<compile_context>
chip_gen: v6e
topology: v6e:2x2x1
jax: 0.10.0
libtpu: 0.0.40
codegen_flags: <defaults>
</compile_context>

<pallas_src>
import functools

import numpy as np
import jax
import jax.numpy as jnp
from jax import lax
from jax.experimental import pallas as pl
from jax.experimental.pallas import tpu as pltpu


# --------------------------------------------------------------------------- #
#                              fused Pallas kernel                             #
# --------------------------------------------------------------------------- #

def _delta_decoder_kernel(
    # ---- data ---------------------------------------------------------------
    last_pos_ref, last_pos_rel_ref, h0_ref, c0_ref,
    sel_j_ref, sel_d_ref, mask_ref,
    # ---- LSTM (spatial_embedding folded into wih / b_lstm) -------------------
    wih_ref, whh_ref, b_lstm_ref,
    # ---- hidden2pos -----------------------------------------------------------
    h2p_w_ref, h2p_b_ref,
    # ---- PoolHiddenNet (spatial_embedding folded into pp1_wrel / pp1_t) ------
    pp1_wrel_ref, pp1_wh_ref, pp1_s_ref, pp1_t_ref,
    pp2_w_ref, pp2_s_ref, pp2_t_ref,
    # ---- decoder MLP ----------------------------------------------------------
    mlp1_wH_ref, mlp1_wP_ref, mlp1_s_ref, mlp1_t_ref,
    mlp2_w_ref, mlp2_s_ref, mlp2_t_ref,
    # ---- outputs --------------------------------------------------------------
    pred_ref, hfin_ref,
    *, seq_len,
):
    f32 = jnp.float32
    B, H = h0_ref.shape

    def step(t, carry):
        h_prev, c_prev, last_pos, x2 = carry     # x2: (B, 2) LSTM 2-D input

        # ---------------- LSTM cell (PyTorch gate order i, f, g, o) ------------
        gates = (jnp.dot(x2, wih_ref[...], preferred_element_type=f32)
                 + jnp.dot(h_prev, whh_ref[...], preferred_element_type=f32)
                 + b_lstm_ref[...])                                    # (B, 4H)
        # transcendentals on the full packed 4H-lane vector (EUP), slice after
        sig = jax.nn.sigmoid(gates)
        tah = jnp.tanh(gates)
        i_g = sig[:, 0 * H:1 * H]
        f_g = sig[:, 1 * H:2 * H]
        g_g = tah[:, 2 * H:3 * H]
        o_g = sig[:, 3 * H:4 * H]
        c_new = f_g * c_prev + i_g * g_g
        h_lstm = o_g * jnp.tanh(c_new)                                 # (B, H)

        # ---------------- hidden2pos -------------------------------------------
        rel_pos = (jnp.dot(h_lstm, h2p_w_ref[...], preferred_element_type=f32)
                   + h2p_b_ref[...])                                   # (B, 2)
        curr_pos = rel_pos + last_pos                                  # (B, 2)

        # ---------------- PoolHiddenNet over all (i, j) pairs -------------------
        # pair row r = j*B + i holds f(pos_j - pos_i, h_j); the expansion to B^2
        # rows happens through constant 0/±1 selection matmuls AFTER the
        # per-agent 512-wide projections.
        P = jnp.dot(curr_pos, pp1_wrel_ref[...], preferred_element_type=f32)  # (B, 512)
        Q = jnp.dot(h_lstm, pp1_wh_ref[...], preferred_element_type=f32)      # (B, 512)
        pre1 = (jnp.dot(sel_d_ref[...], P, preferred_element_type=f32)
                + jnp.dot(sel_j_ref[...], Q, preferred_element_type=f32))     # (B^2, 512)
        h1 = jnp.maximum(pre1 * pp1_s_ref[...] + pp1_t_ref[...], 0.0)
        h2 = jnp.dot(h1, pp2_w_ref[...], preferred_element_type=f32)
        h2 = jnp.maximum(h2 * pp2_s_ref[...] + pp2_t_ref[...], 0.0)           # (B^2, BNECK)
        h2 = h2 + mask_ref[...]                    # -1e30 on cross-group pairs (f32)

        # max over j for each ped i: tree reduction over contiguous (B, BNECK)
        # row blocks (== h2.reshape(B, B, BNECK).max(axis=0)).
        blocks = [h2[j * B:(j + 1) * B, :] for j in range(B)]
        while len(blocks) > 1:
            nxt = [jnp.maximum(blocks[a], blocks[a + 1])
                   for a in range(0, len(blocks) - 1, 2)]
            if len(blocks) % 2:
                nxt.append(blocks[-1])
            blocks = nxt
        pool_h = blocks[0]                                              # (B, BNECK)

        # ---------------- decoder MLP: h <- mlp([h_lstm ; pool_h]) --------------
        dh = (jnp.dot(h_lstm, mlp1_wH_ref[...], preferred_element_type=f32)
              + jnp.dot(pool_h, mlp1_wP_ref[...], preferred_element_type=f32))
        dh = jnp.maximum(dh * mlp1_s_ref[...] + mlp1_t_ref[...], 0.0)          # (B, MLP)
        h_new = jnp.dot(dh, mlp2_w_ref[...], preferred_element_type=f32)
        h_new = jnp.maximum(h_new * mlp2_s_ref[...] + mlp2_t_ref[...], 0.0)    # (B, H)

        # ---------------- per-step output (VMEM; single HBM writeback at end) ----
        pred_ref[pl.ds(t, 1), :, :] = curr_pos[None, :, :]

        # next step: LSTM input is the absolute curr_pos (Delta_Decoder semantics)
        return (h_new, c_new, curr_pos, curr_pos)

    carry0 = (h0_ref[...], c0_ref[...], last_pos_ref[...], last_pos_rel_ref[...])
    h_last, _, _, _ = lax.fori_loop(0, seq_len, step, carry0, unroll=True)
    hfin_ref[...] = h_last


# --------------------------------------------------------------------------- #
#                         parameters & host-side prep                          #
# --------------------------------------------------------------------------- #

def fold_bn(b, gamma, beta, mean, var, eps=1e-5):
    """Fold Linear bias + eval-mode BatchNorm1d into per-feature (scale, shift)."""
    scale = gamma / jnp.sqrt(var + eps)
    shift = beta - mean * scale + b * scale
    return scale, shift


def init_params(key, E, H, MLP, BNECK, PRE):
    keys = iter(jax.random.split(key, 40))
    nk = lambda: next(keys)

    def lin(din, dout, s=0.1):
        w = jax.random.normal(nk(), (din, dout), jnp.float32) * s
        b = jax.random.normal(nk(), (dout,), jnp.float32) * s
        return w, b

    def bn(d):
        gamma = 1.0 + 0.1 * jax.random.normal(nk(), (d,), jnp.float32)
        beta = 0.1 * jax.random.normal(nk(), (d,), jnp.float32)
        mean = 0.1 * jax.random.normal(nk(), (d,), jnp.float32)
        var = jax.random.uniform(nk(), (d,), jnp.float32, minval=0.5, maxval=1.5)
        return gamma, beta, mean, var

    p = {}
    p["se_dec_w"], p["se_dec_b"] = lin(2, E)            # decoder spatial_embedding
    p["h2p_w"], p["h2p_b"] = lin(H, 2)                  # hidden2pos
    wih, bih = lin(E, 4 * H)                            # LSTM(E, H, 1)
    whh, bhh = lin(H, 4 * H)
    p["wih"], p["whh"], p["b_lstm"] = wih, whh, bih + bhh
    p["se_pool_w"], p["se_pool_b"] = lin(2, E)          # PoolHiddenNet.spatial_embedding
    w1, b1 = lin(E + H, PRE); g, bt, m, v = bn(PRE)     # mlp_pre_pool layer 1
    p["pp1_w"] = w1; p["pp1_s"], p["pp1_t"] = fold_bn(b1, g, bt, m, v)
    w2, b2 = lin(PRE, BNECK); g, bt, m, v = bn(BNECK)   # mlp_pre_pool layer 2
    p["pp2_w"] = w2; p["pp2_s"], p["pp2_t"] = fold_bn(b2, g, bt, m, v)
    w3, b3 = lin(H + BNECK, MLP); g, bt, m, v = bn(MLP)   # decoder mlp layer 1
    p["mlp1_w"] = w3; p["mlp1_s"], p["mlp1_t"] = fold_bn(b3, g, bt, m, v)
    w4, b4 = lin(MLP, H); g, bt, m, v = bn(H)             # decoder mlp layer 2
    p["mlp2_w"] = w4; p["mlp2_s"], p["mlp2_t"] = fold_bn(b4, g, bt, m, v)
    return p


_KPARAM_ORDER = (
    "wih", "whh", "b_lstm",
    "h2p_w", "h2p_b",
    "pp1_wrel", "pp1_wh", "pp1_s", "pp1_t",
    "pp2_w", "pp2_s", "pp2_t",
    "mlp1_wH", "mlp1_wP", "mlp1_s", "mlp1_t",
    "mlp2_w", "mlp2_s", "mlp2_t",
)


def prepare_kernel_params(p, E, H):
    """One-time host-side prep: fold both spatial embeddings into downstream
    weights (exact up to FP order), split concat-consuming weights, reshape
    vectors to (1, D)."""
    r = lambda v: v.reshape(1, -1)
    # decoder spatial_embedding folded into the LSTM input weights
    wih2 = p["se_dec_w"] @ p["wih"]                            # (2, 4H)
    b_lstm2 = p["b_lstm"] + p["se_dec_b"] @ p["wih"]           # (4H,)
    # PoolHiddenNet spatial_embedding folded into mlp_pre_pool layer 1
    pp1_wA = p["pp1_w"][:E]                                    # (E, 512)
    pp1_wB = p["pp1_w"][E:]                                    # (H, 512)
    pp1_wrel = p["se_pool_w"] @ pp1_wA                         # (2, 512)
    pp1_t2 = p["pp1_t"] + p["pp1_s"] * (p["se_pool_b"] @ pp1_wA)
    return {
        "wih": wih2, "whh": p["whh"], "b_lstm": r(b_lstm2),
        "h2p_w": p["h2p_w"], "h2p_b": r(p["h2p_b"]),
        "pp1_wrel": pp1_wrel, "pp1_wh": pp1_wB,
        "pp1_s": r(p["pp1_s"]), "pp1_t": r(pp1_t2),
        "pp2_w": p["pp2_w"], "pp2_s": r(p["pp2_s"]), "pp2_t": r(p["pp2_t"]),
        "mlp1_wH": p["mlp1_w"][:H], "mlp1_wP": p["mlp1_w"][H:],
        "mlp1_s": r(p["mlp1_s"]), "mlp1_t": r(p["mlp1_t"]),
        "mlp2_w": p["mlp2_w"], "mlp2_s": r(p["mlp2_s"]), "mlp2_t": r(p["mlp2_t"]),
    }


def _group_constants(seq_start_end, batch, bneck):
    """Trace-time constants derived from the static seq_start_end list.
    Pair row r = j*B + i: sel_j selects row j, sel_d = sel_j - sel_i, mask adds
    -1e30 to cross-group pairs (kept in f32)."""
    assert sum(e - s for s, e in seq_start_end) == batch
    gid = np.full((batch,), -1, np.int64)
    for g, (s, e) in enumerate(seq_start_end):
        gid[s:e] = g
    assert (gid >= 0).all(), "seq_start_end must cover the whole batch"
    eye = np.eye(batch, dtype=np.float32)
    sel_j = np.repeat(eye, batch, axis=0)      # row r=j*B+i -> one-hot(j)
    sel_i = np.tile(eye, (batch, 1))           # row r=j*B+i -> one-hot(i)
    sel_d = sel_j - sel_i
    same = gid[:, None] == gid[None, :]        # symmetric group mask [j, i]
    mask = np.where(same, 0.0, -1e30).astype(np.float32).reshape(batch * batch, 1)
    mask = np.ascontiguousarray(np.broadcast_to(mask, (batch * batch, bneck)))
    return sel_j, sel_d, mask


# --------------------------------------------------------------------------- #
#                                 forward pass                                 #
# --------------------------------------------------------------------------- #

@functools.partial(jax.jit, static_argnames=("seq_start_end", "seq_len"))
def delta_decoder_forward(kparams, last_pos, last_pos_rel, state_tuple,
                          seq_start_end, seq_len):
    """
    Matches Delta_Decoder.forward:
      last_pos, last_pos_rel: (B, 2); state_tuple: (hh, ch) each (1, B, H);
      seq_start_end: static tuple of (start, end).
    Returns (pred_traj (seq_len, B, 2), final hidden state (1, B, H)).
    """
    B = last_pos.shape[0]
    H = kparams["mlp2_w"].shape[1]
    BNECK = kparams["pp2_w"].shape[1]
    h0 = state_tuple[0][0]
    c0 = state_tuple[1][0]

    sel_j, sel_d, mask = _group_constants(seq_start_end, B, BNECK)
    inputs = (last_pos, last_pos_rel, h0, c0,
              jnp.asarray(sel_j), jnp.asarray(sel_d), jnp.asarray(mask)) \
        + tuple(kparams[k] for k in _KPARAM_ORDER)

    vmem = pl.BlockSpec(memory_space=pltpu.MemorySpace.VMEM)   # whole array, VMEM-resident
    pred, h_fin = pl.pallas_call(
        functools.partial(_delta_decoder_kernel, seq_len=seq_len),
        out_shape=(jax.ShapeDtypeStruct((seq_len, B, 2), jnp.float32),
                   jax.ShapeDtypeStruct((B, H), jnp.float32)),
        in_specs=[vmem] * len(inputs),
        out_specs=(vmem, vmem),
    )(*inputs)
    return pred, h_fin[None]


# --------------------------------------------------------------------------- #
#                  pure-JAX reference (mirrors the PyTorch module)             #
# --------------------------------------------------------------------------- #

def reference_forward(p, last_pos, last_pos_rel, state_tuple, seq_start_end, seq_len):
    h = state_tuple[0][0]
    c = state_tuple[1][0]
    H = h.shape[1]
    preds = []
    dec_in = last_pos_rel @ p["se_dec_w"] + p["se_dec_b"]
    for _ in range(seq_len):
        gates = dec_in @ p["wih"] + h @ p["whh"] + p["b_lstm"]
        i = jax.nn.sigmoid(gates[:, 0 * H:1 * H])
        f = jax.nn.sigmoid(gates[:, 1 * H:2 * H])
        g = jnp.tanh(gates[:, 2 * H:3 * H])
        o = jax.nn.sigmoid(gates[:, 3 * H:4 * H])
        c = f * c + i * g
        h_lstm = o * jnp.tanh(c)
        rel_pos = h_lstm @ p["h2p_w"] + p["h2p_b"]
        curr_pos = rel_pos + last_pos
        chunks = []
        for (s, e) in seq_start_end:
            n = e - s
            ch_ = h_lstm[s:e]
            cp_ = curr_pos[s:e]
            pos1 = jnp.tile(cp_, (n, 1))
            pos2 = jnp.repeat(cp_, n, axis=0)
            rel = pos1 - pos2
            remb = rel @ p["se_pool_w"] + p["se_pool_b"]
            mlp_in = jnp.concatenate([remb, jnp.tile(ch_, (n, 1))], axis=1)
            h1 = jnp.maximum((mlp_in @ p["pp1_w"]) * p["pp1_s"] + p["pp1_t"], 0.0)
            h2 = jnp.maximum((h1 @ p["pp2_w"]) * p["pp2_s"] + p["pp2_t"], 0.0)
            chunks.append(jnp.max(h2.reshape(n, n, -1), axis=1))
        pool_h = jnp.concatenate(chunks, axis=0)
        dh_in = jnp.concatenate([h_lstm, pool_h], axis=1)
        dh = jnp.maximum((dh_in @ p["mlp1_w"]) * p["mlp1_s"] + p["mlp1_t"], 0.0)
        h = jnp.maximum((dh @ p["mlp2_w"]) * p["mlp2_s"] + p["mlp2_t"], 0.0)
        dec_in = curr_pos @ p["se_dec_w"] + p["se_dec_b"]
        preds.append(curr_pos)
        last_pos = curr_pos
    return jnp.stack(preds, axis=0), h[None]


# --------------------------------------------------------------------------- #
#                                     main                                     #
# --------------------------------------------------------------------------- #

if __name__ == "__main__":
    E, H = 32, 32              # embedding_dim, h_dim
    MLP, BNECK = 64, 64        # mlp_dim, bottleneck_dim
    PRE = 512                  # hidden width of mlp_pre_pool (hard-coded 512 in module)
    SEQ_LEN = 4
    batch = 4
    seq_start_end = ((0, 2), (2, 4))   # two sequences of 2 pedestrians each (static)

    key = jax.random.PRNGKey(0)
    kroot, k1, k2, k3, k4 = jax.random.split(key, 5)
    raw_params = init_params(kroot, E, H, MLP, BNECK, PRE)
    kernel_params = prepare_kernel_params(raw_params, E, H)

    last_pos = jax.random.normal(k1, (batch, 2), jnp.float32)
    last_pos_rel = jax.random.normal(k2, (batch, 2), jnp.float32)
    hh = jax.random.normal(k3, (1, batch, H), jnp.float32)
    ch = jax.random.normal(k4, (1, batch, H), jnp.float32)

    pred_traj, final_h = delta_decoder_forward(
        kernel_params, last_pos, last_pos_rel, (hh, ch), seq_start_end, SEQ_LEN)
    jax.block_until_ready((pred_traj, final_h))

    # correctness check against a pure-JAX mirror of the PyTorch module
    ref_pred, ref_h = reference_forward(
        raw_params, last_pos, last_pos_rel, (hh, ch), seq_start_end, SEQ_LEN)
    np.testing.assert_allclose(np.asarray(pred_traj), np.asarray(ref_pred),
                               rtol=2e-3, atol=2e-3)
    np.testing.assert_allclose(np.asarray(final_h), np.asarray(ref_h),
                               rtol=2e-3, atol=2e-3)

    assert pred_traj.shape == (SEQ_LEN, batch, 2)
    assert final_h.shape == (1, batch, H)
    print("KERNEL_OK")
</pallas_src>

<mosaic_0001>
module attributes {stable_mosaic.version = 11 : i64} {
  func.func @_delta_decoder_kernel(%arg0: memref<4x2xf32, #tpu.memory_space<vmem>>, %arg1: memref<4x2xf32, #tpu.memory_space<vmem>>, %arg2: memref<4x32xf32, #tpu.memory_space<vmem>>, %arg3: memref<4x32xf32, #tpu.memory_space<vmem>>, %arg4: memref<16x4xf32, #tpu.memory_space<vmem>>, %arg5: memref<16x4xf32, #tpu.memory_space<vmem>>, %arg6: memref<16x64xf32, #tpu.memory_space<vmem>>, %arg7: memref<2x128xf32, #tpu.memory_space<vmem>>, %arg8: memref<32x128xf32, #tpu.memory_space<vmem>>, %arg9: memref<1x128xf32, #tpu.memory_space<vmem>>, %arg10: memref<32x2xf32, #tpu.memory_space<vmem>>, %arg11: memref<1x2xf32, #tpu.memory_space<vmem>>, %arg12: memref<2x512xf32, #tpu.memory_space<vmem>>, %arg13: memref<32x512xf32, #tpu.memory_space<vmem>>, %arg14: memref<1x512xf32, #tpu.memory_space<vmem>>, %arg15: memref<1x512xf32, #tpu.memory_space<vmem>>, %arg16: memref<512x64xf32, #tpu.memory_space<vmem>>, %arg17: memref<1x64xf32, #tpu.memory_space<vmem>>, %arg18: memref<1x64xf32, #tpu.memory_space<vmem>>, %arg19: memref<32x64xf32, #tpu.memory_space<vmem>>, %arg20: memref<64x64xf32, #tpu.memory_space<vmem>>, %arg21: memref<1x64xf32, #tpu.memory_space<vmem>>, %arg22: memref<1x64xf32, #tpu.memory_space<vmem>>, %arg23: memref<64x32xf32, #tpu.memory_space<vmem>>, %arg24: memref<1x32xf32, #tpu.memory_space<vmem>>, %arg25: memref<1x32xf32, #tpu.memory_space<vmem>>, %arg26: memref<4x4x2xf32, #tpu.memory_space<vmem>>, %arg27: memref<4x32xf32, #tpu.memory_space<vmem>>) attributes {dimension_semantics = [], scalar_prefetch = 0 : i64, scratch_operands = 0 : i64, tpu.core_type = #tpu.core_type<tc>} {
    %c0 = arith.constant 0 : index
    %c0_0 = arith.constant 0 : index
    %0 = vector.load %arg2[%c0, %c0_0] : memref<4x32xf32, #tpu.memory_space<vmem>>, vector<4x32xf32>
    %c0_1 = arith.constant 0 : index
    %c0_2 = arith.constant 0 : index
    %1 = vector.load %arg3[%c0_1, %c0_2] : memref<4x32xf32, #tpu.memory_space<vmem>>, vector<4x32xf32>
    %c0_3 = arith.constant 0 : index
    %c0_4 = arith.constant 0 : index
    %2 = vector.load %arg0[%c0_3, %c0_4] : memref<4x2xf32, #tpu.memory_space<vmem>>, vector<4x2xf32>
    %c0_5 = arith.constant 0 : index
    %c0_6 = arith.constant 0 : index
    %3 = vector.load %arg1[%c0_5, %c0_6] : memref<4x2xf32, #tpu.memory_space<vmem>>, vector<4x2xf32>
    %c0_i32 = arith.constant 0 : i32
    %c0_7 = arith.constant 0 : index
    %c0_8 = arith.constant 0 : index
    %4 = vector.load %arg7[%c0_7, %c0_8] : memref<2x128xf32, #tpu.memory_space<vmem>>, vector<2x128xf32>
    %cst = arith.constant dense<0.000000e+00> : vector<4x128xf32>
    %5 = tpu.matmul %3, %4, %cst {dimension_numbers = #tpu.dot_dimension_numbers<[1], [0], [0], [1], [0, 0, 1, 1], [], []>} : vector<4x2xf32>, vector<2x128xf32>, vector<4x128xf32> -> vector<4x128xf32>
    %c0_9 = arith.constant 0 : index
    %c0_10 = arith.constant 0 : index
    %6 = vector.load %arg8[%c0_9, %c0_10] : memref<32x128xf32, #tpu.memory_space<vmem>>, vector<32x128xf32>
    %cst_11 = arith.constant dense<0.000000e+00> : vector<4x128xf32>
    %7 = tpu.matmul %0, %6, %cst_11 {dimension_numbers = #tpu.dot_dimension_numbers<[1], [0], [0], [1], [0, 0, 1, 1], [], []>} : vector<4x32xf32>, vector<32x128xf32>, vector<4x128xf32> -> vector<4x128xf32>
    %8 = arith.addf %5, %7 : vector<4x128xf32>
    %c0_12 = arith.constant 0 : index
    %c0_13 = arith.constant 0 : index
    %9 = vector.load %arg9[%c0_12, %c0_13] : memref<1x128xf32, #tpu.memory_space<vmem>>, vector<1x128xf32>
    %10 = vector.broadcast %9 : vector<1x128xf32> to vector<4x128xf32>
    %11 = arith.addf %8, %10 : vector<4x128xf32>
    %12 = arith.negf %11 : vector<4x128xf32>
    %13 = math.exp %12 : vector<4x128xf32>
    %cst_14 = arith.constant 1.000000e+00 : f32
    %14 = vector.broadcast %cst_14 : f32 to vector<4x128xf32>
    %15 = arith.addf %14, %13 : vector<4x128xf32>
    %16 = arith.divf %14, %15 : vector<4x128xf32>
    %17 = math.tanh %11 : vector<4x128xf32>
    %18 = vector.extract_strided_slice %16 {offsets = [0, 0], sizes = [4, 32], strides = [1, 1]} : vector<4x128xf32> to vector<4x32xf32>
    %19 = vector.extract_strided_slice %16 {offsets = [0, 32], sizes = [4, 32], strides = [1, 1]} : vector<4x128xf32> to vector<4x32xf32>
    %20 = vector.extract_strided_slice %17 {offsets = [0, 64], sizes = [4, 32], strides = [1, 1]} : vector<4x128xf32> to vector<4x32xf32>
    %21 = vector.extract_strided_slice %16 {offsets = [0, 96], sizes = [4, 32], strides = [1, 1]} : vector<4x128xf32> to vector<4x32xf32>
    %22 = arith.mulf %19, %1 : vector<4x32xf32>
    %23 = arith.mulf %18, %20 : vector<4x32xf32>
    %24 = arith.addf %22, %23 : vector<4x32xf32>
    %25 = math.tanh %24 : vector<4x32xf32>
    %26 = arith.mulf %21, %25 : vector<4x32xf32>
    %c0_15 = arith.constant 0 : index
    %c0_16 = arith.constant 0 : index
    %27 = vector.load %arg10[%c0_15, %c0_16] : memref<32x2xf32, #tpu.memory_space<vmem>>, vector<32x2xf32>
    %cst_17 = arith.constant dense<0.000000e+00> : vector<4x2xf32>
    %28 = tpu.matmul %26, %27, %cst_17 {dimension_numbers = #tpu.dot_dimension_numbers<[1], [0], [0], [1], [0, 0, 1, 1], [], []>} : vector<4x32xf32>, vector<32x2xf32>, vector<4x2xf32> -> vector<4x2xf32>
    %c0_18 = arith.constant 0 : index
    %c0_19 = arith.constant 0 : index
    %29 = vector.load %arg11[%c0_18, %c0_19] : memref<1x2xf32, #tpu.memory_space<vmem>>, vector<1x2xf32>
    %30 = vector.broadcast %29 : vector<1x2xf32> to vector<4x2xf32>
    %31 = arith.addf %28, %30 : vector<4x2xf32>
    %32 = arith.addf %31, %2 : vector<4x2xf32>
    %c0_20 = arith.constant 0 : index
    %c0_21 = arith.constant 0 : index
    %33 = vector.load %arg12[%c0_20, %c0_21] : memref<2x512xf32, #tpu.memory_space<vmem>>, vector<2x512xf32>
    %cst_22 = arith.constant dense<0.000000e+00> : vector<4x512xf32>
    %34 = tpu.matmul %32, %33, %cst_22 {dimension_numbers = #tpu.dot_dimension_numbers<[1], [0], [0], [1], [0, 0, 1, 1], [], []>} : vector<4x2xf32>, vector<2x512xf32>, vector<4x512xf32> -> vector<4x512xf32>
    %c0_23 = arith.constant 0 : index
    %c0_24 = arith.constant 0 : index
    %35 = vector.load %arg13[%c0_23, %c0_24] : memref<32x512xf32, #tpu.memory_space<vmem>>, vector<32x512xf32>
    %cst_25 = arith.constant dense<0.000000e+00> : vector<4x512xf32>
    %36 = tpu.matmul %26, %35, %cst_25 {dimension_numbers = #tpu.dot_dimension_numbers<[1], [0], [0], [1], [0, 0, 1, 1], [], []>} : vector<4x32xf32>, vector<32x512xf32>, vector<4x512xf32> -> vector<4x512xf32>
    %c0_26 = arith.constant 0 : index
    %c0_27 = arith.constant 0 : index
    %37 = vector.load %arg5[%c0_26, %c0_27] : memref<16x4xf32, #tpu.memory_space<vmem>>, vector<16x4xf32>
    %cst_28 = arith.constant dense<0.000000e+00> : vector<16x512xf32>
    %38 = tpu.matmul %37, %34, %cst_28 {dimension_numbers = #tpu.dot_dimension_numbers<[1], [0], [0], [1], [0, 0, 1, 1], [], []>} : vector<16x4xf32>, vector<4x512xf32>, vector<16x512xf32> -> vector<16x512xf32>
    %c0_29 = arith.constant 0 : index
    %c0_30 = arith.constant 0 : index
    %39 = vector.load %arg4[%c0_29, %c0_30] : memref<16x4xf32, #tpu.memory_space<vmem>>, vector<16x4xf32>
    %cst_31 = arith.constant dense<0.000000e+00> : vector<16x512xf32>
    %40 = tpu.matmul %39, %36, %cst_31 {dimension_numbers = #tpu.dot_dimension_numbers<[1], [0], [0], [1], [0, 0, 1, 1], [], []>} : vector<16x4xf32>, vector<4x512xf32>, vector<16x512xf32> -> vector<16x512xf32>
    %41 = arith.addf %38, %40 : vector<16x512xf32>
    %c0_32 = arith.constant 0 : index
    %c0_33 = arith.constant 0 : index
    %42 = vector.load %arg14[%c0_32, %c0_33] : memref<1x512xf32, #tpu.memory_space<vmem>>, vector<1x512xf32>
    %43 = vector.broadcast %42 : vector<1x512xf32> to vector<16x512xf32>
    %44 = arith.mulf %41, %43 : vector<16x512xf32>
    %c0_34 = arith.constant 0 : index
    %c0_35 = arith.constant 0 : index
    %45 = vector.load %arg15[%c0_34, %c0_35] : memref<1x512xf32, #tpu.memory_space<vmem>>, vector<1x512xf32>
    %46 = vector.broadcast %45 : vector<1x512xf32> to vector<16x512xf32>
    %47 = arith.addf %44, %46 : vector<16x512xf32>
    %cst_36 = arith.constant 0.000000e+00 : f32
    %48 = vector.broadcast %cst_36 : f32 to vector<16x512xf32>
    %49 = arith.maximumf %47, %48 : vector<16x512xf32>
    %c0_37 = arith.constant 0 : index
    %c0_38 = arith.constant 0 : index
    %50 = vector.load %arg16[%c0_37, %c0_38] : memref<512x64xf32, #tpu.memory_space<vmem>>, vector<512x64xf32>
    %cst_39 = arith.constant dense<0.000000e+00> : vector<16x64xf32>
    %51 = tpu.matmul %49, %50, %cst_39 {dimension_numbers = #tpu.dot_dimension_numbers<[1], [0], [0], [1], [0, 0, 1, 1], [], []>} : vector<16x512xf32>, vector<512x64xf32>, vector<16x64xf32> -> vector<16x64xf32>
    %c0_40 = arith.constant 0 : index
    %c0_41 = arith.constant 0 : index
    %52 = vector.load %arg17[%c0_40, %c0_41] : memref<1x64xf32, #tpu.memory_space<vmem>>, vector<1x64xf32>
    %53 = vector.broadcast %52 : vector<1x64xf32> to vector<16x64xf32>
    %54 = arith.mulf %51, %53 : vector<16x64xf32>
    %c0_42 = arith.constant 0 : index
    %c0_43 = arith.constant 0 : index
    %55 = vector.load %arg18[%c0_42, %c0_43] : memref<1x64xf32, #tpu.memory_space<vmem>>, vector<1x64xf32>
    %56 = vector.broadcast %55 : vector<1x64xf32> to vector<16x64xf32>
    %57 = arith.addf %54, %56 : vector<16x64xf32>
    %cst_44 = arith.constant 0.000000e+00 : f32
    %58 = vector.broadcast %cst_44 : f32 to vector<16x64xf32>
    %59 = arith.maximumf %57, %58 : vector<16x64xf32>
    %c0_45 = arith.constant 0 : index
    %c0_46 = arith.constant 0 : index
    %60 = vector.load %arg6[%c0_45, %c0_46] : memref<16x64xf32, #tpu.memory_space<vmem>>, vector<16x64xf32>
    %61 = arith.addf %59, %60 : vector<16x64xf32>
    %62 = vector.extract_strided_slice %61 {offsets = [0, 0], sizes = [4, 64], strides = [1, 1]} : vector<16x64xf32> to vector<4x64xf32>
    %63 = vector.extract_strided_slice %61 {offsets = [4, 0], sizes = [4, 64], strides = [1, 1]} : vector<16x64xf32> to vector<4x64xf32>
    %64 = vector.extract_strided_slice %61 {offsets = [8, 0], sizes = [4, 64], strides = [1, 1]} : vector<16x64xf32> to vector<4x64xf32>
    %65 = vector.extract_strided_slice %61 {offsets = [12, 0], sizes = [4, 64], strides = [1, 1]} : vector<16x64xf32> to vector<4x64xf32>
    %66 = arith.maximumf %62, %63 : vector<4x64xf32>
    %67 = arith.maximumf %64, %65 : vector<4x64xf32>
    %68 = arith.maximumf %66, %67 : vector<4x64xf32>
    %c0_47 = arith.constant 0 : index
    %c0_48 = arith.constant 0 : index
    %69 = vector.load %arg19[%c0_47, %c0_48] : memref<32x64xf32, #tpu.memory_space<vmem>>, vector<32x64xf32>
    %cst_49 = arith.constant dense<0.000000e+00> : vector<4x64xf32>
    %70 = tpu.matmul %26, %69, %cst_49 {dimension_numbers = #tpu.dot_dimension_numbers<[1], [0], [0], [1], [0, 0, 1, 1], [], []>} : vector<4x32xf32>, vector<32x64xf32>, vector<4x64xf32> -> vector<4x64xf32>
    %c0_50 = arith.constant 0 : index
    %c0_51 = arith.constant 0 : index
    %71 = vector.load %arg20[%c0_50, %c0_51] : memref<64x64xf32, #tpu.memory_space<vmem>>, vector<64x64xf32>
    %cst_52 = arith.constant dense<0.000000e+00> : vector<4x64xf32>
    %72 = tpu.matmul %68, %71, %cst_52 {dimension_numbers = #tpu.dot_dimension_numbers<[1], [0], [0], [1], [0, 0, 1, 1], [], []>} : vector<4x64xf32>, vector<64x64xf32>, vector<4x64xf32> -> vector<4x64xf32>
    %73 = arith.addf %70, %72 : vector<4x64xf32>
    %c0_53 = arith.constant 0 : index
    %c0_54 = arith.constant 0 : index
    %74 = vector.load %arg21[%c0_53, %c0_54] : memref<1x64xf32, #tpu.memory_space<vmem>>, vector<1x64xf32>
    %75 = vector.broadcast %74 : vector<1x64xf32> to vector<4x64xf32>
    %76 = arith.mulf %73, %75 : vector<4x64xf32>
    %c0_55 = arith.constant 0 : index
    %c0_56 = arith.constant 0 : index
    %77 = vector.load %arg22[%c0_55, %c0_56] : memref<1x64xf32, #tpu.memory_space<vmem>>, vector<1x64xf32>
    %78 = vector.broadcast %77 : vector<1x64xf32> to vector<4x64xf32>
    %79 = arith.addf %76, %78 : vector<4x64xf32>
    %cst_57 = arith.constant 0.000000e+00 : f32
    %80 = vector.broadcast %cst_57 : f32 to vector<4x64xf32>
    %81 = arith.maximumf %79, %80 : vector<4x64xf32>
    %c0_58 = arith.constant 0 : index
    %c0_59 = arith.constant 0 : index
    %82 = vector.load %arg23[%c0_58, %c0_59] : memref<64x32xf32, #tpu.memory_space<vmem>>, vector<64x32xf32>
    %cst_60 = arith.constant dense<0.000000e+00> : vector<4x32xf32>
    %83 = tpu.matmul %81, %82, %cst_60 {dimension_numbers = #tpu.dot_dimension_numbers<[1], [0], [0], [1], [0, 0, 1, 1], [], []>} : vector<4x64xf32>, vector<64x32xf32>, vector<4x32xf32> -> vector<4x32xf32>
    %c0_61 = arith.constant 0 : index
    %c0_62 = arith.constant 0 : index
    %84 = vector.load %arg24[%c0_61, %c0_62] : memref<1x32xf32, #tpu.memory_space<vmem>>, vector<1x32xf32>
    %85 = vector.broadcast %84 : vector<1x32xf32> to vector<4x32xf32>
    %86 = arith.mulf %83, %85 : vector<4x32xf32>
    %c0_63 = arith.constant 0 : index
    %c0_64 = arith.constant 0 : index
    %87 = vector.load %arg25[%c0_63, %c0_64] : memref<1x32xf32, #tpu.memory_space<vmem>>, vector<1x32xf32>
    %88 = vector.broadcast %87 : vector<1x32xf32> to vector<4x32xf32>
    %89 = arith.addf %86, %88 : vector<4x32xf32>
    %cst_65 = arith.constant 0.000000e+00 : f32
    %90 = vector.broadcast %cst_65 : f32 to vector<4x32xf32>
    %91 = arith.maximumf %89, %90 : vector<4x32xf32>
    %92 = vector.shape_cast %32 : vector<4x2xf32> to vector<1x4x2xf32>
    %93 = arith.index_cast %c0_i32 : i32 to index
    %c0_66 = arith.constant 0 : index
    %c0_67 = arith.constant 0 : index
    %94 = vector.load %arg26[%93, %c0_66, %c0_67] : memref<4x4x2xf32, #tpu.memory_space<vmem>>, vector<1x4x2xf32>
    tpu.vector_store %arg26[%93, %c0_66, %c0_67], %92 {strides = array<i32>} : memref<4x4x2xf32, #tpu.memory_space<vmem>>, vector<1x4x2xf32>,
    %c1_i32 = arith.constant 1 : i32
    %c0_68 = arith.constant 0 : index
    %c0_69 = arith.constant 0 : index
    %95 = vector.load %arg7[%c0_68, %c0_69] : memref<2x128xf32, #tpu.memory_space<vmem>>, vector<2x128xf32>
    %cst_70 = arith.constant dense<0.000000e+00> : vector<4x128xf32>
    %96 = tpu.matmul %32, %95, %cst_70 {dimension_numbers = #tpu.dot_dimension_numbers<[1], [0], [0], [1], [0, 0, 1, 1], [], []>} : vector<4x2xf32>, vector<2x128xf32>, vector<4x128xf32> -> vector<4x128xf32>
    %c0_71 = arith.constant 0 : index
    %c0_72 = arith.constant 0 : index
    %97 = vector.load %arg8[%c0_71, %c0_72] : memref<32x128xf32, #tpu.memory_space<vmem>>, vector<32x128xf32>
    %cst_73 = arith.constant dense<0.000000e+00> : vector<4x128xf32>
    %98 = tpu.matmul %91, %97, %cst_73 {dimension_numbers = #tpu.dot_dimension_numbers<[1], [0], [0], [1], [0, 0, 1, 1], [], []>} : vector<4x32xf32>, vector<32x128xf32>, vector<4x128xf32> -> vector<4x128xf32>
    %99 = arith.addf %96, %98 : vector<4x128xf32>
    %c0_74 = arith.constant 0 : index
    %c0_75 = arith.constant 0 : index
    %100 = vector.load %arg9[%c0_74, %c0_75] : memref<1x128xf32, #tpu.memory_space<vmem>>, vector<1x128xf32>
    %101 = vector.broadcast %100 : vector<1x128xf32> to vector<4x128xf32>
    %102 = arith.addf %99, %101 : vector<4x128xf32>
    %103 = arith.negf %102 : vector<4x128xf32>
    %104 = math.exp %103 : vector<4x128xf32>
    %cst_76 = arith.constant 1.000000e+00 : f32
    %105 = vector.broadcast %cst_76 : f32 to vector<4x128xf32>
    %106 = arith.addf %105, %104 : vector<4x128xf32>
    %107 = arith.divf %105, %106 : vector<4x128xf32>
    %108 = math.tanh %102 : vector<4x128xf32>
    %109 = vector.extract_strided_slice %107 {offsets = [0, 0], sizes = [4, 32], strides = [1, 1]} : vector<4x128xf32> to vector<4x32xf32>
    %110 = vector.extract_strided_slice %107 {offsets = [0, 32], sizes = [4, 32], strides = [1, 1]} : vector<4x128xf32> to vector<4x32xf32>
    %111 = vector.extract_strided_slice %108 {offsets = [0, 64], sizes = [4, 32], strides = [1, 1]} : vector<4x128xf32> to vector<4x32xf32>
    %112 = vector.extract_strided_slice %107 {offsets = [0, 96], sizes = [4, 32], strides = [1, 1]} : vector<4x128xf32> to vector<4x32xf32>
    %113 = arith.mulf %110, %24 : vector<4x32xf32>
    %114 = arith.mulf %109, %111 : vector<4x32xf32>
    %115 = arith.addf %113, %114 : vector<4x32xf32>
    %116 = math.tanh %115 : vector<4x32xf32>
    %117 = arith.mulf %112, %116 : vector<4x32xf32>
    %c0_77 = arith.constant 0 : index
    %c0_78 = arith.constant 0 : index
    %118 = vector.load %arg10[%c0_77, %c0_78] : memref<32x2xf32, #tpu.memory_space<vmem>>, vector<32x2xf32>
    %cst_79 = arith.constant dense<0.000000e+00> : vector<4x2xf32>
    %119 = tpu.matmul %117, %118, %cst_79 {dimension_numbers = #tpu.dot_dimension_numbers<[1], [0], [0], [1], [0, 0, 1, 1], [], []>} : vector<4x32xf32>, vector<32x2xf32>, vector<4x2xf32> -> vector<4x2xf32>
    %c0_80 = arith.constant 0 : index
    %c0_81 = arith.constant 0 : index
    %120 = vector.load %arg11[%c0_80, %c0_81] : memref<1x2xf32, #tpu.memory_space<vmem>>, vector<1x2xf32>
    %121 = vector.broadcast %120 : vector<1x2xf32> to vector<4x2xf32>
    %122 = arith.addf %119, %121 : vector<4x2xf32>
    %123 = arith.addf %122, %32 : vector<4x2xf32>
    %c0_82 = arith.constant 0 : index
    %c0_83 = arith.constant 0 : index
    %124 = vector.load %arg12[%c0_82, %c0_83] : memref<2x512xf32, #tpu.memory_space<vmem>>, vector<2x512xf32>
    %cst_84 = arith.constant dense<0.000000e+00> : vector<4x512xf32>
    %125 = tpu.matmul %123, %124, %cst_84 {dimension_numbers = #tpu.dot_dimension_numbers<[1], [0], [0], [1], [0, 0, 1, 1], [], []>} : vector<4x2xf32>, vector<2x512xf32>, vector<4x512xf32> -> vector<4x512xf32>
    %c0_85 = arith.constant 0 : index
    %c0_86 = arith.constant 0 : index
    %126 = vector.load %arg13[%c0_85, %c0_86] : memref<32x512xf32, #tpu.memory_space<vmem>>, vector<32x512xf32>
    %cst_87 = arith.constant dense<0.000000e+00> : vector<4x512xf32>
    %127 = tpu.matmul %117, %126, %cst_87 {dimension_numbers = #tpu.dot_dimension_numbers<[1], [0], [0], [1], [0, 0, 1, 1], [], []>} : vector<4x32xf32>, vector<32x512xf32>, vector<4x512xf32> -> vector<4x512xf32>
    %c0_88 = arith.constant 0 : index
    %c0_89 = arith.constant 0 : index
    %128 = vector.load %arg5[%c0_88, %c0_89] : memref<16x4xf32, #tpu.memory_space<vmem>>, vector<16x4xf32>
    %cst_90 = arith.constant dense<0.000000e+00> : vector<16x512xf32>
    %129 = tpu.matmul %128, %125, %cst_90 {dimension_numbers = #tpu.dot_dimension_numbers<[1], [0], [0], [1], [0, 0, 1, 1], [], []>} : vector<16x4xf32>, vector<4x512xf32>, vector<16x512xf32> -> vector<16x512xf32>
    %c0_91 = arith.constant 0 : index
    %c0_92 = arith.constant 0 : index
    %130 = vector.load %arg4[%c0_91, %c0_92] : memref<16x4xf32, #tpu.memory_space<vmem>>, vector<16x4xf32>
    %cst_93 = arith.constant dense<0.000000e+00> : vector<16x512xf32>
    %131 = tpu.matmul %130, %127, %cst_93 {dimension_numbers = #tpu.dot_dimension_numbers<[1], [0], [0], [1], [0, 0, 1, 1], [], []>} : vector<16x4xf32>, vector<4x512xf32>, vector<16x512xf32> -> vector<16x512xf32>
    %132 = arith.addf %129, %131 : vector<16x512xf32>
    %c0_94 = arith.constant 0 : index
    %c0_95 = arith.constant 0 : index
    %133 = vector.load %arg14[%c0_94, %c0_95] : memref<1x512xf32, #tpu.memory_space<vmem>>, vector<1x512xf32>
    %134 = vector.broadcast %133 : vector<1x512xf32> to vector<16x512xf32>
    %135 = arith.mulf %132, %134 : vector<16x512xf32>
    %c0_96 = arith.constant 0 : index
    %c0_97 = arith.constant 0 : index
    %136 = vector.load %arg15[%c0_96, %c0_97] : memref<1x512xf32, #tpu.memory_space<vmem>>, vector<1x512xf32>
    %137 = vector.broadcast %136 : vector<1x512xf32> to vector<16x512xf32>
    %138 = arith.addf %135, %137 : vector<16x512xf32>
    %cst_98 = arith.constant 0.000000e+00 : f32
    %139 = vector.broadcast %cst_98 : f32 to vector<16x512xf32>
    %140 = arith.maximumf %138, %139 : vector<16x512xf32>
    %c0_99 = arith.constant 0 : index
    %c0_100 = arith.constant 0 : index
    %141 = vector.load %arg16[%c0_99, %c0_100] : memref<512x64xf32, #tpu.memory_space<vmem>>, vector<512x64xf32>
    %cst_101 = arith.constant dense<0.000000e+00> : vector<16x64xf32>
    %142 = tpu.matmul %140, %141, %cst_101 {dimension_numbers = #tpu.dot_dimension_numbers<[1], [0], [0], [1], [0, 0, 1, 1], [], []>} : vector<16x512xf32>, vector<512x64xf32>, vector<16x64xf32> -> vector<16x64xf32>
    %c0_102 = arith.constant 0 : index
    %c0_103 = arith.constant 0 : index
    %143 = vector.load %arg17[%c0_102, %c0_103] : memref<1x64xf32, #tpu.memory_space<vmem>>, vector<1x64xf32>
    %144 = vector.broadcast %143 : vector<1x64xf32> to vector<16x64xf32>
    %145 = arith.mulf %142, %144 : vector<16x64xf32>
    %c0_104 = arith.constant 0 : index
    %c0_105 = arith.constant 0 : index
    %146 = vector.load %arg18[%c0_104, %c0_105] : memref<1x64xf32, #tpu.memory_space<vmem>>, vector<1x64xf32>
    %147 = vector.broadcast %146 : vector<1x64xf32> to vector<16x64xf32>
    %148 = arith.addf %145, %147 : vector<16x64xf32>
    %cst_106 = arith.constant 0.000000e+00 : f32
    %149 = vector.broadcast %cst_106 : f32 to vector<16x64xf32>
    %150 = arith.maximumf %148, %149 : vector<16x64xf32>
    %c0_107 = arith.constant 0 : index
    %c0_108 = arith.constant 0 : index
    %151 = vector.load %arg6[%c0_107, %c0_108] : memref<16x64xf32, #tpu.memory_space<vmem>>, vector<16x64xf32>
    %152 = arith.addf %150, %151 : vector<16x64xf32>
    %153 = vector.extract_strided_slice %152 {offsets = [0, 0], sizes = [4, 64], strides = [1, 1]} : vector<16x64xf32> to vector<4x64xf32>
    %154 = vector.extract_strided_slice %152 {offsets = [4, 0], sizes = [4, 64], strides = [1, 1]} : vector<16x64xf32> to vector<4x64xf32>
    %155 = vector.extract_strided_slice %152 {offsets = [8, 0], sizes = [4, 64], strides = [1, 1]} : vector<16x64xf32> to vector<4x64xf32>
    %156 = vector.extract_strided_slice %152 {offsets = [12, 0], sizes = [4, 64], strides = [1, 1]} : vector<16x64xf32> to vector<4x64xf32>
    %157 = arith.maximumf %153, %154 : vector<4x64xf32>
    %158 = arith.maximumf %155, %156 : vector<4x64xf32>
    %159 = arith.maximumf %157, %158 : vector<4x64xf32>
    %c0_109 = arith.constant 0 : index
    %c0_110 = arith.constant 0 : index
    %160 = vector.load %arg19[%c0_109, %c0_110] : memref<32x64xf32, #tpu.memory_space<vmem>>, vector<32x64xf32>
    %cst_111 = arith.constant dense<0.000000e+00> : vector<4x64xf32>
    %161 = tpu.matmul %117, %160, %cst_111 {dimension_numbers = #tpu.dot_dimension_numbers<[1], [0], [0], [1], [0, 0, 1, 1], [], []>} : vector<4x32xf32>, vector<32x64xf32>, vector<4x64xf32> -> vector<4x64xf32>
    %c0_112 = arith.constant 0 : index
    %c0_113 = arith.constant 0 : index
    %162 = vector.load %arg20[%c0_112, %c0_113] : memref<64x64xf32, #tpu.memory_space<vmem>>, vector<64x64xf32>
    %cst_114 = arith.constant dense<0.000000e+00> : vector<4x64xf32>
    %163 = tpu.matmul %159, %162, %cst_114 {dimension_numbers = #tpu.dot_dimension_numbers<[1], [0], [0], [1], [0, 0, 1, 1], [], []>} : vector<4x64xf32>, vector<64x64xf32>, vector<4x64xf32> -> vector<4x64xf32>
    %164 = arith.addf %161, %163 : vector<4x64xf32>
    %c0_115 = arith.constant 0 : index
    %c0_116 = arith.constant 0 : index
    %165 = vector.load %arg21[%c0_115, %c0_116] : memref<1x64xf32, #tpu.memory_space<vmem>>, vector<1x64xf32>
    %166 = vector.broadcast %165 : vector<1x64xf32> to vector<4x64xf32>
    %167 = arith.mulf %164, %166 : vector<4x64xf32>
    %c0_117 = arith.constant 0 : index
    %c0_118 = arith.constant 0 : index
    %168 = vector.load %arg22[%c0_117, %c0_118] : memref<1x64xf32, #tpu.memory_space<vmem>>, vector<1x64xf32>
    %169 = vector.broadcast %168 : vector<1x64xf32> to vector<4x64xf32>
    %170 = arith.addf %167, %169 : vector<4x64xf32>
    %cst_119 = arith.constant 0.000000e+00 : f32
    %171 = vector.broadcast %cst_119 : f32 to vector<4x64xf32>
    %172 = arith.maximumf %170, %171 : vector<4x64xf32>
    %c0_120 = arith.constant 0 : index
    %c0_121 = arith.constant 0 : index
    %173 = vector.load %arg23[%c0_120, %c0_121] : memref<64x32xf32, #tpu.memory_space<vmem>>, vector<64x32xf32>
    %cst_122 = arith.constant dense<0.000000e+00> : vector<4x32xf32>
    %174 = tpu.matmul %172, %173, %cst_122 {dimension_numbers = #tpu.dot_dimension_numbers<[1], [0], [0], [1], [0, 0, 1, 1], [], []>} : vector<4x64xf32>, vector<64x32xf32>, vector<4x32xf32> -> vector<4x32xf32>
    %c0_123 = arith.constant 0 : index
    %c0_124 = arith.constant 0 : index
    %175 = vector.load %arg24[%c0_123, %c0_124] : memref<1x32xf32, #tpu.memory_space<vmem>>, vector<1x32xf32>
    %176 = vector.broadcast %175 : vector<1x32xf32> to vector<4x32xf32>
    %177 = arith.mulf %174, %176 : vector<4x32xf32>
    %c0_125 = arith.constant 0 : index
    %c0_126 = arith.constant 0 : index
    %178 = vector.load %arg25[%c0_125, %c0_126] : memref<1x32xf32, #tpu.memory_space<vmem>>, vector<1x32xf32>
    %179 = vector.broadcast %178 : vector<1x32xf32> to vector<4x32xf32>
    %180 = arith.addf %177, %179 : vector<4x32xf32>
    %cst_127 = arith.constant 0.000000e+00 : f32
    %181 = vector.broadcast %cst_127 : f32 to vector<4x32xf32>
    %182 = arith.maximumf %180, %181 : vector<4x32xf32>
    %183 = vector.shape_cast %123 : vector<4x2xf32> to vector<1x4x2xf32>
    %184 = arith.index_cast %c1_i32 : i32 to index
    %c0_128 = arith.constant 0 : index
    %c0_129 = arith.constant 0 : index
    %185 = vector.load %arg26[%184, %c0_128, %c0_129] : memref<4x4x2xf32, #tpu.memory_space<vmem>>, vector<1x4x2xf32>
    tpu.vector_store %arg26[%184, %c0_128, %c0_129], %183 {strides = array<i32>} : memref<4x4x2xf32, #tpu.memory_space<vmem>>, vector<1x4x2xf32>,
    %c2_i32 = arith.constant 2 : i32
    %c0_130 = arith.constant 0 : index
    %c0_131 = arith.constant 0 : index
    %186 = vector.load %arg7[%c0_130, %c0_131] : memref<2x128xf32, #tpu.memory_space<vmem>>, vector<2x128xf32>
    %cst_132 = arith.constant dense<0.000000e+00> : vector<4x128xf32>
    %187 = tpu.matmul %123, %186, %cst_132 {dimension_numbers = #tpu.dot_dimension_numbers<[1], [0], [0], [1], [0, 0, 1, 1], [], []>} : vector<4x2xf32>, vector<2x128xf32>, vector<4x128xf32> -> vector<4x128xf32>
    %c0_133 = arith.constant 0 : index
    %c0_134 = arith.constant 0 : index
    %188 = vector.load %arg8[%c0_133, %c0_134] : memref<32x128xf32, #tpu.memory_space<vmem>>, vector<32x128xf32>
    %cst_135 = arith.constant dense<0.000000e+00> : vector<4x128xf32>
    %189 = tpu.matmul %182, %188, %cst_135 {dimension_numbers = #tpu.dot_dimension_numbers<[1], [0], [0], [1], [0, 0, 1, 1], [], []>} : vector<4x32xf32>, vector<32x128xf32>, vector<4x128xf32> -> vector<4x128xf32>
    %190 = arith.addf %187, %189 : vector<4x128xf32>
    %c0_136 = arith.constant 0 : index
    %c0_137 = arith.constant 0 : index
    %191 = vector.load %arg9[%c0_136, %c0_137] : memref<1x128xf32, #tpu.memory_space<vmem>>, vector<1x128xf32>
    %192 = vector.broadcast %191 : vector<1x128xf32> to vector<4x128xf32>
    %193 = arith.addf %190, %192 : vector<4x128xf32>
    %194 = arith.negf %193 : vector<4x128xf32>
    %195 = math.exp %194 : vector<4x128xf32>
    %cst_138 = arith.constant 1.000000e+00 : f32
    %196 = vector.broadcast %cst_138 : f32 to vector<4x128xf32>
    %197 = arith.addf %196, %195 : vector<4x128xf32>
    %198 = arith.divf %196, %197 : vector<4x128xf32>
    %199 = math.tanh %193 : vector<4x128xf32>
    %200 = vector.extract_strided_slice %198 {offsets = [0, 0], sizes = [4, 32], strides = [1, 1]} : vector<4x128xf32> to vector<4x32xf32>
    %201 = vector.extract_strided_slice %198 {offsets = [0, 32], sizes = [4, 32], strides = [1, 1]} : vector<4x128xf32> to vector<4x32xf32>
    %202 = vector.extract_strided_slice %199 {offsets = [0, 64], sizes = [4, 32], strides = [1, 1]} : vector<4x128xf32> to vector<4x32xf32>
    %203 = vector.extract_strided_slice %198 {offsets = [0, 96], sizes = [4, 32], strides = [1, 1]} : vector<4x128xf32> to vector<4x32xf32>
    %204 = arith.mulf %201, %115 : vector<4x32xf32>
    %205 = arith.mulf %200, %202 : vector<4x32xf32>
    %206 = arith.addf %204, %205 : vector<4x32xf32>
    %207 = math.tanh %206 : vector<4x32xf32>
    %208 = arith.mulf %203, %207 : vector<4x32xf32>
    %c0_139 = arith.constant 0 : index
    %c0_140 = arith.constant 0 : index
    %209 = vector.load %arg10[%c0_139, %c0_140] : memref<32x2xf32, #tpu.memory_space<vmem>>, vector<32x2xf32>
    %cst_141 = arith.constant dense<0.000000e+00> : vector<4x2xf32>
    %210 = tpu.matmul %208, %209, %cst_141 {dimension_numbers = #tpu.dot_dimension_numbers<[1], [0], [0], [1], [0, 0, 1, 1], [], []>} : vector<4x32xf32>, vector<32x2xf32>, vector<4x2xf32> -> vector<4x2xf32>
    %c0_142 = arith.constant 0 : index
    %c0_143 = arith.constant 0 : index
    %211 = vector.load %arg11[%c0_142, %c0_143] : memref<1x2xf32, #tpu.memory_space<vmem>>, vector<1x2xf32>
    %212 = vector.broadcast %211 : vector<1x2xf32> to vector<4x2xf32>
    %213 = arith.addf %210, %212 : vector<4x2xf32>
    %214 = arith.addf %213, %123 : vector<4x2xf32>
    %c0_144 = arith.constant 0 : index
    %c0_145 = arith.constant 0 : index
    %215 = vector.load %arg12[%c0_144, %c0_145] : memref<2x512xf32, #tpu.memory_space<vmem>>, vector<2x512xf32>
    %cst_146 = arith.constant dense<0.000000e+00> : vector<4x512xf32>
    %216 = tpu.matmul %214, %215, %cst_146 {dimension_numbers = #tpu.dot_dimension_numbers<[1], [0], [0], [1], [0, 0, 1, 1], [], []>} : vector<4x2xf32>, vector<2x512xf32>, vector<4x512xf32> -> vector<4x512xf32>
    %c0_147 = arith.constant 0 : index
    %c0_148 = arith.constant 0 : index
    %217 = vector.load %arg13[%c0_147, %c0_148] : memref<32x512xf32, #tpu.memory_space<vmem>>, vector<32x512xf32>
    %cst_149 = arith.constant dense<0.000000e+00> : vector<4x512xf32>
    %218 = tpu.matmul %208, %217, %cst_149 {dimension_numbers = #tpu.dot_dimension_numbers<[1], [0], [0], [1], [0, 0, 1, 1], [], []>} : vector<4x32xf32>, vector<32x512xf32>, vector<4x512xf32> -> vector<4x512xf32>
    %c0_150 = arith.constant 0 : index
    %c0_151 = arith.constant 0 : index
    %219 = vector.load %arg5[%c0_150, %c0_151] : memref<16x4xf32, #tpu.memory_space<vmem>>, vector<16x4xf32>
    %cst_152 = arith.constant dense<0.000000e+00> : vector<16x512xf32>
    %220 = tpu.matmul %219, %216, %cst_152 {dimension_numbers = #tpu.dot_dimension_numbers<[1], [0], [0], [1], [0, 0, 1, 1], [], []>} : vector<16x4xf32>, vector<4x512xf32>, vector<16x512xf32> -> vector<16x512xf32>
    %c0_153 = arith.constant 0 : index
    %c0_154 = arith.constant 0 : index
    %221 = vector.load %arg4[%c0_153, %c0_154] : memref<16x4xf32, #tpu.memory_space<vmem>>, vector<16x4xf32>
    %cst_155 = arith.constant dense<0.000000e+00> : vector<16x512xf32>
    %222 = tpu.matmul %221, %218, %cst_155 {dimension_numbers = #tpu.dot_dimension_numbers<[1], [0], [0], [1], [0, 0, 1, 1], [], []>} : vector<16x4xf32>, vector<4x512xf32>, vector<16x512xf32> -> vector<16x512xf32>
    %223 = arith.addf %220, %222 : vector<16x512xf32>
    %c0_156 = arith.constant 0 : index
    %c0_157 = arith.constant 0 : index
    %224 = vector.load %arg14[%c0_156, %c0_157] : memref<1x512xf32, #tpu.memory_space<vmem>>, vector<1x512xf32>
    %225 = vector.broadcast %224 : vector<1x512xf32> to vector<16x512xf32>
    %226 = arith.mulf %223, %225 : vector<16x512xf32>
    %c0_158 = arith.constant 0 : index
    %c0_159 = arith.constant 0 : index
    %227 = vector.load %arg15[%c0_158, %c0_159] : memref<1x512xf32, #tpu.memory_space<vmem>>, vector<1x512xf32>
    %228 = vector.broadcast %227 : vector<1x512xf32> to vector<16x512xf32>
    %229 = arith.addf %226, %228 : vector<16x512xf32>
    %cst_160 = arith.constant 0.000000e+00 : f32
    %230 = vector.broadcast %cst_160 : f32 to vector<16x512xf32>
    %231 = arith.maximumf %229, %230 : vector<16x512xf32>
    %c0_161 = arith.constant 0 : index
    %c0_162 = arith.constant 0 : index
    %232 = vector.load %arg16[%c0_161, %c0_162] : memref<512x64xf32, #tpu.memory_space<vmem>>, vector<512x64xf32>
    %cst_163 = arith.constant dense<0.000000e+00> : vector<16x64xf32>
    %233 = tpu.matmul %231, %232, %cst_163 {dimension_numbers = #tpu.dot_dimension_numbers<[1], [0], [0], [1], [0, 0, 1, 1], [], []>} : vector<16x512xf32>, vector<512x64xf32>, vector<16x64xf32> -> vector<16x64xf32>
    %c0_164 = arith.constant 0 : index
    %c0_165 = arith.constant 0 : index
    %234 = vector.load %arg17[%c0_164, %c0_165] : memref<1x64xf32, #tpu.memory_space<vmem>>, vector<1x64xf32>
    %235 = vector.broadcast %234 : vector<1x64xf32> to vector<16x64xf32>
    %236 = arith.mulf %233, %235 : vector<16x64xf32>
    %c0_166 = arith.constant 0 : index
    %c0_167 = arith.constant 0 : index
    %237 = vector.load %arg18[%c0_166, %c0_167] : memref<1x64xf32, #tpu.memory_space<vmem>>, vector<1x64xf32>
    %238 = vector.broadcast %237 : vector<1x64xf32> to vector<16x64xf32>
    %239 = arith.addf %236, %238 : vector<16x64xf32>
    %cst_168 = arith.constant 0.000000e+00 : f32
    %240 = vector.broadcast %cst_168 : f32 to vector<16x64xf32>
    %241 = arith.maximumf %239, %240 : vector<16x64xf32>
    %c0_169 = arith.constant 0 : index
    %c0_170 = arith.constant 0 : index
    %242 = vector.load %arg6[%c0_169, %c0_170] : memref<16x64xf32, #tpu.memory_space<vmem>>, vector<16x64xf32>
    %243 = arith.addf %241, %242 : vector<16x64xf32>
    %244 = vector.extract_strided_slice %243 {offsets = [0, 0], sizes = [4, 64], strides = [1, 1]} : vector<16x64xf32> to vector<4x64xf32>
    %245 = vector.extract_strided_slice %243 {offsets = [4, 0], sizes = [4, 64], strides = [1, 1]} : vector<16x64xf32> to vector<4x64xf32>
    %246 = vector.extract_strided_slice %243 {offsets = [8, 0], sizes = [4, 64], strides = [1, 1]} : vector<16x64xf32> to vector<4x64xf32>
    %247 = vector.extract_strided_slice %243 {offsets = [12, 0], sizes = [4, 64], strides = [1, 1]} : vector<16x64xf32> to vector<4x64xf32>
    %248 = arith.maximumf %244, %245 : vector<4x64xf32>
    %249 = arith.maximumf %246, %247 : vector<4x64xf32>
    %250 = arith.maximumf %248, %249 : vector<4x64xf32>
    %c0_171 = arith.constant 0 : index
    %c0_172 = arith.constant 0 : index
    %251 = vector.load %arg19[%c0_171, %c0_172] : memref<32x64xf32, #tpu.memory_space<vmem>>, vector<32x64xf32>
    %cst_173 = arith.constant dense<0.000000e+00> : vector<4x64xf32>
    %252 = tpu.matmul %208, %251, %cst_173 {dimension_numbers = #tpu.dot_dimension_numbers<[1], [0], [0], [1], [0, 0, 1, 1], [], []>} : vector<4x32xf32>, vector<32x64xf32>, vector<4x64xf32> -> vector<4x64xf32>
    %c0_174 = arith.constant 0 : index
    %c0_175 = arith.constant 0 : index
    %253 = vector.load %arg20[%c0_174, %c0_175] : memref<64x64xf32, #tpu.memory_space<vmem>>, vector<64x64xf32>
    %cst_176 = arith.constant dense<0.000000e+00> : vector<4x64xf32>
    %254 = tpu.matmul %250, %253, %cst_176 {dimension_numbers = #tpu.dot_dimension_numbers<[1], [0], [0], [1], [0, 0, 1, 1], [], []>} : vector<4x64xf32>, vector<64x64xf32>, vector<4x64xf32> -> vector<4x64xf32>
    %255 = arith.addf %252, %254 : vector<4x64xf32>
    %c0_177 = arith.constant 0 : index
    %c0_178 = arith.constant 0 : index
    %256 = vector.load %arg21[%c0_177, %c0_178] : memref<1x64xf32, #tpu.memory_space<vmem>>, vector<1x64xf32>
    %257 = vector.broadcast %256 : vector<1x64xf32> to vector<4x64xf32>
    %258 = arith.mulf %255, %257 : vector<4x64xf32>
    %c0_179 = arith.constant 0 : index
    %c0_180 = arith.constant 0 : index
    %259 = vector.load %arg22[%c0_179, %c0_180] : memref<1x64xf32, #tpu.memory_space<vmem>>, vector<1x64xf32>
    %260 = vector.broadcast %259 : vector<1x64xf32> to vector<4x64xf32>
    %261 = arith.addf %258, %260 : vector<4x64xf32>
    %cst_181 = arith.constant 0.000000e+00 : f32
    %262 = vector.broadcast %cst_181 : f32 to vector<4x64xf32>
    %263 = arith.maximumf %261, %262 : vector<4x64xf32>
    %c0_182 = arith.constant 0 : index
    %c0_183 = arith.constant 0 : index
    %264 = vector.load %arg23[%c0_182, %c0_183] : memref<64x32xf32, #tpu.memory_space<vmem>>, vector<64x32xf32>
    %cst_184 = arith.constant dense<0.000000e+00> : vector<4x32xf32>
    %265 = tpu.matmul %263, %264, %cst_184 {dimension_numbers = #tpu.dot_dimension_numbers<[1], [0], [0], [1], [0, 0, 1, 1], [], []>} : vector<4x64xf32>, vector<64x32xf32>, vector<4x32xf32> -> vector<4x32xf32>
    %c0_185 = arith.constant 0 : index
    %c0_186 = arith.constant 0 : index
    %266 = vector.load %arg24[%c0_185, %c0_186] : memref<1x32xf32, #tpu.memory_space<vmem>>, vector<1x32xf32>
    %267 = vector.broadcast %266 : vector<1x32xf32> to vector<4x32xf32>
    %268 = arith.mulf %265, %267 : vector<4x32xf32>
    %c0_187 = arith.constant 0 : index
    %c0_188 = arith.constant 0 : index
    %269 = vector.load %arg25[%c0_187, %c0_188] : memref<1x32xf32, #tpu.memory_space<vmem>>, vector<1x32xf32>
    %270 = vector.broadcast %269 : vector<1x32xf32> to vector<4x32xf32>
    %271 = arith.addf %268, %270 : vector<4x32xf32>
    %cst_189 = arith.constant 0.000000e+00 : f32
    %272 = vector.broadcast %cst_189 : f32 to vector<4x32xf32>
    %273 = arith.maximumf %271, %272 : vector<4x32xf32>
    %274 = vector.shape_cast %214 : vector<4x2xf32> to vector<1x4x2xf32>
    %275 = arith.index_cast %c2_i32 : i32 to index
    %c0_190 = arith.constant 0 : index
    %c0_191 = arith.constant 0 : index
    %276 = vector.load %arg26[%275, %c0_190, %c0_191] : memref<4x4x2xf32, #tpu.memory_space<vmem>>, vector<1x4x2xf32>
    tpu.vector_store %arg26[%275, %c0_190, %c0_191], %274 {strides = array<i32>} : memref<4x4x2xf32, #tpu.memory_space<vmem>>, vector<1x4x2xf32>,
    %c3_i32 = arith.constant 3 : i32
    %c0_192 = arith.constant 0 : index
    %c0_193 = arith.constant 0 : index
    %277 = vector.load %arg7[%c0_192, %c0_193] : memref<2x128xf32, #tpu.memory_space<vmem>>, vector<2x128xf32>
    %cst_194 = arith.constant dense<0.000000e+00> : vector<4x128xf32>
    %278 = tpu.matmul %214, %277, %cst_194 {dimension_numbers = #tpu.dot_dimension_numbers<[1], [0], [0], [1], [0, 0, 1, 1], [], []>} : vector<4x2xf32>, vector<2x128xf32>, vector<4x128xf32> -> vector<4x128xf32>
    %c0_195 = arith.constant 0 : index
    %c0_196 = arith.constant 0 : index
    %279 = vector.load %arg8[%c0_195, %c0_196] : memref<32x128xf32, #tpu.memory_space<vmem>>, vector<32x128xf32>
    %cst_197 = arith.constant dense<0.000000e+00> : vector<4x128xf32>
    %280 = tpu.matmul %273, %279, %cst_197 {dimension_numbers = #tpu.dot_dimension_numbers<[1], [0], [0], [1], [0, 0, 1, 1], [], []>} : vector<4x32xf32>, vector<32x128xf32>, vector<4x128xf32> -> vector<4x128xf32>
    %281 = arith.addf %278, %280 : vector<4x128xf32>
    %c0_198 = arith.constant 0 : index
    %c0_199 = arith.constant 0 : index
    %282 = vector.load %arg9[%c0_198, %c0_199] : memref<1x128xf32, #tpu.memory_space<vmem>>, vector<1x128xf32>
    %283 = vector.broadcast %282 : vector<1x128xf32> to vector<4x128xf32>
    %284 = arith.addf %281, %283 : vector<4x128xf32>
    %285 = arith.negf %284 : vector<4x128xf32>
    %286 = math.exp %285 : vector<4x128xf32>
    %cst_200 = arith.constant 1.000000e+00 : f32
    %287 = vector.broadcast %cst_200 : f32 to vector<4x128xf32>
    %288 = arith.addf %287, %286 : vector<4x128xf32>
    %289 = arith.divf %287, %288 : vector<4x128xf32>
    %290 = math.tanh %284 : vector<4x128xf32>
    %291 = vector.extract_strided_slice %289 {offsets = [0, 0], sizes = [4, 32], strides = [1, 1]} : vector<4x128xf32> to vector<4x32xf32>
    %292 = vector.extract_strided_slice %289 {offsets = [0, 32], sizes = [4, 32], strides = [1, 1]} : vector<4x128xf32> to vector<4x32xf32>
    %293 = vector.extract_strided_slice %290 {offsets = [0, 64], sizes = [4, 32], strides = [1, 1]} : vector<4x128xf32> to vector<4x32xf32>
    %294 = vector.extract_strided_slice %289 {offsets = [0, 96], sizes = [4, 32], strides = [1, 1]} : vector<4x128xf32> to vector<4x32xf32>
    %295 = arith.mulf %292, %206 : vector<4x32xf32>
    %296 = arith.mulf %291, %293 : vector<4x32xf32>
    %297 = arith.addf %295, %296 : vector<4x32xf32>
    %298 = math.tanh %297 : vector<4x32xf32>
    %299 = arith.mulf %294, %298 : vector<4x32xf32>
    %c0_201 = arith.constant 0 : index
    %c0_202 = arith.constant 0 : index
    %300 = vector.load %arg10[%c0_201, %c0_202] : memref<32x2xf32, #tpu.memory_space<vmem>>, vector<32x2xf32>
    %cst_203 = arith.constant dense<0.000000e+00> : vector<4x2xf32>
    %301 = tpu.matmul %299, %300, %cst_203 {dimension_numbers = #tpu.dot_dimension_numbers<[1], [0], [0], [1], [0, 0, 1, 1], [], []>} : vector<4x32xf32>, vector<32x2xf32>, vector<4x2xf32> -> vector<4x2xf32>
    %c0_204 = arith.constant 0 : index
    %c0_205 = arith.constant 0 : index
    %302 = vector.load %arg11[%c0_204, %c0_205] : memref<1x2xf32, #tpu.memory_space<vmem>>, vector<1x2xf32>
    %303 = vector.broadcast %302 : vector<1x2xf32> to vector<4x2xf32>
    %304 = arith.addf %301, %303 : vector<4x2xf32>
    %305 = arith.addf %304, %214 : vector<4x2xf32>
    %c0_206 = arith.constant 0 : index
    %c0_207 = arith.constant 0 : index
    %306 = vector.load %arg12[%c0_206, %c0_207] : memref<2x512xf32, #tpu.memory_space<vmem>>, vector<2x512xf32>
    %cst_208 = arith.constant dense<0.000000e+00> : vector<4x512xf32>
    %307 = tpu.matmul %305, %306, %cst_208 {dimension_numbers = #tpu.dot_dimension_numbers<[1], [0], [0], [1], [0, 0, 1, 1], [], []>} : vector<4x2xf32>, vector<2x512xf32>, vector<4x512xf32> -> vector<4x512xf32>
    %c0_209 = arith.constant 0 : index
    %c0_210 = arith.constant 0 : index
    %308 = vector.load %arg13[%c0_209, %c0_210] : memref<32x512xf32, #tpu.memory_space<vmem>>, vector<32x512xf32>
    %cst_211 = arith.constant dense<0.000000e+00> : vector<4x512xf32>
    %309 = tpu.matmul %299, %308, %cst_211 {dimension_numbers = #tpu.dot_dimension_numbers<[1], [0], [0], [1], [0, 0, 1, 1], [], []>} : vector<4x32xf32>, vector<32x512xf32>, vector<4x512xf32> -> vector<4x512xf32>
    %c0_212 = arith.constant 0 : index
    %c0_213 = arith.constant 0 : index
    %310 = vector.load %arg5[%c0_212, %c0_213] : memref<16x4xf32, #tpu.memory_space<vmem>>, vector<16x4xf32>
    %cst_214 = arith.constant dense<0.000000e+00> : vector<16x512xf32>
    %311 = tpu.matmul %310, %307, %cst_214 {dimension_numbers = #tpu.dot_dimension_numbers<[1], [0], [0], [1], [0, 0, 1, 1], [], []>} : vector<16x4xf32>, vector<4x512xf32>, vector<16x512xf32> -> vector<16x512xf32>
    %c0_215 = arith.constant 0 : index
    %c0_216 = arith.constant 0 : index
    %312 = vector.load %arg4[%c0_215, %c0_216] : memref<16x4xf32, #tpu.memory_space<vmem>>, vector<16x4xf32>
    %cst_217 = arith.constant dense<0.000000e+00> : vector<16x512xf32>
    %313 = tpu.matmul %312, %309, %cst_217 {dimension_numbers = #tpu.dot_dimension_numbers<[1], [0], [0], [1], [0, 0, 1, 1], [], []>} : vector<16x4xf32>, vector<4x512xf32>, vector<16x512xf32> -> vector<16x512xf32>
    %314 = arith.addf %311, %313 : vector<16x512xf32>
    %c0_218 = arith.constant 0 : index
    %c0_219 = arith.constant 0 : index
    %315 = vector.load %arg14[%c0_218, %c0_219] : memref<1x512xf32, #tpu.memory_space<vmem>>, vector<1x512xf32>
    %316 = vector.broadcast %315 : vector<1x512xf32> to vector<16x512xf32>
    %317 = arith.mulf %314, %316 : vector<16x512xf32>
    %c0_220 = arith.constant 0 : index
    %c0_221 = arith.constant 0 : index
    %318 = vector.load %arg15[%c0_220, %c0_221] : memref<1x512xf32, #tpu.memory_space<vmem>>, vector<1x512xf32>
    %319 = vector.broadcast %318 : vector<1x512xf32> to vector<16x512xf32>
    %320 = arith.addf %317, %319 : vector<16x512xf32>
    %cst_222 = arith.constant 0.000000e+00 : f32
    %321 = vector.broadcast %cst_222 : f32 to vector<16x512xf32>
    %322 = arith.maximumf %320, %321 : vector<16x512xf32>
    %c0_223 = arith.constant 0 : index
    %c0_224 = arith.constant 0 : index
    %323 = vector.load %arg16[%c0_223, %c0_224] : memref<512x64xf32, #tpu.memory_space<vmem>>, vector<512x64xf32>
    %cst_225 = arith.constant dense<0.000000e+00> : vector<16x64xf32>
    %324 = tpu.matmul %322, %323, %cst_225 {dimension_numbers = #tpu.dot_dimension_numbers<[1], [0], [0], [1], [0, 0, 1, 1], [], []>} : vector<16x512xf32>, vector<512x64xf32>, vector<16x64xf32> -> vector<16x64xf32>
    %c0_226 = arith.constant 0 : index
    %c0_227 = arith.constant 0 : index
    %325 = vector.load %arg17[%c0_226, %c0_227] : memref<1x64xf32, #tpu.memory_space<vmem>>, vector<1x64xf32>
    %326 = vector.broadcast %325 : vector<1x64xf32> to vector<16x64xf32>
    %327 = arith.mulf %324, %326 : vector<16x64xf32>
    %c0_228 = arith.constant 0 : index
    %c0_229 = arith.constant 0 : index
    %328 = vector.load %arg18[%c0_228, %c0_229] : memref<1x64xf32, #tpu.memory_space<vmem>>, vector<1x64xf32>
    %329 = vector.broadcast %328 : vector<1x64xf32> to vector<16x64xf32>
    %330 = arith.addf %327, %329 : vector<16x64xf32>
    %cst_230 = arith.constant 0.000000e+00 : f32
    %331 = vector.broadcast %cst_230 : f32 to vector<16x64xf32>
    %332 = arith.maximumf %330, %331 : vector<16x64xf32>
    %c0_231 = arith.constant 0 : index
    %c0_232 = arith.constant 0 : index
    %333 = vector.load %arg6[%c0_231, %c0_232] : memref<16x64xf32, #tpu.memory_space<vmem>>, vector<16x64xf32>
    %334 = arith.addf %332, %333 : vector<16x64xf32>
    %335 = vector.extract_strided_slice %334 {offsets = [0, 0], sizes = [4, 64], strides = [1, 1]} : vector<16x64xf32> to vector<4x64xf32>
    %336 = vector.extract_strided_slice %334 {offsets = [4, 0], sizes = [4, 64], strides = [1, 1]} : vector<16x64xf32> to vector<4x64xf32>
    %337 = vector.extract_strided_slice %334 {offsets = [8, 0], sizes = [4, 64], strides = [1, 1]} : vector<16x64xf32> to vector<4x64xf32>
    %338 = vector.extract_strided_slice %334 {offsets = [12, 0], sizes = [4, 64], strides = [1, 1]} : vector<16x64xf32> to vector<4x64xf32>
    %339 = arith.maximumf %335, %336 : vector<4x64xf32>
    %340 = arith.maximumf %337, %338 : vector<4x64xf32>
    %341 = arith.maximumf %339, %340 : vector<4x64xf32>
    %c0_233 = arith.constant 0 : index
    %c0_234 = arith.constant 0 : index
    %342 = vector.load %arg19[%c0_233, %c0_234] : memref<32x64xf32, #tpu.memory_space<vmem>>, vector<32x64xf32>
    %cst_235 = arith.constant dense<0.000000e+00> : vector<4x64xf32>
    %343 = tpu.matmul %299, %342, %cst_235 {dimension_numbers = #tpu.dot_dimension_numbers<[1], [0], [0], [1], [0, 0, 1, 1], [], []>} : vector<4x32xf32>, vector<32x64xf32>, vector<4x64xf32> -> vector<4x64xf32>
    %c0_236 = arith.constant 0 : index
    %c0_237 = arith.constant 0 : index
    %344 = vector.load %arg20[%c0_236, %c0_237] : memref<64x64xf32, #tpu.memory_space<vmem>>, vector<64x64xf32>
    %cst_238 = arith.constant dense<0.000000e+00> : vector<4x64xf32>
    %345 = tpu.matmul %341, %344, %cst_238 {dimension_numbers = #tpu.dot_dimension_numbers<[1], [0], [0], [1], [0, 0, 1, 1], [], []>} : vector<4x64xf32>, vector<64x64xf32>, vector<4x64xf32> -> vector<4x64xf32>
    %346 = arith.addf %343, %345 : vector<4x64xf32>
    %c0_239 = arith.constant 0 : index
    %c0_240 = arith.constant 0 : index
    %347 = vector.load %arg21[%c0_239, %c0_240] : memref<1x64xf32, #tpu.memory_space<vmem>>, vector<1x64xf32>
    %348 = vector.broadcast %347 : vector<1x64xf32> to vector<4x64xf32>
    %349 = arith.mulf %346, %348 : vector<4x64xf32>
    %c0_241 = arith.constant 0 : index
    %c0_242 = arith.constant 0 : index
    %350 = vector.load %arg22[%c0_241, %c0_242] : memref<1x64xf32, #tpu.memory_space<vmem>>, vector<1x64xf32>
    %351 = vector.broadcast %350 : vector<1x64xf32> to vector<4x64xf32>
    %352 = arith.addf %349, %351 : vector<4x64xf32>
    %cst_243 = arith.constant 0.000000e+00 : f32
    %353 = vector.broadcast %cst_243 : f32 to vector<4x64xf32>
    %354 = arith.maximumf %352, %353 : vector<4x64xf32>
    %c0_244 = arith.constant 0 : index
    %c0_245 = arith.constant 0 : index
    %355 = vector.load %arg23[%c0_244, %c0_245] : memref<64x32xf32, #tpu.memory_space<vmem>>, vector<64x32xf32>
    %cst_246 = arith.constant dense<0.000000e+00> : vector<4x32xf32>
    %356 = tpu.matmul %354, %355, %cst_246 {dimension_numbers = #tpu.dot_dimension_numbers<[1], [0], [0], [1], [0, 0, 1, 1], [], []>} : vector<4x64xf32>, vector<64x32xf32>, vector<4x32xf32> -> vector<4x32xf32>
    %c0_247 = arith.constant 0 : index
    %c0_248 = arith.constant 0 : index
    %357 = vector.load %arg24[%c0_247, %c0_248] : memref<1x32xf32, #tpu.memory_space<vmem>>, vector<1x32xf32>
    %358 = vector.broadcast %357 : vector<1x32xf32> to vector<4x32xf32>
    %359 = arith.mulf %356, %358 : vector<4x32xf32>
    %c0_249 = arith.constant 0 : index
    %c0_250 = arith.constant 0 : index
    %360 = vector.load %arg25[%c0_249, %c0_250] : memref<1x32xf32, #tpu.memory_space<vmem>>, vector<1x32xf32>
    %361 = vector.broadcast %360 : vector<1x32xf32> to vector<4x32xf32>
    %362 = arith.addf %359, %361 : vector<4x32xf32>
    %cst_251 = arith.constant 0.000000e+00 : f32
    %363 = vector.broadcast %cst_251 : f32 to vector<4x32xf32>
    %364 = arith.maximumf %362, %363 : vector<4x32xf32>
    %365 = vector.shape_cast %305 : vector<4x2xf32> to vector<1x4x2xf32>
    %366 = arith.index_cast %c3_i32 : i32 to index
    %c0_252 = arith.constant 0 : index
    %c0_253 = arith.constant 0 : index
    %367 = vector.load %arg26[%366, %c0_252, %c0_253] : memref<4x4x2xf32, #tpu.memory_space<vmem>>, vector<1x4x2xf32>
    tpu.vector_store %arg26[%366, %c0_252, %c0_253], %365 {strides = array<i32>} : memref<4x4x2xf32, #tpu.memory_space<vmem>>, vector<1x4x2xf32>,
    %c4_i32 = arith.constant 4 : i32
    %c0_254 = arith.constant 0 : index
    %c0_255 = arith.constant 0 : index
    %368 = vector.load %arg27[%c0_254, %c0_255] : memref<4x32xf32, #tpu.memory_space<vmem>>, vector<4x32xf32>
    tpu.vector_store %arg27[%c0_254, %c0_255], %364 {strides = array<i32>} : memref<4x32xf32, #tpu.memory_space<vmem>>, vector<4x32xf32>,
    return
  }
}

</mosaic_0001>

<bundles_post_ra>
// kernel: delta_decoder_forward.1
= control target key start
LH: loop header
LB: loop body
LE: loop exit
PB: predicated region body
PF: predicated region fallthrough
CT: control target
= control target key end

     0   :  { %s9690_s0 = inlined_call_operand.vmem [shape: f32[4,2], index: 0, kind: input, shape index: {}]   ;;  %s9691_s1 = inlined_call_operand.vmem [shape: f32[4,2], index: 1, kind: input, shape index: {}]   ;;  %s9692_s2 = inlined_call_operand.vmem [shape: f32[4,32], index: 2, kind: input, shape index: {}]   ;;  %s9693_s3 = inlined_call_operand.vmem [shape: f32[4,32], index: 3, kind: input, shape index: {}]   ;;  %s9694_s4 = inlined_call_operand.vmem [shape: f32[16,4], index: 4, kind: input, shape index: {}]   ;;  %s9695_s5 = inlined_call_operand.vmem [shape: f32[16,4], index: 5, kind: input, shape index: {}]   ;;  %s9696_s6 = inlined_call_operand.vmem [shape: f32[16,64], index: 6, kind: input, shape index: {}]   ;;  %s9697_s7 = inlined_call_operand.vmem [shape: f32[2,128], index: 7, kind: input, shape index: {}]   ;;  %s9698_s8 = inlined_call_operand.vmem [shape: f32[32,128], index: 8, kind: input, shape index: {}]   ;;  %s9699_s9 = inlined_call_operand.vmem [shape: f32[1,128], index: 9, kind: input, shape index: {}]   ;;  %s9700_s10 = inlined_call_operand.vmem [shape: f32[32,2], index: 10, kind: input, shape index: {}]   ;;  %s9701_s11 = inlined_call_operand.vmem [shape: f32[1,2], index: 11, kind: input, shape index: {}]   ;;  %s9702_s12 = inlined_call_operand.vmem [shape: f32[2,512], index: 12, kind: input, shape index: {}]   ;;  %s9703_s13 = inlined_call_operand.vmem [shape: f32[32,512], index: 13, kind: input, shape index: {}]   ;;  %s9704_s14 = inlined_call_operand.vmem [shape: f32[1,512], index: 14, kind: input, shape index: {}]   ;;  %s9705_s15 = inlined_call_operand.vmem [shape: f32[1,512], index: 15, kind: input, shape index: {}]   ;;  %s9706_s16 = inlined_call_operand.vmem [shape: f32[512,64], index: 16, kind: input, shape index: {}]   ;;  %s9707_s17 = inlined_call_operand.vmem [shape: f32[1,64], index: 17, kind: input, shape index: {}]   ;;  %s9708_s18 = inlined_call_operand.vmem [shape: f32[1,64], index: 18, kind: input, shape index: {}]   ;;  %s9709_s19 = inlined_call_operand.vmem [shape: f32[32,64], index: 19, kind: input, shape index: {}]   ;;  %s9710_s20 = inlined_call_operand.vmem [shape: f32[64,64], index: 20, kind: input, shape index: {}]   ;;  %s9711_s21 = inlined_call_operand.vmem [shape: f32[1,64], index: 21, kind: input, shape index: {}]   ;;  %s9712_s22 = inlined_call_operand.vmem [shape: f32[1,64], index: 22, kind: input, shape index: {}]   ;;  %s9713_s23 = inlined_call_operand.vmem [shape: f32[64,32], index: 23, kind: input, shape index: {}]   ;;  %s9714_s24 = inlined_call_operand.vmem [shape: f32[1,32], index: 24, kind: input, shape index: {}]   ;;  %s9715_s25 = inlined_call_operand.vmem [shape: f32[1,32], index: 25, kind: input, shape index: {}]   ;;  %s9716_s26 = inlined_call_operand.vmem [shape: f32[4,4,2], index: 26, kind: output, shape index: {0}]   ;;  %s9717_s27 = inlined_call_operand.hbm [shape: f32[4,32], index: 27, kind: output, shape index: {1}]  }
   0x1   :  { %9890 = sst [smem:[#allocation80_spill]] %s9690_s0 }
   0x2   :  { %9891 = sst [smem:[#allocation81_spill]] %s9691_s1 }
   0x3   :  { %9892 = sst [smem:[#allocation82_spill]] %s9692_s2 }
   0x4   :  { %9893 = sst [smem:[#allocation83_spill]] %s9693_s3 }
   0x5   :  { %9894 = sst [smem:[#allocation84_spill]] %s9694_s4 }
   0x6   :  { %9895 = sst [smem:[#allocation85_spill]] %s9695_s5 }
   0x7   :  { %9896 = sst [smem:[#allocation86_spill]] %s9696_s6 }
   0x8   :  { %9897 = sst [smem:[#allocation87_spill]] %s9697_s7 }
   0x9   :  { %9898 = sst [smem:[#allocation88_spill]] %s9698_s8 }
   0xa   :  { %9899 = sst [smem:[#allocation89_spill]] %s9699_s9 }
   0xb   :  { %9900 = sst [smem:[#allocation90_spill]] %s9700_s10 }
   0xc   :  { %9901 = sst [smem:[#allocation91_spill]] %s9701_s11 }
   0xd   :  { %9902 = sst [smem:[#allocation92_spill]] %s9717_s27 }
   0xe   :  { %s9903_s8 = sld [smem:[#allocation88_spill]]  ;;  %vm173_vm0 = vcmask 1041408   ;;  %v9733_v1 = vmov 0.0   ;;  %vm169_vm1 = vcmask 15360  }
   0xf   :  { %6870 = vmatprep.subr.mxu0 %v9733_v1  ;;  %6881 = vmatprep.subr.mxu1 %v9733_v1  ;;  %s9904_s0 = sld [smem:[#allocation87_spill]] }
  0x10   :  { %s9905_s1 = sld [smem:[#allocation81_spill]] }
  0x14   :  { %v7385_v0 = vld [vmem:[%s9903_s8 + $0x18] sm:$0xff]  ;;  %v7391_v2 = vld [vmem:[%s9903_s8 + $0x10] sm:$0xff] }
  0x15   :  { %v90_v3 = vld [vmem:[%s9904_s0] sm:$0x3]  ;;  %6871 = vmatpush3.msra.mxu0 %v7385_v0 }
  0x16   :  { %v89_v4 = vld [vmem:[%s9905_s1] sm:$0xf]  ;;  %6882 = vmatpush3.msk.msra.mxu1 %vm173_vm0, %v90_v3 }
  0x17   :  { %33 = vsyncpa [#allocation3], 0  ;;  %6872 = vmatprep.subr.mxu0 %v9733_v1  ;;  %v7406_v5 = vld [vmem:[%s9903_s8 + $0x8] sm:$0xff]  ;;  %vm7237_vm2 = vmmov 0   ;;  %v7416_v6 = vld [vmem:[%s9903_s8] sm:$0xff]  ;;  %s9906_s30 = sld [smem:[#allocation82_spill]]  ;;  %6886 = vmatprep.subr.mxu1 %v9733_v1  ;;  %v376_v45 = vlaneseq }
  0x18   :  { %6883 = vmatprep.mubr.msk.f32.mxu1 %vm7237_vm2, %v9733_v1  ;;  %6873 = vmatpush3.msra.mxu0 %v7391_v2  ;;  %vm95_vm3 = vcmask 261120   ;;  %s9907_s28 = sld [smem:[#allocation89_spill]]  ;;  %s9728_s10 = smov 64   ;;  %v7449_v27 = vld [vmem:[%s9703_s13 + $0x68] sm:$0xff]  ;;  %v7459_v29 = vld [vmem:[%s9703_s13 + $0x60] sm:$0xff]  ;;  %vm711_vm4 = vcmask 1043456  }
  0x19   :  { %6884 = vmatmul.mubr.msk.f32.vlgmr.msra.gmra.mxu1 %vm169_vm1, %v89_v4  ;;  %6874 = vmatprep.subr.mxu0 %v9733_v1  ;;  %s9908_s6 = sld [smem:[#allocation83_spill]]  ;;  %s9726_s11 = smov 32   ;;  %v7466_v30 = vld [vmem:[%s9703_s13 + $0x48] sm:$0xff]  ;;  %v7476_v32 = vld [vmem:[%s9703_s13 + $0x40] sm:$0xff]  ;;  %v7240_v43 = vmov 1983009808  }
  0x1a   :  { %6878 = vmatprep.mubr.msk.f32.mxu0 %vm7237_vm2, %v9733_v1  ;;  %6875 = vmatpush3.msra.mxu0 %v7406_v5  ;;  %v7483_v33 = vld [vmem:[%s9703_s13 + $0x28] sm:$0xff]  ;;  %v7495_v35 = vld [vmem:[%s9703_s13 + $0x20] sm:$0xff]  ;;  %v374_v44 = vunpack.c.l.s4 %v7240_v43  ;;  %v7531_v47 = vshrl.u32 %v376_v45, 7  ;;  %s9911_s3 = sld [smem:[#allocation91_spill]]  ;;  %vm1636_vm5 = vcmask 11264   ;;  %v7575_v63 = vld [vmem:[%s9703_s13 + $0x78] sm:$0xff] }
  0x1b   :  { %6876 = vmatprep.subr.mxu0 %v9733_v1  ;;  %6894 = vmatprep.mubr.msk.f32.mxu1 %vm7237_vm2, %v9733_v1  ;;  %v7502_v36 = vld [vmem:[%s9703_s13 + $0x8] sm:$0xff]  ;;  %v7514_v38 = vld [vmem:[%s9703_s13] sm:$0xff]  ;;  %s9912_s9 = sld [smem:[#allocation80_spill]]  ;;  %v7591_v3 = vld [vmem:[%s9703_s13 + $0x70] sm:$0xff]  ;;  %vm704_vm6 = vcmask 31744   ;;  %vm1377_vm7 = vcmask 523264  }
  0x1c   :  { %6877 = vmatpush3.msra.mxu0 %v7416_v6  ;;  %v375_v46 = vunpack.c.0.s8 %v374_v44  ;;  %v370_v49 = vld [vmem:[%s9702_s12] sm:$0xff]  ;;  %v7596_v4 = vld [vmem:[%s9703_s13 + $0x58] sm:$0xff]  ;;  %s9913_s2 = sld [smem:[#allocation84_spill]]  ;;  %s9991_s7 = smov 64   ;;  %vm6243_vm8 = vcmask 257024  }
  0x1d   :  { %v86_v7 = vld [vmem:[%s9906_s30] sm:$0xf]  ;;  %s9909_s30 = sld [smem:[#allocation90_spill]]  ;;  %582 = vmatprep.subr.mxu0 %v7449_v27  ;;  %v372_v51 = vcombine.high %v370_v49, %v370_v49  ;;  %v7718_v43 = vld [vmem:[%s9706_s16 + $0xd8] sm:$0xff]  ;;  %s9992_s4 = smov 32  }
  0x1e   :  { %6879 = vmatmul.mubr.msk.f32.vlgmr.msra.gmra.mxu0 %vm95_vm3, %v86_v7  ;;  %v7434_v11 = vld [vmem:[%s9907_s28] ss:$0 sm:$0xff]  ;;  %v7534_v48 = vsub.s32 %v375_v46, %v7531_v47  ;;  %v7603_v7 = vld [vmem:[%s9703_s13 + $0x50] sm:$0xff]  ;;  %s9915_s29 = sld [smem:[#allocation85_spill]]  ;;  %9926 = vst [vmem:[#allocation17_spill] sm:$0xff] %v7718_v43  ;;  %v7724_v44 = vld [vmem:[%s9706_s16 + $0x58] sm:$0xff] }
  0x1f   :  { %622 = vmatprep.mubr.f32.mxu0 %v9733_v1  ;;  %v87_v16 = vld [vmem:[%s9908_s6] sm:$0xf]  ;;  %583 = vmatpush1.msra.mxu0 %v7459_v29  ;;  %9927 = vst [vmem:[#allocation18_spill] sm:$0xff] %v7724_v44  ;;  %v7730_v46 = vld [vmem:[%s9706_s16 + $0xd0] sm:$0xff] }
  0x20   :  { %584 = vmatprep.subr.mxu0 %v7466_v30  ;;  %9910 = vst [vmem:[#allocation5_spill] sm:$0xff] %v7534_v48  ;;  %v7540_v50 = vrot.slane %v370_v49, %v7534_v48  ;;  %v7547_v53 = vrot.slane %v372_v51, %v7534_v48  ;;  %v7562_v55 = vld [vmem:[%s9911_s3] ss:$0 sm:$0xff]  ;;  %9928 = vst [vmem:[#allocation19_spill] sm:$0xff] %v7730_v46  ;;  %v7736_v49 = vld [vmem:[%s9706_s16 + $0x50] sm:$0xff] }
  0x21   :  { %585 = vmatpush1.msra.mxu0 %v7476_v32  ;;  %v88_v56 = vld [vmem:[%s9912_s9] sm:$0xf]  ;;  %9929 = vst [vmem:[#allocation20_spill] sm:$0xff] %v7736_v49  ;;  %v7826_v48 = vld [vmem:[%s9706_s16 + $0x1e8] sm:$0xff] }
  0x22   :  { %586 = vmatprep.subr.mxu0 %v7483_v33  ;;  %v7544_v52 = vcombine.high %v7540_v50, %v7540_v50  ;;  %v7555_v54 = vcombine.high %v7547_v53, %v7547_v53  ;;  %9942 = vst [vmem:[#allocation33_spill] sm:$0xff] %v7826_v48 }
  0x23   :  { %v7454_v28 = vld [vmem:[%s9909_s30 + $0x18] sm:$0xff]  ;;  %v7471_v31 = vld [vmem:[%s9909_s30 + $0x10] sm:$0xff]  ;;  %v7488_v34 = vld [vmem:[%s9909_s30 + $0x8] sm:$0xff]  ;;  %587 = vmatpush1.msra.mxu0 %v7495_v35 }
  0x24   :  { %6887 = vmatpush3.msra.mxu1 %v7454_v28  ;;  %v7507_v37 = vld [vmem:[%s9909_s30] sm:$0xff]  ;;  %588 = vmatprep.subr.mxu0 %v7502_v36 }
  0x25   :  { %6888 = vmatprep.subr.mxu1 %v9733_v1  ;;  %589 = vmatpush1.msra.mxu0 %v7514_v38 }
  0x26   :  { %6889 = vmatpush3.msra.mxu1 %v7471_v31 }
  0x27   :  { %6890 = vmatprep.subr.mxu1 %v9733_v1 }
  0x28   :  { %6891 = vmatpush3.msra.mxu1 %v7488_v34 }
  0x29   :  { %6892 = vmatprep.subr.mxu1 %v9733_v1 }
  0x2a   :  { %6893 = vmatpush3.msra.mxu1 %v7507_v37 }
  0x2b   :  { %6270 = vmatprep.subr.msk.mxu1 %vm173_vm0, %v7544_v52 }
  0xd9   :  { %v243_v8 = vpop.f32.mrf.mxu1 }
  0xdb   :  { %v6885_v9 = vpop.f32.mrf.mxu1 }
  0xdc   :  { %v7616_v9 = vld [vmem:[%s9703_s13 + $0x30] sm:$0xff] }
  0xde   :  { %v165_v10 = vpop.f32.mrf.mxu0 }
  0xdf   :  { %v244_v12 = vadd.f32 %v243_v8, %v165_v10  ;;  %v7609_v8 = vld [vmem:[%s9703_s13 + $0x38] sm:$0xff] }
  0xe0   :  { %v6880_v13 = vpop.f32.mrf.mxu0  ;;  %v7622_v10 = vld [vmem:[%s9703_s13 + $0x18] sm:$0xff] }
  0xe1   :  { %v254_v14 = vadd.f32 %v7434_v11, %v244_v12  ;;  %v7628_v12 = vld [vmem:[%s9703_s13 + $0x10] sm:$0xff]  ;;  %v7639_v13 = vld [vmem:[%s9913_s2] sm:$0xff] }
  0xe3   :  { %7182 = vtanh.f32 %v254_v14  ;;  %v6267_v17 = vmul.f32 -1.442695, %v254_v14  ;;  %v7647_v14 = vld [vmem:[%s9913_s2 + $0x8] sm:$0xff] }
  0xe4   :  { %9914 = vst [vmem:[#allocation6_spill] sm:$0xff] %v7647_v14 }
  0xe5   :  { %7184 = vpow2.f32 %v6267_v17  ;;  %v7655_v17 = vld [vmem:[%s9915_s29] sm:$0xff] }
  0xe6   :  { %9916 = vst [vmem:[#allocation7_spill] sm:$0xff] %v7655_v17 }
  0xf0   :  { %v7183_v15 = vpop.eup %7182 }
  0xf1   :  { %268 = vrot.lane.b32.xlu0 %v7183_v15, %s9728_s10 }
  0xf2   :  { %v7185_v18 = vpop.eup %7184 }
  0xf3   :  { %v258_v19 = vadd.f32 1.0, %v7185_v18  ;;  %v7660_v18 = vld [vmem:[%s9706_s16 + $0xf8] sm:$0xff] }
  0xf4   :  { %9917 = vst [vmem:[#allocation8_spill] sm:$0xff] %v7660_v18 }
  0xf5   :  { %263 = vrot.lane.b32.xlu0 %v87_v16, %s9726_s11  ;;  %7186 = vrcp.f32 %v258_v19  ;;  %v7666_v19 = vld [vmem:[%s9706_s16 + $0x78] sm:$0xff] }
  0xf6   :  { %9918 = vst [vmem:[#allocation9_spill] sm:$0xff] %v7666_v19 }
 0x102   :  { %v7187_v20 = vpop.eup %7186 }
 0x163   :  { %v269_v21 = vpop.permute.xlu0 %268 }
 0x164   :  { %v271_v22 = vmul.f32 %v7187_v20, %v269_v21  ;;  %v7680_v21 = vld [vmem:[%s9706_s16 + $0x70] sm:$0xff] }
 0x165   :  { %9920 = vst [vmem:[#allocation11_spill] sm:$0xff] %v7680_v21 }
 0x166   :  { %273 = vrot.lane.b32.xlu1 %v271_v22, %s9726_s11 }
 0x167   :  { %v264_v23 = vpop.permute.xlu0 %263 }
 0x168   :  { %v266_v24 = vmul.f32 %v7187_v20, %v264_v23  ;;  %v7686_v23 = vld [vmem:[%s9915_s29 + $0x8] sm:$0xff] }
 0x169   :  { %9921 = vst [vmem:[#allocation12_spill] sm:$0xff] %v7686_v23 }
 0x1d8   :  { %v274_v25 = vpop.permute.xlu1 %273 }
 0x1d9   :  { %v7443_v26 = vadd.f32 %v274_v25, %v266_v24  ;;  %v7692_v24 = vld [vmem:[%s9706_s16 + $0xe8] sm:$0xff] }
 0x1da   :  { %9922 = vst [vmem:[#allocation13_spill] sm:$0xff] %v7692_v24  ;;  %v7698_v25 = vld [vmem:[%s9706_s16 + $0x68] sm:$0xff] }
 0x1db   :  { %7188 = vtanh.f32 %v7443_v26  ;;  %9923 = vst [vmem:[#allocation14_spill] sm:$0xff] %v7698_v25 }
 0x1e8   :  { %v7189_v39 = vpop.eup %7188 }
 0x1e9   :  { %279 = vrot.lane.b32.xlu1 %v7189_v39, %s9728_s10  ;;  %v7704_v39 = vld [vmem:[%s9706_s16 + $0xe0] sm:$0xff]  ;;  %s9990_s10 = sld [smem:[#allocation86_spill]] }
 0x1ea   :  { %9924 = vst [vmem:[#allocation15_spill] sm:$0xff] %v7704_v39 }
 0x25b   :  { %v280_v40 = vpop.permute.xlu1 %279 }
 0x25c   :  { %v282_v41 = vmul.f32 %v7187_v20, %v280_v40  ;;  %v7672_v20 = vld [vmem:[%s9706_s16 + $0xf0] sm:$0xff]  ;;  %v7712_v40 = vld [vmem:[%s9706_s16 + $0x60] sm:$0xff] }
 0x25d   :  { %9919 = vst [vmem:[#allocation10_spill] sm:$0xff] %v7672_v20  ;;  %9925 = vst [vmem:[#allocation16_spill] sm:$0xff] %v7712_v40 }
 0x25e   :  { %295 = vrot.lane.b32.xlu0 %v282_v41, %s9726_s11 }
 0x2d0   :  { %v7523_v42 = vpop.permute.xlu0 %295 }
 0x2d1   :  { %6895 = vmatmul.mubr.msk.f32.vlgmr.msra.gmra.mxu1 %vm95_vm3, %v7523_v42  ;;  %6276 = vmatmul.mubr.msk.f32.vlgmr.msra.gmra.mxu0 %vm95_vm3, %v7523_v42 }
 0x2d2   :  { %464 = vmatprep.mubr.f32.mxu1 %v9733_v1  ;;  %788 = vmatprep.mubr.f32.mxu0 %v9733_v1 }
 0x2d3   :  { %6271 = vmatpush1.msk.msra.mxu1 %vm173_vm0, %v7540_v50 }
 0x2d4   :  { %6273 = vmatprep.subr.msk.mxu1 %vm173_vm0, %v7555_v54 }
 0x391   :  { %v365_v57 = vpop.f32.mrf.mxu1  ;;  %v624_v58 = vpop.f32.mrf.mxu0 }
 0x392   :  { %v366_v59 = vadd.f32 %v7562_v55, %v365_v57  ;;  %v7751_v57 = vld [vmem:[%s9706_s16 + $0x1f8] sm:$0xff] }
 0x393   :  { %v6896_v60 = vpop.f32.mrf.mxu1  ;;  %v626_v61 = vpop.f32.mrf.mxu0  ;;  %9931 = vst [vmem:[#allocation22_spill] sm:$0xff] %v7751_v57 }
 0x394   :  { %v7568_v62 = vadd.f32 %v366_v59, %v88_v56  ;;  %6278 = vmatprep.subr.msk.mxu0 %vm711_vm4, %v626_v61  ;;  %v7746_v56 = vld [vmem:[%s9706_s16 + $0xc8] sm:$0xff]  ;;  %v7766_v59 = vld [vmem:[%s9706_s16 + $0xc0] sm:$0xff]  ;;  %v7779_v61 = vld [vmem:[%s9706_s16 + $0xb8] sm:$0xff] }
 0x395   :  { %6279 = vmatpush1.msk.msra.mxu0 %vm711_vm4, %v624_v58  ;;  %9930 = vst [vmem:[#allocation21_spill] sm:$0xff] %v7746_v56  ;;  %v7759_v58 = vld [vmem:[%s9706_s16 + $0x48] sm:$0xff]  ;;  %9933 = vst [vmem:[#allocation24_spill] sm:$0xff] %v7766_v59  ;;  %v7773_v60 = vld [vmem:[%s9706_s16 + $0x40] sm:$0xff] }
 0x396   :  { %6272 = vmatmul.mubr.msk.f32.vlgmr.msra.gmra.mxu1 %vm169_vm1, %v7568_v62  ;;  %1637 = vst.msk [vmem:[%s9716_s26] sm:$0xf] %vm1636_vm5, %v7568_v62  ;;  %6280 = vmatmul.mubr.msk.f32.vlgmr.msra.gmra.mxu0 %vm704_vm6, %v7639_v13  ;;  %9932 = vst [vmem:[#allocation23_spill] sm:$0xff] %v7759_v58 }
 0x397   :  { %6274 = vmatpush1.msk.msra.mxu1 %vm173_vm0, %v7547_v53  ;;  %535 = vmatprep.mubr.f32.mxu1 %v9733_v1  ;;  %9934 = vst [vmem:[#allocation25_spill] sm:$0xff] %v7773_v60  ;;  %9935 = vst [vmem:[#allocation26_spill] sm:$0xff] %v7779_v61 }
 0x398   :  { %653 = vmatprep.subr.mxu1 %v7575_v63  ;;  %794 = vmatprep.mubr.f32.mxu0 %v9733_v1 }
 0x39a   :  { %6275 = vmatmul.mubr.msk.f32.vlgmr.msra.gmra.mxu1 %vm169_vm1, %v7568_v62  ;;  %6281 = vmatmul.mubr.msk.f32.gmra.mxu0 %vm704_vm6, %v7647_v14 }
 0x39b   :  { %654 = vmatpush1.msra.mxu1 %v7591_v3  ;;  %693 = vmatprep.mubr.f32.mxu1 %v9733_v1 }
 0x39c   :  { %655 = vmatprep.subr.mxu1 %v7596_v4  ;;  %960 = vmatprep.mubr.f32.mxu0 %v9733_v1 }
 0x39d   :  { %656 = vmatpush1.msra.mxu1 %v7603_v7 }
 0x39e   :  { %657 = vmatprep.subr.mxu1 %v7609_v8 }
 0x39f   :  { %658 = vmatpush1.msra.mxu1 %v7616_v9 }
 0x3a0   :  { %659 = vmatprep.subr.mxu1 %v7622_v10 }
 0x3a1   :  { %660 = vmatpush1.msra.mxu1 %v7628_v12 }
 0x3a2   :  { %6277 = vmatmul.mubr.msk.f32.vlgmr.msra.gmra.mxu1 %vm95_vm3, %v7523_v42 }
 0x3a3   :  { %865 = vmatprep.mubr.f32.mxu1 %v9733_v1 }
 0x456   :  { %v466_v15 = vpop.f32.mrf.mxu1 }
 0x458   :  { %v468_v16 = vpop.f32.mrf.mxu1 }
 0x459   :  { %6286 = vmatprep.subr.msk.mxu0 %vm711_vm4, %v468_v16  ;;  %v7794_v16 = vld [vmem:[%s9706_s16 + $0xb0] sm:$0xff] }
 0x45a   :  { %6287 = vmatpush1.msk.msra.mxu0 %vm711_vm4, %v466_v15  ;;  %v537_v22 = vpop.f32.mrf.mxu1  ;;  %v7787_v15 = vld [vmem:[%s9706_s16 + $0x38] sm:$0xff]  ;;  %9937 = vst [vmem:[#allocation28_spill] sm:$0xff] %v7794_v16 }
 0x45b   :  { %6288 = vmatmul.mubr.msk.f32.vlgmr.msra.gmra.mxu0 %vm704_vm6, %v7655_v17  ;;  %6438 = vmatprep.subr.mxu0 %v7660_v18  ;;  %9936 = vst [vmem:[#allocation27_spill] sm:$0xff] %v7787_v15 }
 0x45c   :  { %966 = vmatprep.mubr.f32.mxu0 %v9733_v1  ;;  %6439 = vmatpush3.msra.mxu0 %v7666_v19  ;;  %v539_v41 = vpop.f32.mrf.mxu1 }
 0x45d   :  { %6440 = vmatprep.subr.mxu0 %v7672_v20 }
 0x45e   :  { %6441 = vmatpush3.msra.mxu0 %v7680_v21 }
 0x45f   :  { %6289 = vmatmul.mubr.msk.f32.gmra.mxu0 %vm704_vm6, %v7686_v23  ;;  %6442 = vmatprep.subr.mxu0 %v7692_v24 }
 0x460   :  { %6443 = vmatpush3.msra.mxu0 %v7698_v25 }
 0x461   :  { %6444 = vmatprep.subr.mxu0 %v7704_v39 }
 0x462   :  { %v695_v45 = vpop.f32.mrf.mxu1  ;;  %6445 = vmatpush3.msra.mxu0 %v7712_v40 }
 0x463   :  { %6446 = vmatprep.subr.mxu0 %v7718_v43 }
 0x464   :  { %v697_v51 = vpop.f32.mrf.mxu1  ;;  %6447 = vmatpush3.msra.mxu0 %v7724_v44 }
 0x465   :  { %6282 = vmatprep.subr.msk.mxu1 %vm711_vm4, %v697_v51  ;;  %6448 = vmatprep.subr.mxu0 %v7730_v46  ;;  %v7818_v51 = vld [vmem:[%s9706_s16 + $0x170] sm:$0xff] }
 0x466   :  { %6283 = vmatpush1.msk.msra.mxu1 %vm711_vm4, %v695_v45  ;;  %6449 = vmatpush3.msra.mxu0 %v7736_v49  ;;  %v7811_v45 = vld [vmem:[%s9706_s16 + $0x30] sm:$0xff]  ;;  %9941 = vst [vmem:[#allocation32_spill] sm:$0xff] %v7818_v51 }
 0x467   :  { %6284 = vmatmul.mubr.msk.f32.vlgmr.msra.gmra.mxu1 %vm704_vm6, %v7639_v13  ;;  %6290 = vmatprep.subr.msk.mxu1 %vm711_vm4, %v539_v41  ;;  %v7805_v41 = vld [vmem:[%s9706_s16 + $0x1f0] sm:$0xff]  ;;  %9940 = vst [vmem:[#allocation31_spill] sm:$0xff] %v7811_v45 }
 0x468   :  { %6291 = vmatpush1.msk.msra.mxu1 %vm711_vm4, %v537_v22  ;;  %871 = vmatprep.mubr.f32.mxu1 %v9733_v1  ;;  %v7799_v22 = vld [vmem:[%s9706_s16 + $0x178] sm:$0xff]  ;;  %9939 = vst [vmem:[#allocation30_spill] sm:$0xff] %v7805_v41 }
 0x469   :  { %6450 = vmatprep.subr.mxu0 %v7746_v56  ;;  %6476 = vmatprep.subr.mxu1 %v7751_v57  ;;  %9938 = vst [vmem:[#allocation29_spill] sm:$0xff] %v7799_v22 }
 0x46a   :  { %6451 = vmatpush3.msra.mxu0 %v7759_v58 }
 0x46b   :  { %6285 = vmatmul.mubr.msk.f32.gmra.mxu1 %vm704_vm6, %v7647_v14  ;;  %6452 = vmatprep.subr.mxu0 %v7766_v59 }
 0x46c   :  { %1037 = vmatprep.mubr.f32.mxu1 %v9733_v1  ;;  %6453 = vmatpush3.msra.mxu0 %v7773_v60  ;;  %v8077_v60 = vsub.s32 1, %v7531_v47 }
 0x46d   :  { %6454 = vmatprep.subr.mxu0 %v7779_v61  ;;  %v1050_v61 = vld [vmem:[%s9704_s14] sm:$0xf] }
 0x46e   :  { %6455 = vmatpush3.msra.mxu0 %v7787_v15  ;;  %v7832_v15 = vld [vmem:[%s9706_s16 + $0x168] sm:$0xff]  ;;  %9984 = vst [vmem:[#allocation74_spill] sm:$0xff] %v8077_v60  ;;  %v1059_v56 = vrot.slane %v1050_v61, %v8077_v60 }
 0x46f   :  { %6292 = vmatmul.mubr.msk.f32.vlgmr.msra.gmra.mxu1 %vm704_vm6, %v7655_v17  ;;  %6456 = vmatprep.subr.mxu0 %v7794_v16  ;;  %9943 = vst [vmem:[#allocation34_spill] sm:$0xff] %v7832_v15 }
 0x470   :  { %1043 = vmatprep.mubr.f32.mxu1 %v9733_v1  ;;  %6477 = vmatpush3.msra.mxu1 %v7799_v22  ;;  %v7839_v1 = vld [vmem:[%s9706_s16 + $0x1e0] sm:$0xff] }
 0x471   :  { %6478 = vmatprep.subr.mxu1 %v7805_v41  ;;  %6457 = vmatpush3.msra.mxu0 %v7811_v45  ;;  %9944 = vst [vmem:[#allocation35_spill] sm:$0xff] %v7839_v1  ;;  %v7849_v45 = vld [vmem:[%s9706_s16 + $0xa8] sm:$0xff]  ;;  %v7888_v41 = vld [vmem:[%s9706_s16 + $0x1d0] sm:$0xff] }
 0x472   :  { %6479 = vmatpush3.msra.mxu1 %v7818_v51  ;;  %9945 = vst [vmem:[#allocation36_spill] sm:$0xff] %v7849_v45  ;;  %v7854_v51 = vld [vmem:[%s9706_s16 + $0x160] sm:$0xff]  ;;  %6458 = vmatprep.subr.mxu0 %v7849_v45  ;;  %9952 = vst [vmem:[#allocation43_spill] sm:$0xff] %v7888_v41 }
 0x473   :  { %6293 = vmatmul.mubr.msk.f32.gmra.mxu1 %vm704_vm6, %v7686_v23  ;;  %6480 = vmatprep.subr.mxu1 %v7826_v48  ;;  %9946 = vst [vmem:[#allocation37_spill] sm:$0xff] %v7854_v51  ;;  %v7871_v48 = vld [vmem:[%s9706_s16 + $0xa0] sm:$0xff] }
 0x474   :  { %6481 = vmatpush3.msra.mxu1 %v7832_v15  ;;  %v7861_v15 = vld [vmem:[%s9706_s16 + $0x28] sm:$0xff]  ;;  %9949 = vst [vmem:[#allocation40_spill] sm:$0xff] %v7871_v48  ;;  %v7883_v45 = vld [vmem:[%s9706_s16 + $0x20] sm:$0xff] }
 0x475   :  { %6482 = vmatprep.subr.mxu1 %v7839_v1  ;;  %9947 = vst [vmem:[#allocation38_spill] sm:$0xff] %v7861_v15  ;;  %v7866_v1 = vld [vmem:[%s9706_s16 + $0x1d8] sm:$0xff]  ;;  %6459 = vmatpush3.msra.mxu0 %v7861_v15  ;;  %9951 = vst [vmem:[#allocation42_spill] sm:$0xff] %v7883_v45  ;;  %v7900_v15 = vld [vmem:[%s9706_s16 + $0x150] sm:$0xff] }
 0x476   :  { %6483 = vmatpush3.msra.mxu1 %v7854_v51  ;;  %9948 = vst [vmem:[#allocation39_spill] sm:$0xff] %v7866_v1  ;;  %v7878_v51 = vld [vmem:[%s9706_s16 + $0x158] sm:$0xff]  ;;  %6460 = vmatprep.subr.mxu0 %v7871_v48  ;;  %9954 = vst [vmem:[#allocation45_spill] sm:$0xff] %v7900_v15  ;;  %v7914_v48 = vld [vmem:[%s9706_s16 + $0x1c8] sm:$0xff] }
 0x477   :  { %6484 = vmatprep.subr.mxu1 %v7866_v1  ;;  %9950 = vst [vmem:[#allocation41_spill] sm:$0xff] %v7878_v51  ;;  %v7895_v1 = vld [vmem:[%s9706_s16 + $0x98] sm:$0xff]  ;;  %6461 = vmatpush3.msra.mxu0 %v7883_v45  ;;  %9956 = vst [vmem:[#allocation47_spill] sm:$0xff] %v7914_v48 }
 0x478   :  { %6485 = vmatpush3.msra.mxu1 %v7878_v51  ;;  %9953 = vst [vmem:[#allocation44_spill] sm:$0xff] %v7895_v1  ;;  %6462 = vmatprep.subr.mxu0 %v7895_v1  ;;  %v7909_v51 = vld [vmem:[%s9706_s16 + $0x18] sm:$0xff]  ;;  %v9971_v1 = vmov 0.0  }
 0x479   :  { %6486 = vmatprep.subr.mxu1 %v7888_v41  ;;  %9955 = vst [vmem:[#allocation46_spill] sm:$0xff] %v7909_v51  ;;  %6463 = vmatpush3.msra.mxu0 %v7909_v51  ;;  %v7921_v41 = vld [vmem:[%s9706_s16 + $0x90] sm:$0xff] }
 0x47a   :  { %6487 = vmatpush3.msra.mxu1 %v7900_v15  ;;  %9957 = vst [vmem:[#allocation48_spill] sm:$0xff] %v7921_v41  ;;  %v7926_v15 = vld [vmem:[%s9706_s16 + $0x148] sm:$0xff]  ;;  %6464 = vmatprep.subr.mxu0 %v7921_v41  ;;  %v7933_v51 = vld [vmem:[%s9706_s16 + $0x10] sm:$0xff] }
 0x47b   :  { %6488 = vmatprep.subr.mxu1 %v7914_v48  ;;  %9958 = vst [vmem:[#allocation49_spill] sm:$0xff] %v7926_v15  ;;  %9959 = vst [vmem:[#allocation50_spill] sm:$0xff] %v7933_v51  ;;  %v7938_v48 = vld [vmem:[%s9706_s16 + $0x1c0] sm:$0xff]  ;;  %6465 = vmatpush3.msra.mxu0 %v7933_v51  ;;  %v7945_v41 = vld [vmem:[%s9706_s16 + $0x88] sm:$0xff] }
 0x47c   :  { %6489 = vmatpush3.msra.mxu1 %v7926_v15  ;;  %9960 = vst [vmem:[#allocation51_spill] sm:$0xff] %v7938_v48  ;;  %9961 = vst [vmem:[#allocation52_spill] sm:$0xff] %v7945_v41  ;;  %v7950_v15 = vld [vmem:[%s9706_s16 + $0x140] sm:$0xff]  ;;  %6466 = vmatprep.subr.mxu0 %v7945_v41  ;;  %v7957_v51 = vld [vmem:[%s9706_s16 + $0x8] sm:$0xff] }
 0x47d   :  { %6490 = vmatprep.subr.mxu1 %v7938_v48  ;;  %9962 = vst [vmem:[#allocation53_spill] sm:$0xff] %v7950_v15  ;;  %9963 = vst [vmem:[#allocation54_spill] sm:$0xff] %v7957_v51  ;;  %v7962_v48 = vld [vmem:[%s9706_s16 + $0x1b8] sm:$0xff]  ;;  %6467 = vmatpush3.msra.mxu0 %v7957_v51  ;;  %v7969_v41 = vld [vmem:[%s9706_s16 + $0x80] sm:$0xff] }
 0x47e   :  { %6491 = vmatpush3.msra.mxu1 %v7950_v15  ;;  %9964 = vst [vmem:[#allocation55_spill] sm:$0xff] %v7962_v48  ;;  %9965 = vst [vmem:[#allocation56_spill] sm:$0xff] %v7969_v41  ;;  %v7974_v15 = vld [vmem:[%s9706_s16 + $0x138] sm:$0xff]  ;;  %6468 = vmatprep.subr.mxu0 %v7969_v41  ;;  %v7981_v51 = vld [vmem:[%s9706_s16] sm:$0xff] }
 0x47f   :  { %6492 = vmatprep.subr.mxu1 %v7962_v48  ;;  %9966 = vst [vmem:[#allocation57_spill] sm:$0xff] %v7974_v15  ;;  %9967 = vst [vmem:[#allocation58_spill] sm:$0xff] %v7981_v51  ;;  %v7986_v48 = vld [vmem:[%s9706_s16 + $0x1b0] sm:$0xff]  ;;  %6469 = vmatpush3.msra.mxu0 %v7981_v51  ;;  %v8018_v51 = vld [vmem:[%s9706_s16 + $0x120] sm:$0xff] }
 0x480   :  { %6493 = vmatpush3.msra.mxu1 %v7974_v15  ;;  %9968 = vst [vmem:[#allocation59_spill] sm:$0xff] %v7986_v48  ;;  %v7993_v41 = vld [vmem:[%s9706_s16 + $0x130] sm:$0xff]  ;;  %v7999_v15 = vld [vmem:[%s9706_s16 + $0x1a8] sm:$0xff]  ;;  %6897 = vmatprep.subr.mxu0 %v9971_v1  ;;  %9974 = vst [vmem:[#allocation64_spill] sm:$0xff] %v8018_v51 }
 0x481   :  { %6494 = vmatprep.subr.mxu1 %v7986_v48  ;;  %9969 = vst [vmem:[#allocation60_spill] sm:$0xff] %v7993_v41  ;;  %9970 = vst [vmem:[#allocation61_spill] sm:$0xff] %v7999_v15  ;;  %v8006_v48 = vld [vmem:[%s9706_s16 + $0x128] sm:$0xff] }
 0x482   :  { %6495 = vmatpush3.msra.mxu1 %v7993_v41  ;;  %9972 = vst [vmem:[#allocation62_spill] sm:$0xff] %v8006_v48  ;;  %v8012_v41 = vld [vmem:[%s9706_s16 + $0x1a0] sm:$0xff] }
 0x483   :  { %6496 = vmatprep.subr.mxu1 %v7999_v15  ;;  %9973 = vst [vmem:[#allocation63_spill] sm:$0xff] %v8012_v41  ;;  %v8024_v15 = vld [vmem:[%s9706_s16 + $0x198] sm:$0xff] }
 0x484   :  { %6497 = vmatpush3.msra.mxu1 %v8006_v48  ;;  %9975 = vst [vmem:[#allocation65_spill] sm:$0xff] %v8024_v15  ;;  %v8030_v48 = vld [vmem:[%s9706_s16 + $0x118] sm:$0xff] }
 0x485   :  { %6498 = vmatprep.subr.mxu1 %v8012_v41  ;;  %9976 = vst [vmem:[#allocation66_spill] sm:$0xff] %v8030_v48  ;;  %v8036_v41 = vld [vmem:[%s9706_s16 + $0x190] sm:$0xff] }
 0x486   :  { %6499 = vmatpush3.msra.mxu1 %v8018_v51  ;;  %9977 = vst [vmem:[#allocation67_spill] sm:$0xff] %v8036_v41  ;;  %v8042_v51 = vld [vmem:[%s9706_s16 + $0x110] sm:$0xff] }
 0x487   :  { %6500 = vmatprep.subr.mxu1 %v8024_v15  ;;  %9978 = vst [vmem:[#allocation68_spill] sm:$0xff] %v8042_v51  ;;  %v8048_v15 = vld [vmem:[%s9706_s16 + $0x188] sm:$0xff] }
 0x488   :  { %6501 = vmatpush3.msra.mxu1 %v8030_v48  ;;  %9979 = vst [vmem:[#allocation69_spill] sm:$0xff] %v8048_v15  ;;  %v8054_v48 = vld [vmem:[%s9706_s16 + $0x108] sm:$0xff] }
 0x489   :  { %6502 = vmatprep.subr.mxu1 %v8036_v41  ;;  %9980 = vst [vmem:[#allocation70_spill] sm:$0xff] %v8054_v48  ;;  %v8060_v41 = vld [vmem:[%s9706_s16 + $0x180] sm:$0xff] }
 0x48a   :  { %6503 = vmatpush3.msra.mxu1 %v8042_v51  ;;  %9981 = vst [vmem:[#allocation71_spill] sm:$0xff] %v8060_v41  ;;  %v8065_v51 = vld [vmem:[%s9706_s16 + $0x100] sm:$0xff] }
 0x48b   :  { %6504 = vmatprep.subr.mxu1 %v8048_v15  ;;  %9982 = vst [vmem:[#allocation72_spill] sm:$0xff] %v8065_v51  ;;  %v790_v15 = vpop.f32.mrf.mxu0 }
 0x48c   :  { %6505 = vmatpush3.msra.mxu1 %v8054_v48  ;;  %v8071_v48 = vsub.s32 0, %v7531_v47 }
 0x48d   :  { %6506 = vmatprep.subr.mxu1 %v8060_v41  ;;  %v792_v45 = vpop.f32.mrf.mxu0 }
 0x48e   :  { %6507 = vmatpush3.msra.mxu1 %v8065_v51  ;;  %9983 = vst [vmem:[#allocation73_spill] sm:$0xff] %v8071_v48  ;;  %v1080_v51 = vld [vmem:[%s9705_s15] sm:$0xf]  ;;  %v1055_v41 = vrot.slane %v1050_v61, %v8071_v48 }
 0x48f   :  { %6916 = vmatprep.subr.mxu1 %v9971_v1  ;;  %v796_v22 = vpop.f32.mrf.mxu0  ;;  %v1085_v57 = vrot.slane %v1080_v51, %v8071_v48  ;;  %v1089_v43 = vrot.slane %v1080_v51, %v8077_v60  ;;  %v8087_v60 = vsub.s32 2, %v7531_v47 }
 0x491   :  { %v798_v16 = vpop.f32.mrf.mxu0 }
 0x51b   :  { %v962_v59 = vpop.f32.mrf.mxu0 }
 0x51c   :  { %v963_v58 = vadd.f32 %v962_v59, %v790_v15 }
 0x51d   :  { %v964_v49 = vpop.f32.mrf.mxu0 }
 0x51e   :  { %v1072_v46 = vmul.f32 %v1055_v41, %v963_v58  ;;  %v965_v44 = vadd.f32 %v964_v49, %v792_v45 }
 0x51f   :  { %v968_v40 = vpop.f32.mrf.mxu0 }
 0x520   :  { %v1102_v39 = vadd.f32 %v1085_v57, %v1072_v46  ;;  %v1073_v25 = vmul.f32 %v1059_v56, %v965_v44  ;;  %v969_v24 = vadd.f32 %v968_v40, %v796_v22 }
 0x521   :  { %v970_v23 = vpop.f32.mrf.mxu0 }
 0x522   :  { %v1076_v21 = vmul.f32 %v1055_v41, %v969_v24  ;;  %v971_v20 = vadd.f32 %v970_v23, %v798_v16  ;;  %v1103_v19 = vadd.f32 %v1089_v43, %v1073_v25  ;;  %v1110_v18 = vmax.f32 %v1102_v39, 0.0 }
 0x523   :  { %v8090_v23 = vsub.s32 3, %v7531_v47 }
 0x524   :  { %v1077_v17 = vmul.f32 %v1059_v56, %v971_v20  ;;  %v1111_v59 = vmax.f32 %v1103_v19, 0.0  ;;  %v1106_v15 = vadd.f32 %v1085_v57, %v1076_v21  ;;  %v1093_v21 = vrot.slane %v1080_v51, %v8087_v60 }
 0x526   :  { %1246 = vmatprep.mubr.f32.mxu0 %v1111_v59  ;;  %v1107_v48 = vadd.f32 %v1089_v43, %v1077_v17  ;;  %v1114_v58 = vmax.f32 %v1106_v15, 0.0  ;;  %v1063_v17 = vrot.slane %v1050_v61, %v8087_v60  ;;  %v1097_v43 = vrot.slane %v1080_v51, %v8090_v23  ;;  %v8106_v51 = vld [vmem:[%s9709_s19 + $0x10] sm:$0xff] }
 0x527   :  { %v867_v14 = vpop.f32.mrf.mxu1  ;;  %1247 = vmatmul.mubr.f32.vlgmr.msra.gmra.mxu0 %v1110_v18 }
 0x528   :  { %v1115_v49 = vmax.f32 %v1107_v48, 0.0  ;;  %v1067_v48 = vrot.slane %v1050_v61, %v8090_v23  ;;  %v8101_v61 = vld [vmem:[%s9709_s19 + $0x18] sm:$0xff] }
 0x529   :  { %v869_v45 = vpop.f32.mrf.mxu1 }
 0x52a   :  { %1251 = vmatprep.mubr.f32.mxu0 %v1115_v49 }
 0x52b   :  { %v873_v40 = vpop.f32.mrf.mxu1  ;;  %1252 = vmatmul.mubr.f32.gmra.mxu0 %v1114_v58 }
 0x52c   :  { %6913 = vmatprep.mubr.msk.f32.mxu0 %vm7237_vm2, %v9971_v1 }
 0x52d   :  { %v875_v19 = vpop.f32.mrf.mxu1 }
 0x52f   :  { %v1039_v20 = vpop.f32.mrf.mxu1 }
 0x530   :  { %v1040_v18 = vadd.f32 %v1039_v20, %v867_v14  ;;  %v8135_v20 = vld [vmem:[%s9710_s20 + $0x38] sm:$0xff] }
 0x531   :  { %v1041_v24 = vpop.f32.mrf.mxu1  ;;  %6898 = vmatpush3.msra.mxu0 %v8135_v20 }
 0x532   :  { %v1074_v25 = vmul.f32 %v1063_v17, %v1040_v18  ;;  %v1042_v39 = vadd.f32 %v1041_v24, %v869_v45  ;;  %6899 = vmatprep.subr.mxu0 %v9971_v1  ;;  %v8142_v18 = vld [vmem:[%s9710_s20 + $0x30] sm:$0xff] }
 0x533   :  { %v1045_v44 = vpop.f32.mrf.mxu1  ;;  %6900 = vmatpush3.msra.mxu0 %v8142_v18  ;;  %v8170_v24 = vld [vmem:[%s9710_s20 + $0x10] sm:$0xff] }
 0x534   :  { %v1075_v47 = vmul.f32 %v1067_v48, %v1042_v39  ;;  %v1046_v46 = vadd.f32 %v1045_v44, %v873_v40  ;;  %v1104_v56 = vadd.f32 %v1093_v21, %v1074_v25  ;;  %6901 = vmatprep.subr.mxu0 %v9971_v1  ;;  %v8177_v25 = vld [vmem:[%s9710_s20 + $0x8] sm:$0xff]  ;;  %v8184_v39 = vld [vmem:[%s9710_s20] sm:$0xff]  ;;  %v8195_v44 = vld [vmem:[%s9713_s23 + $0x30] sm:$0xff] }
 0x535   :  { %v1047_v57 = vpop.f32.mrf.mxu1  ;;  %9988 = vst [vmem:[#allocation78_spill] sm:$0xff] %v8195_v44 }
 0x536   :  { %v1078_v16 = vmul.f32 %v1063_v17, %v1046_v46  ;;  %v1048_v22 = vadd.f32 %v1047_v57, %v875_v19  ;;  %v1105_v41 = vadd.f32 %v1097_v43, %v1075_v47  ;;  %v1112_v14 = vmax.f32 %v1104_v56, 0.0  ;;  %v8113_v19 = vld [vmem:[%s9709_s19 + $0x8] sm:$0xff]  ;;  %v8120_v17 = vld [vmem:[%s9709_s19] sm:$0xff] }
 0x537   :  { %9985 = vst [vmem:[#allocation75_spill] sm:$0xff] %v8113_v19  ;;  %9986 = vst [vmem:[#allocation76_spill] sm:$0xff] %v8120_v17  ;;  %v8203_v47 = vld [vmem:[%s9713_s23 + $0x28] sm:$0xff] }
 0x538   :  { %v1079_v59 = vmul.f32 %v1067_v48, %v1048_v22  ;;  %v1113_v15 = vmax.f32 %v1105_v41, 0.0  ;;  %v1108_v58 = vadd.f32 %v1093_v21, %v1078_v16  ;;  %v8156_v48 = vld [vmem:[%s9710_s20 + $0x20] sm:$0xff]  ;;  %v8163_v21 = vld [vmem:[%s9710_s20 + $0x18] sm:$0xff]  ;;  %9989 = vst [vmem:[#allocation79_spill] sm:$0xff] %v8203_v47 }
 0x53a   :  { %1321 = vmatprep.mubr.f32.mxu1 %v1113_v15  ;;  %v1109_v49 = vadd.f32 %v1097_v43, %v1079_v59  ;;  %v1116_v40 = vmax.f32 %v1108_v58, 0.0  ;;  %v8190_v43 = vld [vmem:[%s9713_s23 + $0x38] sm:$0xff] }
 0x53b   :  { %1322 = vmatmul.mubr.f32.vlgmr.msra.gmra.mxu1 %v1112_v14  ;;  %9987 = vst [vmem:[#allocation77_spill] sm:$0xff] %v8190_v43  ;;  %v8212_v14 = vld [vmem:[%s9707_s17] ss:$0 sm:$0xff] }
 0x53c   :  { %6917 = vmatpush3.msra.mxu1 %v8101_v61  ;;  %v1117_v45 = vmax.f32 %v1109_v49, 0.0 }
 0x53d   :  { %6918 = vmatprep.subr.mxu1 %v9971_v1 }
 0x53e   :  { %1326 = vmatprep.mubr.f32.mxu1 %v1117_v45  ;;  %6919 = vmatpush3.msra.mxu1 %v8106_v51  ;;  %v8217_v45 = vld [vmem:[%s9708_s18] ss:$0 sm:$0xff] }
 0x53f   :  { %1327 = vmatmul.mubr.f32.gmra.mxu1 %v1116_v40  ;;  %6920 = vmatprep.subr.mxu1 %v9971_v1 }
 0x540   :  { %6921 = vmatpush3.msra.mxu1 %v8113_v19  ;;  %6924 = vmatprep.mubr.msk.f32.mxu1 %vm7237_vm2, %v9971_v1 }
 0x541   :  { %6922 = vmatprep.subr.mxu1 %v9971_v1 }
 0x542   :  { %6923 = vmatpush3.msra.mxu1 %v8120_v17 }
 0x543   :  { %6925 = vmatmul.mubr.msk.f32.vlgmr.msra.gmra.mxu1 %vm95_vm3, %v7523_v42  ;;  %6927 = vmatprep.subr.mxu1 %v9971_v1  ;;  %v8149_v42 = vld [vmem:[%s9710_s20 + $0x28] sm:$0xff] }
 0x544   :  { %6943 = vmatprep.mubr.msk.f32.mxu1 %vm7237_vm2, %v9971_v1  ;;  %6902 = vmatpush3.msra.mxu0 %v8149_v42 }
 0x545   :  { %6903 = vmatprep.subr.mxu0 %v9971_v1  ;;  %6928 = vmatpush3.msra.mxu1 %v8190_v43 }
 0x546   :  { %6904 = vmatpush3.msra.mxu0 %v8156_v48  ;;  %6929 = vmatprep.subr.mxu1 %v9971_v1 }
 0x547   :  { %6905 = vmatprep.subr.mxu0 %v9971_v1  ;;  %6930 = vmatpush3.msra.mxu1 %v8195_v44 }
 0x548   :  { %6906 = vmatpush3.msra.mxu0 %v8163_v21  ;;  %6931 = vmatprep.subr.mxu1 %v9971_v1 }
 0x549   :  { %6907 = vmatprep.subr.mxu0 %v9971_v1  ;;  %6932 = vmatpush3.msra.mxu1 %v8203_v47 }
 0x54a   :  { %6908 = vmatpush3.msra.mxu0 %v8170_v24  ;;  %6933 = vmatprep.subr.mxu1 %v9971_v1 }
 0x54b   :  { %6909 = vmatprep.subr.mxu0 %v9971_v1 }
 0x54c   :  { %6910 = vmatpush3.msra.mxu0 %v8177_v25 }
 0x54d   :  { %6911 = vmatprep.subr.mxu0 %v9971_v1 }
 0x54e   :  { %6912 = vmatpush3.msra.mxu0 %v8184_v39 }
 0x54f   :  { %6946 = vmatprep.subr.mxu0 %v9971_v1 }
 0x5e7   :  { %v6470_v46 = vpop.f32.mrf.mxu0 }
 0x5e9   :  { %v6471_v56 = vpop.f32.mrf.mxu0 }
 0x5ea   :  { %v6472_v41 = vadd.f32 %v6471_v56, %v6470_v46 }
 0x5eb   :  { %v6473_v57 = vpop.f32.mrf.mxu0 }
 0x5ed   :  { %v6474_v15 = vpop.f32.mrf.mxu0 }
 0x5ee   :  { %v6475_v47 = vadd.f32 %v6474_v15, %v6473_v57  ;;  %v8232_v15 = vld [vmem:[%s9990_s10 + $0x8] sm:$0xff] }
 0x5fb   :  { %v6508_v16 = vpop.f32.mrf.mxu1 }
 0x5fd   :  { %v6509_v22 = vpop.f32.mrf.mxu1 }
 0x5fe   :  { %v6510_v59 = vadd.f32 %v6509_v22, %v6508_v16  ;;  %v8224_v22 = vld [vmem:[%s9990_s10] sm:$0xff] }
 0x5ff   :  { %v6511_v58 = vpop.f32.mrf.mxu1 }
 0x600   :  { %v1324_v49 = vadd.f32 %v6510_v59, %v6472_v41 }
 0x601   :  { %v6512_v40 = vpop.f32.mrf.mxu1 }
 0x602   :  { %v1339_v44 = vmul.f32 %v8212_v14, %v1324_v49  ;;  %v6513_v43 = vadd.f32 %v6512_v40, %v6511_v58 }
 0x603   :  { %v1517_v46 = vpop.f32.mrf.mxu1 }
 0x604   :  { %v1348_v56 = vadd.f32 %v8217_v45, %v1339_v44  ;;  %v1329_v16 = vadd.f32 %v6513_v43, %v6475_v47 }
 0x605   :  { %v6926_v41 = vpop.f32.mrf.mxu1 }
 0x606   :  { %v1350_v59 = vmax.f32 %v1348_v56, 0.0  ;;  %v1340_v17 = vmul.f32 %v8212_v14, %v1329_v16  ;;  %v8284_v16 = vld [vmem:[%s9711_s21] ss:$0 sm:$0xff] }
 0x608   :  { %v1354_v19 = vadd.f32 %v8224_v22, %v1350_v59  ;;  %v1349_v57 = vadd.f32 %v8217_v45, %v1340_v17  ;;  %v8289_v59 = vld [vmem:[%s9712_s22] ss:$0 sm:$0xff] }
 0x60a   :  { %v1351_v44 = vmax.f32 %v1349_v57, 0.0  ;;  %v1357_v43 = vrot.slane %v1354_v19, 4 }
 0x60c   :  { %v1355_v47 = vadd.f32 %v8232_v15, %v1351_v44  ;;  %v1359_v49 = vmax.f32 %v1354_v19, %v1357_v43  ;;  %v8277_v19 = vld [vmem:[%s9713_s23] sm:$0xff] }
 0x60e   :  { %v1361_v58 = vrot.slane %v1355_v47, 4 }
 0x610   :  { %v1363_v40 = vmax.f32 %v1355_v47, %v1361_v58 }
 0x612   :  { %v1364_v56 = vmax.f32 %v1359_v49, %v1363_v40 }
 0x614   :  { %6914 = vmatmul.mubr.msk.f32.vlgmr.msra.gmra.mxu0 %vm1377_vm7, %v1364_v56 }
 0x615   :  { %6947 = vmatpush3.msra.mxu0 %v7385_v0  ;;  %6954 = vmatprep.mubr.msk.f32.mxu0 %vm7237_vm2, %v9971_v1  ;;  %v8249_v0 = vld [vmem:[%s9713_s23 + $0x20] sm:$0xff] }
 0x616   :  { %6948 = vmatprep.subr.mxu0 %v9971_v1  ;;  %6934 = vmatpush3.msra.mxu1 %v8249_v0 }
 0x617   :  { %6949 = vmatpush3.msra.mxu0 %v7391_v2  ;;  %6935 = vmatprep.subr.mxu1 %v9971_v1  ;;  %v8256_v2 = vld [vmem:[%s9713_s23 + $0x18] sm:$0xff] }
 0x618   :  { %6950 = vmatprep.subr.mxu0 %v9971_v1  ;;  %6936 = vmatpush3.msra.mxu1 %v8256_v2 }
 0x619   :  { %6951 = vmatpush3.msra.mxu0 %v7406_v5  ;;  %6937 = vmatprep.subr.mxu1 %v9971_v1  ;;  %v8263_v5 = vld [vmem:[%s9713_s23 + $0x10] sm:$0xff] }
 0x61a   :  { %6952 = vmatprep.subr.mxu0 %v9971_v1  ;;  %6938 = vmatpush3.msra.mxu1 %v8263_v5 }
 0x61b   :  { %6953 = vmatpush3.msra.mxu0 %v7416_v6  ;;  %6939 = vmatprep.subr.mxu1 %v9971_v1  ;;  %v8270_v6 = vld [vmem:[%s9713_s23 + $0x8] sm:$0xff] }
 0x61c   :  { %6957 = vmatprep.subr.mxu0 %v9971_v1  ;;  %6940 = vmatpush3.msra.mxu1 %v8270_v6 }
 0x61d   :  { %6941 = vmatprep.subr.mxu1 %v9971_v1 }
 0x61e   :  { %6942 = vmatpush3.msra.mxu1 %v8277_v19 }
 0x61f   :  { %6962 = vmatprep.subr.mxu1 %v9971_v1 }
 0x6d4   :  { %v1447_v17 = vpop.f32.mrf.mxu0 }
 0x6d5   :  { %v1518_v41 = vadd.f32 %v1517_v46, %v1447_v17 }
 0x6d6   :  { %v6915_v57 = vpop.f32.mrf.mxu0 }
 0x6d7   :  { %v1528_v44 = vmul.f32 %v8284_v16, %v1518_v41 }
 0x6d9   :  { %v1536_v43 = vadd.f32 %v8289_v59, %v1528_v44 }
 0x6db   :  { %v1537_v47 = vmax.f32 %v1536_v43, 0.0 }
 0x6dd   :  { %6944 = vmatmul.mubr.msk.f32.vlgmr.msra.gmra.mxu1 %vm1377_vm7, %v1537_v47 }
 0x6de   :  { %6963 = vmatpush3.msra.mxu1 %v7454_v28  ;;  %6970 = vmatprep.mubr.msk.f32.mxu1 %vm7237_vm2, %v9971_v1  ;;  %v8307_v28 = vld [vmem:[%s9714_s24] ss:$0 sm:$0xff] }
 0x6df   :  { %6964 = vmatprep.subr.mxu1 %v9971_v1 }
 0x6e0   :  { %6965 = vmatpush3.msra.mxu1 %v7471_v31  ;;  %v8312_v31 = vld [vmem:[%s9715_s25] ss:$0 sm:$0xff] }
 0x6e1   :  { %6966 = vmatprep.subr.mxu1 %v9971_v1 }
 0x6e2   :  { %6967 = vmatpush3.msra.mxu1 %v7488_v34 }
 0x6e3   :  { %6968 = vmatprep.subr.mxu1 %v9971_v1 }
 0x6e4   :  { %6969 = vmatpush3.msra.mxu1 %v7507_v37 }
 0x6e5   :  { %2120 = vmatprep.subr.mxu1 %v7449_v27  ;;  %v1638_v27 = vld [vmem:[%s9904_s0] sm:$0x3] }
 0x79d   :  { %v1615_v46 = vpop.f32.mrf.mxu1 }
 0x79e   :  { %v1626_v58 = vmul.f32 %v8307_v28, %v1615_v46 }
 0x79f   :  { %v6945_v34 = vpop.f32.mrf.mxu1 }
 0x7a0   :  { %v1634_v49 = vadd.f32 %v8312_v31, %v1626_v58 }
 0x7a2   :  { %v1635_v40 = vmax.f32 %v1634_v49, 0.0 }
 0x7a4   :  { %6955 = vmatmul.mubr.msk.f32.vlgmr.msra.gmra.mxu0 %vm95_vm3, %v1635_v40 }
 0x7a5   :  { %6958 = vmatpush3.msk.msra.mxu0 %vm173_vm0, %v1638_v27  ;;  %6959 = vmatprep.mubr.msk.f32.mxu0 %vm7237_vm2, %v9971_v1 }
 0x7a6   :  { %6310 = vmatprep.subr.msk.mxu0 %vm173_vm0, %v7544_v52 }
 0x7a8   :  { %6960 = vmatmul.mubr.msk.f32.vlgmr.msra.gmra.mxu0 %vm169_vm1, %v7568_v62 }
 0x7a9   :  { %6311 = vmatpush1.msk.msra.mxu0 %vm173_vm0, %v7540_v50  ;;  %2002 = vmatprep.mubr.f32.mxu0 %v9971_v1 }
 0x7aa   :  { %6313 = vmatprep.subr.msk.mxu0 %vm173_vm0, %v7555_v54 }
 0x864   :  { %v1712_v37 = vpop.f32.mrf.mxu0 }
 0x866   :  { %v6956_v56 = vpop.f32.mrf.mxu0 }
 0x868   :  { %v1785_v17 = vpop.f32.mrf.mxu0 }
 0x869   :  { %v1786_v41 = vadd.f32 %v1785_v17, %v1712_v37 }
 0x86a   :  { %v6961_v57 = vpop.f32.mrf.mxu0 }
 0x86b   :  { %v1796_v44 = vadd.f32 %v7434_v11, %v1786_v41  ;;  %v10003_v57 = vld [vmem:[#allocation16_spill] sm:$0xff] }
 0x86d   :  { %7190 = vtanh.f32 %v1796_v44  ;;  %v6307_v43 = vmul.f32 -1.442695, %v1796_v44  ;;  %v10004_v44 = vld [vmem:[#allocation17_spill] sm:$0xff] }
 0x86f   :  { %7192 = vpow2.f32 %v6307_v43  ;;  %v10005_v43 = vld [vmem:[#allocation18_spill] sm:$0xff] }
 0x87a   :  { %v7191_v52 = vpop.eup %7190 }
 0x87b   :  { %1806 = vrot.lane.b32.xlu1 %v7191_v52, %s9991_s7 }
 0x87c   :  { %v7193_v47 = vpop.eup %7192 }
 0x87d   :  { %v1800_v50 = vadd.f32 1.0, %v7193_v47  ;;  %v10006_v47 = vld [vmem:[#allocation19_spill] sm:$0xff] }
 0x87f   :  { %7194 = vrcp.f32 %v1800_v50  ;;  %v10007_v50 = vld [vmem:[#allocation20_spill] sm:$0xff] }
 0x88c   :  { %v7195_v46 = vpop.eup %7194 }
 0x88d   :  { %v1804_v54 = vmul.f32 %v7195_v46, %v7443_v26 }
 0x8ed   :  { %v1807_v58 = vpop.permute.xlu1 %1806 }
 0x8ee   :  { %v1809_v34 = vmul.f32 %v7195_v46, %v1807_v58  ;;  %v10009_v58 = vld [vmem:[#allocation22_spill] sm:$0xff] }
 0x8f0   :  { %1811 = vrot.lane.b32.xlu0 %v1809_v34, %s9992_s4  ;;  %v10010_v34 = vld [vmem:[#allocation23_spill] sm:$0xff] }
 0x962   :  { %v1812_v49 = vpop.permute.xlu0 %1811 }
 0x963   :  { %v8336_v40 = vadd.f32 %v1812_v49, %v1804_v54  ;;  %v10011_v54 = vld [vmem:[#allocation24_spill] sm:$0xff]  ;;  %v10013_v49 = vld [vmem:[#allocation26_spill] sm:$0xff] }
 0x965   :  { %7196 = vtanh.f32 %v8336_v40 }
 0x972   :  { %v7197_v11 = vpop.eup %7196 }
 0x973   :  { %1817 = vrot.lane.b32.xlu1 %v7197_v11, %s9991_s7  ;;  %v10014_v11 = vld [vmem:[#allocation27_spill] sm:$0xff] }
 0x9e5   :  { %v1818_v27 = vpop.permute.xlu1 %1817 }
 0x9e6   :  { %v1820_v37 = vmul.f32 %v7195_v46, %v1818_v27  ;;  %v10008_v46 = vld [vmem:[#allocation21_spill] sm:$0xff]  ;;  %v10015_v27 = vld [vmem:[#allocation28_spill] sm:$0xff] }
 0x9e8   :  { %1833 = vrot.lane.b32.xlu0 %v1820_v37, %s9992_s4  ;;  %v10016_v37 = vld [vmem:[#allocation29_spill] sm:$0xff] }
 0xa5a   :  { %v8341_v56 = vpop.permute.xlu0 %1833 }
 0xa5b   :  { %6971 = vmatmul.mubr.msk.f32.vlgmr.msra.gmra.mxu1 %vm95_vm3, %v8341_v56 }
 0xa5c   :  { %2121 = vmatpush1.msra.mxu1 %v7459_v29  ;;  %2160 = vmatprep.mubr.f32.mxu1 %v9971_v1 }
 0xa5d   :  { %2122 = vmatprep.subr.mxu1 %v7466_v30 }
 0xa5e   :  { %2123 = vmatpush1.msra.mxu1 %v7476_v32 }
 0xa5f   :  { %2124 = vmatprep.subr.mxu1 %v7483_v33 }
 0xa60   :  { %2125 = vmatpush1.msra.mxu1 %v7495_v35  ;;  %v9993_v35 = vld [vmem:[#allocation6_spill] sm:$0xff] }
 0xa61   :  { %2126 = vmatprep.subr.mxu1 %v7502_v36 }
 0xa62   :  { %2127 = vmatpush1.msra.mxu1 %v7514_v38 }
 0xa63   :  { %6316 = vmatmul.mubr.msk.f32.vlgmr.msra.gmra.mxu1 %vm95_vm3, %v8341_v56 }
 0xa64   :  { %2324 = vmatprep.mubr.f32.mxu1 %v9971_v1 }
 0xb1b   :  { %v1903_v26 = vpop.f32.mrf.mxu1 }
 0xb1c   :  { %v1904_v29 = vadd.f32 %v7562_v55, %v1903_v26  ;;  %v9995_v55 = vld [vmem:[#allocation8_spill] sm:$0xff]  ;;  %v10017_v26 = vld [vmem:[#allocation30_spill] sm:$0xff] }
 0xb1d   :  { %v6972_v17 = vpop.f32.mrf.mxu1 }
 0xb1e   :  { %v8358_v30 = vadd.f32 %v1904_v29, %v7568_v62  ;;  %v10018_v29 = vld [vmem:[#allocation31_spill] sm:$0xff]  ;;  %v10019_v17 = vld [vmem:[#allocation32_spill] sm:$0xff] }
 0xb20   :  { %6312 = vmatmul.mubr.msk.f32.vlgmr.msra.gmra.mxu0 %vm169_vm1, %v8358_v30  ;;  %6343 = vst.msk [vmem:[%s9716_s26 + $0x4] sm:$0xf] %vm1636_vm5, %v8358_v30 }
 0xb21   :  { %6314 = vmatpush1.msk.msra.mxu0 %vm173_vm0, %v7547_v53  ;;  %2073 = vmatprep.mubr.f32.mxu0 %v9971_v1  ;;  %v9994_v53 = vld [vmem:[#allocation7_spill] sm:$0xff] }
 0xb22   :  { %2191 = vmatprep.subr.mxu0 %v7575_v63  ;;  %v9996_v63 = vld [vmem:[#allocation9_spill] sm:$0xff] }
 0xb23   :  { %v2162_v32 = vpop.f32.mrf.mxu1 }
 0xb24   :  { %6315 = vmatmul.mubr.msk.f32.vlgmr.msra.gmra.mxu0 %vm169_vm1, %v8358_v30 }
 0xb25   :  { %v2164_v33 = vpop.f32.mrf.mxu1  ;;  %2192 = vmatpush1.msra.mxu0 %v7591_v3  ;;  %2231 = vmatprep.mubr.f32.mxu0 %v9971_v1  ;;  %v9997_v3 = vld [vmem:[#allocation10_spill] sm:$0xff] }
 0xb26   :  { %2193 = vmatprep.subr.mxu0 %v7596_v4  ;;  %6318 = vmatprep.subr.msk.mxu1 %vm711_vm4, %v2164_v33  ;;  %v9998_v4 = vld [vmem:[#allocation11_spill] sm:$0xff]  ;;  %v10021_v33 = vld [vmem:[#allocation33_spill] sm:$0xff] }
 0xb27   :  { %2194 = vmatpush1.msra.mxu0 %v7603_v7  ;;  %6319 = vmatpush1.msk.msra.mxu1 %vm711_vm4, %v2162_v32  ;;  %v9999_v7 = vld [vmem:[#allocation12_spill] sm:$0xff] }
 0xb28   :  { %2195 = vmatprep.subr.mxu0 %v7609_v8  ;;  %6320 = vmatmul.mubr.msk.f32.vlgmr.msra.gmra.mxu1 %vm704_vm6, %v7639_v13  ;;  %v10000_v8 = vld [vmem:[#allocation13_spill] sm:$0xff]  ;;  %v10020_v32 = vld [vmem:[#allocation36_spill] sm:$0xff] }
 0xb29   :  { %2196 = vmatpush1.msra.mxu0 %v7616_v9  ;;  %2330 = vmatprep.mubr.f32.mxu1 %v9971_v1 }
 0xb2a   :  { %2197 = vmatprep.subr.mxu0 %v7622_v10  ;;  %v10001_v10 = vld [vmem:[#allocation14_spill] sm:$0xff] }
 0xb2b   :  { %2198 = vmatpush1.msra.mxu0 %v7628_v12  ;;  %v10002_v12 = vld [vmem:[#allocation15_spill] sm:$0xff] }
 0xb2c   :  { %6317 = vmatmul.mubr.msk.f32.vlgmr.msra.gmra.mxu0 %vm95_vm3, %v8341_v56  ;;  %6321 = vmatmul.mubr.msk.f32.gmra.mxu1 %vm704_vm6, %v9993_v35 }
 0xb2d   :  { %2496 = vmatprep.mubr.f32.mxu1 %v9971_v1  ;;  %2401 = vmatprep.mubr.f32.mxu0 %v9971_v1 }
 0xbe0   :  { %v2004_v36 = vpop.f32.mrf.mxu0 }
 0xbe2   :  { %v2006_v38 = vpop.f32.mrf.mxu0 }
 0xbe3   :  { %6326 = vmatprep.subr.msk.mxu1 %vm711_vm4, %v2006_v38  ;;  %v10024_v38 = vld [vmem:[#allocation35_spill] sm:$0xff] }
 0xbe4   :  { %6327 = vmatpush1.msk.msra.mxu1 %vm711_vm4, %v2004_v36  ;;  %v2075_v62 = vpop.f32.mrf.mxu0  ;;  %v10023_v36 = vld [vmem:[#allocation38_spill] sm:$0xff] }
 0xbe5   :  { %6328 = vmatmul.mubr.msk.f32.vlgmr.msra.gmra.mxu1 %vm704_vm6, %v9994_v53  ;;  %6549 = vmatprep.subr.mxu1 %v9995_v55  ;;  %v10026_v55 = vld [vmem:[#allocation37_spill] sm:$0xff] }
 0xbe6   :  { %2502 = vmatprep.mubr.f32.mxu1 %v9971_v1  ;;  %6550 = vmatpush3.msra.mxu1 %v9996_v63  ;;  %v2077_v9 = vpop.f32.mrf.mxu0  ;;  %v10028_v63 = vld [vmem:[#allocation39_spill] sm:$0xff] }
 0xbe7   :  { %6551 = vmatprep.subr.mxu1 %v9997_v3  ;;  %v10029_v3 = vld [vmem:[#allocation44_spill] sm:$0xff] }
 0xbe8   :  { %6552 = vmatpush3.msra.mxu1 %v9998_v4  ;;  %v10030_v4 = vld [vmem:[#allocation41_spill] sm:$0xff] }
 0xbe9   :  { %6329 = vmatmul.mubr.msk.f32.gmra.mxu1 %vm704_vm6, %v9999_v7  ;;  %6553 = vmatprep.subr.mxu1 %v10000_v8  ;;  %v10032_v8 = vld [vmem:[#allocation43_spill] sm:$0xff] }
 0xbea   :  { %6554 = vmatpush3.msra.mxu1 %v10001_v10  ;;  %v10034_v10 = vld [vmem:[#allocation45_spill] sm:$0xff] }
 0xbeb   :  { %6555 = vmatprep.subr.mxu1 %v10002_v12  ;;  %v10035_v12 = vld [vmem:[#allocation50_spill] sm:$0xff] }
 0xbec   :  { %v2233_v41 = vpop.f32.mrf.mxu0  ;;  %6556 = vmatpush3.msra.mxu1 %v10003_v57  ;;  %v10037_v57 = vld [vmem:[#allocation52_spill] sm:$0xff] }
 0xbed   :  { %6557 = vmatprep.subr.mxu1 %v10004_v44  ;;  %v10038_v44 = vld [vmem:[#allocation49_spill] sm:$0xff] }
 0xbee   :  { %v2235_v52 = vpop.f32.mrf.mxu0  ;;  %6558 = vmatpush3.msra.mxu1 %v10005_v43  ;;  %v10040_v43 = vld [vmem:[#allocation51_spill] sm:$0xff] }
 0xbef   :  { %6322 = vmatprep.subr.msk.mxu0 %vm711_vm4, %v2235_v52  ;;  %6559 = vmatprep.subr.mxu1 %v10006_v47  ;;  %v10039_v52 = vld [vmem:[#allocation54_spill] sm:$0xff]  ;;  %v10041_v47 = vld [vmem:[#allocation56_spill] sm:$0xff] }
 0xbf0   :  { %6323 = vmatpush1.msk.msra.mxu0 %vm711_vm4, %v2233_v41  ;;  %6560 = vmatpush3.msra.mxu1 %v10007_v50  ;;  %v10036_v41 = vld [vmem:[#allocation47_spill] sm:$0xff]  ;;  %v10042_v50 = vld [vmem:[#allocation53_spill] sm:$0xff] }
 0xbf1   :  { %6324 = vmatmul.mubr.msk.f32.vlgmr.msra.gmra.mxu0 %vm704_vm6, %v7639_v13  ;;  %6330 = vmatprep.subr.msk.mxu0 %vm711_vm4, %v2077_v9  ;;  %v10012_v13 = vld [vmem:[#allocation25_spill] sm:$0xff]  ;;  %v10033_v9 = vld [vmem:[#allocation48_spill] sm:$0xff] }
 0xbf2   :  { %6331 = vmatpush1.msk.msra.mxu0 %vm711_vm4, %v2075_v62  ;;  %2407 = vmatprep.mubr.f32.mxu0 %v9971_v1  ;;  %v10027_v62 = vld [vmem:[#allocation42_spill] sm:$0xff] }
 0xbf3   :  { %6561 = vmatprep.subr.mxu1 %v10008_v46  ;;  %6587 = vmatprep.subr.mxu0 %v10009_v58  ;;  %v10043_v46 = vld [vmem:[#allocation58_spill] sm:$0xff]  ;;  %v10044_v58 = vld [vmem:[#allocation55_spill] sm:$0xff] }
 0xbf4   :  { %6562 = vmatpush3.msra.mxu1 %v10010_v34  ;;  %v10045_v34 = vld [vmem:[#allocation57_spill] sm:$0xff] }
 0xbf5   :  { %6325 = vmatmul.mubr.msk.f32.gmra.mxu0 %vm704_vm6, %v9993_v35  ;;  %6563 = vmatprep.subr.mxu1 %v10011_v54  ;;  %v10022_v35 = vld [vmem:[#allocation34_spill] sm:$0xff]  ;;  %v10046_v54 = vld [vmem:[#allocation59_spill] sm:$0xff] }
 0xbf6   :  { %2573 = vmatprep.mubr.f32.mxu0 %v9971_v1  ;;  %6564 = vmatpush3.msra.mxu1 %v10012_v13  ;;  %v10047_v13 = vld [vmem:[#allocation60_spill] sm:$0xff] }
 0xbf7   :  { %6565 = vmatprep.subr.mxu1 %v10013_v49  ;;  %v10048_v49 = vld [vmem:[#allocation61_spill] sm:$0xff] }
 0xbf8   :  { %6566 = vmatpush3.msra.mxu1 %v10014_v11  ;;  %v10049_v11 = vld [vmem:[#allocation62_spill] sm:$0xff] }
 0xbf9   :  { %6332 = vmatmul.mubr.msk.f32.vlgmr.msra.gmra.mxu0 %vm704_vm6, %v9994_v53  ;;  %6567 = vmatprep.subr.mxu1 %v10015_v27  ;;  %v10025_v53 = vld [vmem:[#allocation40_spill] sm:$0xff]  ;;  %v10050_v27 = vld [vmem:[#allocation63_spill] sm:$0xff] }
 0xbfa   :  { %2579 = vmatprep.mubr.f32.mxu0 %v9971_v1  ;;  %6588 = vmatpush3.msra.mxu0 %v10016_v37  ;;  %v10051_v37 = vld [vmem:[#allocation64_spill] sm:$0xff] }
 0xbfb   :  { %6589 = vmatprep.subr.mxu0 %v10017_v26  ;;  %6568 = vmatpush3.msra.mxu1 %v10018_v29  ;;  %v10052_v26 = vld [vmem:[#allocation65_spill] sm:$0xff]  ;;  %v10053_v29 = vld [vmem:[#allocation66_spill] sm:$0xff] }
 0xbfc   :  { %6590 = vmatpush3.msra.mxu0 %v10019_v17  ;;  %6569 = vmatprep.subr.mxu1 %v10020_v32  ;;  %v10054_v17 = vld [vmem:[#allocation67_spill] sm:$0xff]  ;;  %v10055_v32 = vld [vmem:[#allocation68_spill] sm:$0xff] }
 0xbfd   :  { %6333 = vmatmul.mubr.msk.f32.gmra.mxu0 %vm704_vm6, %v9999_v7  ;;  %6591 = vmatprep.subr.mxu0 %v10021_v33  ;;  %v10031_v7 = vld [vmem:[#allocation46_spill] sm:$0xff]  ;;  %v10056_v33 = vld [vmem:[#allocation69_spill] sm:$0xff] }
 0xbfe   :  { %6592 = vmatpush3.msra.mxu0 %v10022_v35  ;;  %6570 = vmatpush3.msra.mxu1 %v10023_v36  ;;  %v10057_v35 = vld [vmem:[#allocation70_spill] sm:$0xff]  ;;  %v10058_v36 = vld [vmem:[#allocation71_spill] sm:$0xff] }
 0xbff   :  { %6593 = vmatprep.subr.mxu0 %v10024_v38  ;;  %6571 = vmatprep.subr.mxu1 %v10025_v53  ;;  %v10059_v38 = vld [vmem:[#allocation72_spill] sm:$0xff]  ;;  %v2326_v53 = vpop.f32.mrf.mxu1 }
 0xc00   :  { %6594 = vmatpush3.msra.mxu0 %v10026_v55  ;;  %6572 = vmatpush3.msra.mxu1 %v10027_v62 }
 0xc01   :  { %6595 = vmatprep.subr.mxu0 %v10028_v63  ;;  %6573 = vmatprep.subr.mxu1 %v10029_v3  ;;  %v2328_v55 = vpop.f32.mrf.mxu1  ;;  %v2586_v3 = vld [vmem:[%s9704_s14] sm:$0xf] }
 0xc02   :  { %6596 = vmatpush3.msra.mxu0 %v10030_v4  ;;  %6574 = vmatpush3.msra.mxu1 %v10031_v7  ;;  %v2616_v4 = vld [vmem:[%s9705_s15] sm:$0xf]  ;;  %v10060_v7 = vld [vmem:[#allocation73_spill] sm:$0xff] }
 0xc03   :  { %6597 = vmatprep.subr.mxu0 %v10032_v8  ;;  %6575 = vmatprep.subr.mxu1 %v10033_v9  ;;  %v2332_v62 = vpop.f32.mrf.mxu1  ;;  %v2591_v8 = vrot.slane %v2586_v3, %v10060_v7 }
 0xc04   :  { %6598 = vmatpush3.msra.mxu0 %v10034_v10  ;;  %6576 = vmatpush3.msra.mxu1 %v10035_v12  ;;  %v2621_v12 = vrot.slane %v2616_v4, %v10060_v7 }
 0xc05   :  { %6599 = vmatprep.subr.mxu0 %v10036_v41  ;;  %6577 = vmatprep.subr.mxu1 %v10037_v57  ;;  %v2334_v63 = vpop.f32.mrf.mxu1  ;;  %v10061_v41 = vld [vmem:[#allocation74_spill] sm:$0xff] }
 0xc06   :  { %6600 = vmatpush3.msra.mxu0 %v10038_v44  ;;  %6578 = vmatpush3.msra.mxu1 %v10039_v52  ;;  %v2595_v57 = vrot.slane %v2586_v3, %v10061_v41 }
 0xc07   :  { %6601 = vmatprep.subr.mxu0 %v10040_v43  ;;  %6579 = vmatprep.subr.mxu1 %v10041_v47  ;;  %v2625_v47 = vrot.slane %v2616_v4, %v10061_v41 }
 0xc08   :  { %6602 = vmatpush3.msra.mxu0 %v10042_v50  ;;  %6580 = vmatpush3.msra.mxu1 %v10043_v46 }
 0xc09   :  { %6603 = vmatprep.subr.mxu0 %v10044_v58  ;;  %6973 = vmatprep.subr.mxu1 %v9971_v1 }
 0xc0a   :  { %6604 = vmatpush3.msra.mxu0 %v10045_v34 }
 0xc0b   :  { %6605 = vmatprep.subr.mxu0 %v10046_v54 }
 0xc0c   :  { %6606 = vmatpush3.msra.mxu0 %v10047_v13 }
 0xc0d   :  { %6607 = vmatprep.subr.mxu0 %v10048_v49 }
 0xc0e   :  { %6608 = vmatpush3.msra.mxu0 %v10049_v11 }
 0xc0f   :  { %6609 = vmatprep.subr.mxu0 %v10050_v27 }
 0xc10   :  { %6610 = vmatpush3.msra.mxu0 %v10051_v37 }
 0xc11   :  { %6611 = vmatprep.subr.mxu0 %v10052_v26 }
 0xc12   :  { %6612 = vmatpush3.msra.mxu0 %v10053_v29 }
 0xc13   :  { %6613 = vmatprep.subr.mxu0 %v10054_v17 }
 0xc14   :  { %6614 = vmatpush3.msra.mxu0 %v10055_v32 }
 0xc15   :  { %6615 = vmatprep.subr.mxu0 %v10056_v33 }
 0xc16   :  { %6616 = vmatpush3.msra.mxu0 %v10057_v35 }
 0xc17   :  { %6617 = vmatprep.subr.mxu0 %v10058_v36 }
 0xc18   :  { %6618 = vmatpush3.msra.mxu0 %v10059_v38 }
 0xc19   :  { %6992 = vmatprep.subr.mxu0 %v9971_v1 }
 0xca5   :  { %v2498_v9 = vpop.f32.mrf.mxu1 }
 0xca6   :  { %v2499_v10 = vadd.f32 %v2498_v9, %v2326_v53 }
 0xca7   :  { %v2500_v44 = vpop.f32.mrf.mxu1 }
 0xca8   :  { %v2608_v52 = vmul.f32 %v2591_v8, %v2499_v10  ;;  %v2501_v43 = vadd.f32 %v2500_v44, %v2328_v55  ;;  %v2633_v10 = vrot.slane %v2616_v4, %v8090_v23 }
 0xca9   :  { %v2504_v50 = vpop.f32.mrf.mxu1 }
 0xcaa   :  { %v2638_v46 = vadd.f32 %v2621_v12, %v2608_v52  ;;  %v2609_v58 = vmul.f32 %v2595_v57, %v2501_v43  ;;  %v2505_v34 = vadd.f32 %v2504_v50, %v2332_v62  ;;  %v2603_v62 = vrot.slane %v2586_v3, %v8090_v23 }
 0xcab   :  { %v2506_v54 = vpop.f32.mrf.mxu1 }
 0xcac   :  { %v2612_v13 = vmul.f32 %v2591_v8, %v2505_v34  ;;  %v2507_v49 = vadd.f32 %v2506_v54, %v2334_v63  ;;  %v2639_v11 = vadd.f32 %v2625_v47, %v2609_v58  ;;  %v2646_v27 = vmax.f32 %v2638_v46, 0.0  ;;  %v10063_v34 = vld [vmem:[#allocation76_spill] sm:$0xff]  ;;  %v10066_v54 = vld [vmem:[#allocation79_spill] sm:$0xff] }
 0xcae   :  { %v2613_v37 = vmul.f32 %v2595_v57, %v2507_v49  ;;  %v2647_v26 = vmax.f32 %v2639_v11, 0.0  ;;  %v2642_v29 = vadd.f32 %v2621_v12, %v2612_v13 }
 0xcb0   :  { %2782 = vmatprep.mubr.f32.mxu1 %v2647_v26  ;;  %v2643_v17 = vadd.f32 %v2625_v47, %v2613_v37  ;;  %v2650_v33 = vmax.f32 %v2642_v29, 0.0 }
 0xcb1   :  { %v2403_v32 = vpop.f32.mrf.mxu0  ;;  %2783 = vmatmul.mubr.f32.vlgmr.msra.gmra.mxu1 %v2646_v27 }
 0xcb2   :  { %v2651_v35 = vmax.f32 %v2643_v17, 0.0  ;;  %6974 = vmatpush3.msra.mxu1 %v8135_v20  ;;  %v2599_v20 = vrot.slane %v2586_v3, %v8087_v60 }
 0xcb3   :  { %v2405_v36 = vpop.f32.mrf.mxu0  ;;  %6975 = vmatprep.subr.mxu1 %v9971_v1 }
 0xcb4   :  { %2787 = vmatprep.mubr.f32.mxu1 %v2651_v35  ;;  %6976 = vmatpush3.msra.mxu1 %v8142_v18 }
 0xcb5   :  { %v2409_v38 = vpop.f32.mrf.mxu0  ;;  %2788 = vmatmul.mubr.f32.gmra.mxu1 %v2650_v33  ;;  %6977 = vmatprep.subr.mxu1 %v9971_v1 }
 0xcb6   :  { %6978 = vmatpush3.msra.mxu1 %v8149_v42  ;;  %6989 = vmatprep.mubr.msk.f32.mxu1 %vm7237_vm2, %v9971_v1  ;;  %v2629_v42 = vrot.slane %v2616_v4, %v8087_v60 }
 0xcb7   :  { %v2411_v53 = vpop.f32.mrf.mxu0  ;;  %6979 = vmatprep.subr.mxu1 %v9971_v1 }
 0xcb8   :  { %6980 = vmatpush3.msra.mxu1 %v8156_v48 }
 0xcb9   :  { %v2575_v55 = vpop.f32.mrf.mxu0  ;;  %6981 = vmatprep.subr.mxu1 %v9971_v1 }
 0xcba   :  { %v2576_v18 = vadd.f32 %v2575_v55, %v2403_v32  ;;  %6982 = vmatpush3.msra.mxu1 %v8163_v21 }
 0xcbb   :  { %v2577_v63 = vpop.f32.mrf.mxu0  ;;  %6983 = vmatprep.subr.mxu1 %v9971_v1 }
 0xcbc   :  { %v2610_v8 = vmul.f32 %v2599_v20, %v2576_v18  ;;  %v2578_v9 = vadd.f32 %v2577_v63, %v2405_v36  ;;  %6984 = vmatpush3.msra.mxu1 %v8170_v24 }
 0xcbd   :  { %v2581_v48 = vpop.f32.mrf.mxu0  ;;  %6985 = vmatprep.subr.mxu1 %v9971_v1 }
 0xcbe   :  { %v2611_v12 = vmul.f32 %v2603_v62, %v2578_v9  ;;  %v2582_v57 = vadd.f32 %v2581_v48, %v2409_v38  ;;  %6986 = vmatpush3.msra.mxu1 %v8177_v25  ;;  %v2640_v3 = vadd.f32 %v2629_v42, %v2610_v8 }
 0xcbf   :  { %v2583_v21 = vpop.f32.mrf.mxu0  ;;  %6987 = vmatprep.subr.mxu1 %v9971_v1 }
 0xcc0   :  { %v2614_v44 = vmul.f32 %v2599_v20, %v2582_v57  ;;  %v2584_v52 = vadd.f32 %v2583_v21, %v2411_v53  ;;  %v2641_v43 = vadd.f32 %v2633_v10, %v2611_v12  ;;  %6988 = vmatpush3.msra.mxu1 %v8184_v39  ;;  %v2648_v47 = vmax.f32 %v2640_v3, 0.0  ;;  %v10062_v39 = vld [vmem:[#allocation75_spill] sm:$0xff]  ;;  %v8580_v3 = vld [vmem:[%s9903_s8] sm:$0xff] }
 0xcc1   :  { %7022 = vmatprep.subr.mxu1 %v9971_v1 }
 0xcc2   :  { %v2615_v4 = vmul.f32 %v2603_v62, %v2584_v52  ;;  %v2649_v24 = vmax.f32 %v2641_v43, 0.0  ;;  %v2644_v50 = vadd.f32 %v2629_v42, %v2614_v44 }
 0xcc4   :  { %2857 = vmatprep.mubr.f32.mxu0 %v2649_v24  ;;  %v2645_v46 = vadd.f32 %v2633_v10, %v2615_v4  ;;  %v2652_v58 = vmax.f32 %v2644_v50, 0.0  ;;  %v3173_v24 = vld [vmem:[%s9904_s0] sm:$0x3] }
 0xcc5   :  { %2858 = vmatmul.mubr.f32.vlgmr.msra.gmra.mxu0 %v2648_v47  ;;  %v8599_v50 = vld [vmem:[%s9907_s28] ss:$0 sm:$0xff] }
 0xcc6   :  { %6993 = vmatpush3.msra.mxu0 %v8101_v61  ;;  %v2653_v25 = vmax.f32 %v2645_v46, 0.0  ;;  %v10064_v61 = vld [vmem:[#allocation77_spill] sm:$0xff] }
 0xcc7   :  { %6994 = vmatprep.subr.mxu0 %v9971_v1 }
 0xcc8   :  { %2862 = vmatprep.mubr.f32.mxu0 %v2653_v25  ;;  %6995 = vmatpush3.msra.mxu0 %v8106_v51  ;;  %v10065_v51 = vld [vmem:[#allocation78_spill] sm:$0xff] }
 0xcc9   :  { %2863 = vmatmul.mubr.f32.gmra.mxu0 %v2652_v58  ;;  %6996 = vmatprep.subr.mxu0 %v9971_v1 }
 0xcca   :  { %6997 = vmatpush3.msra.mxu0 %v10062_v39  ;;  %7000 = vmatprep.mubr.msk.f32.mxu0 %vm7237_vm2, %v9971_v1 }
 0xccb   :  { %6998 = vmatprep.subr.mxu0 %v9971_v1 }
 0xccc   :  { %6999 = vmatpush3.msra.mxu0 %v10063_v34 }
 0xccd   :  { %7001 = vmatmul.mubr.msk.f32.vlgmr.msra.gmra.mxu0 %vm95_vm3, %v8341_v56  ;;  %7003 = vmatprep.subr.mxu0 %v9971_v1 }
 0xcce   :  { %7004 = vmatpush3.msra.mxu0 %v10064_v61  ;;  %7019 = vmatprep.mubr.msk.f32.mxu0 %vm7237_vm2, %v9971_v1 }
 0xccf   :  { %7005 = vmatprep.subr.mxu0 %v9971_v1 }
 0xcd0   :  { %7006 = vmatpush3.msra.mxu0 %v10065_v51 }
 0xcd1   :  { %7007 = vmatprep.subr.mxu0 %v9971_v1 }
 0xcd2   :  { %7008 = vmatpush3.msra.mxu0 %v10066_v54 }
 0xcd3   :  { %7009 = vmatprep.subr.mxu0 %v9971_v1 }
 0xcd4   :  { %7010 = vmatpush3.msra.mxu0 %v8249_v0 }
 0xcd5   :  { %7011 = vmatprep.subr.mxu0 %v9971_v1 }
 0xcd6   :  { %7012 = vmatpush3.msra.mxu0 %v8256_v2 }
 0xcd7   :  { %7013 = vmatprep.subr.mxu0 %v9971_v1 }
 0xcd8   :  { %7014 = vmatpush3.msra.mxu0 %v8263_v5 }
 0xcd9   :  { %7015 = vmatprep.subr.mxu0 %v9971_v1 }
 0xcda   :  { %7016 = vmatpush3.msra.mxu0 %v8270_v6 }
 0xcdb   :  { %7017 = vmatprep.subr.mxu0 %v9971_v1 }
 0xcdc   :  { %7018 = vmatpush3.msra.mxu0 %v8277_v19 }
 0xcdd   :  { %7038 = vmatprep.subr.mxu0 %v9971_v1 }
 0xd71   :  { %v6581_v56 = vpop.f32.mrf.mxu1 }
 0xd73   :  { %v6582_v0 = vpop.f32.mrf.mxu1 }
 0xd74   :  { %v6583_v2 = vadd.f32 %v6582_v0, %v6581_v56 }
 0xd75   :  { %v6584_v13 = vpop.f32.mrf.mxu1 }
 0xd77   :  { %v6585_v37 = vpop.f32.mrf.mxu1 }
 0xd78   :  { %v6586_v17 = vadd.f32 %v6585_v37, %v6584_v13  ;;  %v8630_v37 = vld [vmem:[%s9909_s30] sm:$0xff] }
 0xd85   :  { %v6619_v49 = vpop.f32.mrf.mxu0 }
 0xd87   :  { %v6620_v11 = vpop.f32.mrf.mxu0 }
 0xd88   :  { %v6621_v27 = vadd.f32 %v6620_v11, %v6619_v49 }
 0xd89   :  { %v6622_v26 = vpop.f32.mrf.mxu0 }
 0xd8a   :  { %v2860_v5 = vadd.f32 %v6621_v27, %v6583_v2  ;;  %v8611_v2 = vld [vmem:[%s9909_s30 + $0x18] sm:$0xff]  ;;  %v8616_v27 = vld [vmem:[%s9909_s30 + $0x10] sm:$0xff] }
 0xd8b   :  { %v6623_v29 = vpop.f32.mrf.mxu0 }
 0xd8c   :  { %v2875_v6 = vmul.f32 %v8212_v14, %v2860_v5  ;;  %v6624_v32 = vadd.f32 %v6623_v29, %v6622_v26  ;;  %v8636_v26 = vld [vmem:[%s9703_s13 + $0x68] sm:$0xff] }
 0xd8d   :  { %v3052_v33 = vpop.f32.mrf.mxu0 }
 0xd8e   :  { %v2884_v19 = vadd.f32 %v8217_v45, %v2875_v6  ;;  %v2865_v35 = vadd.f32 %v6624_v32, %v6586_v17  ;;  %v8646_v6 = vld [vmem:[%s9703_s13 + $0x60] sm:$0xff] }
 0xd8f   :  { %v7002_v36 = vpop.f32.mrf.mxu0 }
 0xd90   :  { %v2886_v38 = vmax.f32 %v2884_v19, 0.0  ;;  %v2876_v53 = vmul.f32 %v8212_v14, %v2865_v35  ;;  %v8660_v19 = vld [vmem:[%s9703_s13 + $0x40] sm:$0xff]  ;;  %v8666_v35 = vld [vmem:[%s9703_s13 + $0x28] sm:$0xff] }
 0xd91   :  { %v8673_v36 = vld [vmem:[%s9703_s13 + $0x20] sm:$0xff] }
 0xd92   :  { %v2890_v20 = vadd.f32 %v2886_v38, %v8224_v22  ;;  %v2885_v55 = vadd.f32 %v8217_v45, %v2876_v53  ;;  %v8679_v38 = vld [vmem:[%s9703_s13 + $0x8] sm:$0xff]  ;;  %v8685_v53 = vld [vmem:[%s9703_s13] sm:$0xff] }
 0xd94   :  { %v2887_v18 = vmax.f32 %v2885_v55, 0.0  ;;  %v2893_v62 = vrot.slane %v2890_v20, 4  ;;  %v10067_v55 = vld [vmem:[#allocation5_spill] sm:$0xff] }
 0xd96   :  { %v2891_v42 = vadd.f32 %v2887_v18, %v8232_v15  ;;  %v2895_v8 = vmax.f32 %v2890_v20, %v2893_v62  ;;  %v8559_v15 = vld [vmem:[%s9903_s8 + $0x18] sm:$0xff]  ;;  %v3443_v20 = vld [vmem:[%s9702_s12] sm:$0xff] }
 0xd97   :  { %v8697_v18 = vrot.slane %v3443_v20, %v10067_v55  ;;  %v3445_v62 = vcombine.high %v3443_v20, %v3443_v20 }
 0xd98   :  { %v2897_v63 = vrot.slane %v2891_v42, 4 }
 0xd9a   :  { %v2899_v9 = vmax.f32 %v2891_v42, %v2897_v63  ;;  %v8701_v42 = vcombine.high %v8697_v18, %v8697_v18  ;;  %v8704_v63 = vrot.slane %v3445_v62, %v10067_v55  ;;  %v8885_v55 = vld [vmem:[%s9706_s16 + $0xd0] sm:$0xff] }
 0xd9b   :  { %10082 = vst [vmem:[#allocation20_spill] sm:$0xff] %v8885_v55  ;;  %v8891_v62 = vld [vmem:[%s9706_s16 + $0x50] sm:$0xff] }
 0xd9c   :  { %v2900_v10 = vmax.f32 %v2895_v8, %v2899_v9  ;;  %v8712_v8 = vcombine.high %v8704_v63, %v8704_v63  ;;  %v8719_v9 = vld [vmem:[%s9911_s3] ss:$0 sm:$0xff]  ;;  %10083 = vst [vmem:[#allocation21_spill] sm:$0xff] %v8891_v62 }
 0xd9e   :  { %6990 = vmatmul.mubr.msk.f32.vlgmr.msra.gmra.mxu1 %vm1377_vm7, %v2900_v10 }
 0xd9f   :  { %7030 = vmatprep.mubr.msk.f32.mxu1 %vm7237_vm2, %v9971_v1  ;;  %7023 = vmatpush3.msra.mxu1 %v8559_v15 }
 0xda0   :  { %7024 = vmatprep.subr.mxu1 %v9971_v1 }
 0xe5e   :  { %v2982_v48 = vpop.f32.mrf.mxu1 }
 0xe5f   :  { %v3053_v12 = vadd.f32 %v3052_v33, %v2982_v48  ;;  %v8653_v33 = vld [vmem:[%s9703_s13 + $0x48] sm:$0xff] }
 0xe60   :  { %v6991_v14 = vpop.f32.mrf.mxu1 }
 0xe61   :  { %v3063_v22 = vmul.f32 %v8284_v16, %v3053_v12  ;;  %v8566_v16 = vld [vmem:[%s9903_s8 + $0x10] sm:$0xff] }
 0xe62   :  { %7025 = vmatpush3.msra.mxu1 %v8566_v16 }
 0xe63   :  { %v3071_v45 = vadd.f32 %v8289_v59, %v3063_v22  ;;  %7026 = vmatprep.subr.mxu1 %v9971_v1  ;;  %v8573_v59 = vld [vmem:[%s9903_s8 + $0x8] sm:$0xff]  ;;  %v8728_v22 = vld [vmem:[%s9703_s13 + $0x78] sm:$0xff] }
 0xe64   :  { %7027 = vmatpush3.msra.mxu1 %v8573_v59 }
 0xe65   :  { %v3072_v57 = vmax.f32 %v3071_v45, 0.0  ;;  %7028 = vmatprep.subr.mxu1 %v9971_v1 }
 0xe66   :  { %7029 = vmatpush3.msra.mxu1 %v8580_v3 }
 0xe67   :  { %7020 = vmatmul.mubr.msk.f32.vlgmr.msra.gmra.mxu0 %vm1377_vm7, %v3072_v57  ;;  %7033 = vmatprep.subr.mxu1 %v9971_v1  ;;  %v8749_v57 = vld [vmem:[%s9703_s13 + $0x58] sm:$0xff] }
 0xe68   :  { %7046 = vmatprep.mubr.msk.f32.mxu0 %vm7237_vm2, %v9971_v1  ;;  %7039 = vmatpush3.msra.mxu0 %v8611_v2 }
 0xe69   :  { %7040 = vmatprep.subr.mxu0 %v9971_v1 }
 0xe6a   :  { %7041 = vmatpush3.msra.mxu0 %v8616_v27 }
 0xe6b   :  { %7042 = vmatprep.subr.mxu0 %v9971_v1 }
 0xf27   :  { %v3150_v21 = vpop.f32.mrf.mxu0 }
 0xf28   :  { %v3161_v44 = vmul.f32 %v8307_v28, %v3150_v21  ;;  %v8756_v21 = vld [vmem:[%s9703_s13 + $0x50] sm:$0xff] }
 0xf29   :  { %v7021_v52 = vpop.f32.mrf.mxu0 }
 0xf2a   :  { %v3169_v43 = vadd.f32 %v8312_v31, %v3161_v44  ;;  %v8762_v52 = vld [vmem:[%s9703_s13 + $0x38] sm:$0xff] }
 0xf2c   :  { %v3170_v4 = vmax.f32 %v3169_v43, 0.0  ;;  %v8770_v43 = vld [vmem:[%s9703_s13 + $0x30] sm:$0xff] }
 0xf2e   :  { %7031 = vmatmul.mubr.msk.f32.vlgmr.msra.gmra.mxu1 %vm95_vm3, %v3170_v4  ;;  %v8777_v4 = vld [vmem:[%s9703_s13 + $0x18] sm:$0xff] }
 0xf2f   :  { %7034 = vmatpush3.msk.msra.mxu1 %vm173_vm0, %v3173_v24  ;;  %7035 = vmatprep.mubr.msk.f32.mxu1 %vm7237_vm2, %v9971_v1  ;;  %v8783_v24 = vld [vmem:[%s9703_s13 + $0x10] sm:$0xff] }
 0xf30   :  { %6351 = vmatprep.subr.msk.mxu1 %vm173_vm0, %v8701_v42  ;;  %10068 = vst [vmem:[#allocation6_spill] sm:$0xff] %v8783_v24 }
 0xf32   :  { %7036 = vmatmul.mubr.msk.f32.vlgmr.msra.gmra.mxu1 %vm169_vm1, %v8358_v30 }
 0xf33   :  { %3537 = vmatprep.mubr.f32.mxu1 %v9971_v1  ;;  %6352 = vmatpush1.msk.msra.mxu1 %vm173_vm0, %v8697_v18 }
 0xf34   :  { %6354 = vmatprep.subr.msk.mxu1 %vm173_vm0, %v8712_v8 }
 0xfee   :  { %v3247_v28 = vpop.f32.mrf.mxu1 }
 0xff0   :  { %v7032_v47 = vpop.f32.mrf.mxu1 }
 0xff1   :  { %v8802_v47 = vld [vmem:[%s9913_s2 + $0x8] sm:$0xff] }
 0xff2   :  { %v3320_v31 = vpop.f32.mrf.mxu1  ;;  %10069 = vst [vmem:[#allocation7_spill] sm:$0xff] %v8802_v47 }
 0xff3   :  { %v3321_v46 = vadd.f32 %v3320_v31, %v3247_v28  ;;  %v8794_v28 = vld [vmem:[%s9913_s2] sm:$0xff] }
 0xff4   :  { %v7037_v25 = vpop.f32.mrf.mxu1 }
 0xff5   :  { %v3331_v58 = vadd.f32 %v8599_v50, %v3321_v46  ;;  %v8810_v25 = vld [vmem:[%s9915_s29] sm:$0xff] }
 0xff6   :  { %10070 = vst [vmem:[#allocation8_spill] sm:$0xff] %v8810_v25 }
 0xff7   :  { %7198 = vtanh.f32 %v3331_v58  ;;  %v6348_v34 = vmul.f32 -1.442695, %v3331_v58  ;;  %v8815_v58 = vld [vmem:[%s9706_s16 + $0xf8] sm:$0xff] }
 0xff8   :  { %10071 = vst [vmem:[#allocation9_spill] sm:$0xff] %v8815_v58 }
 0xff9   :  { %7200 = vpow2.f32 %v6348_v34  ;;  %v8827_v34 = vld [vmem:[%s9706_s16 + $0xf0] sm:$0xff] }
 0xffa   :  { %10073 = vst [vmem:[#allocation11_spill] sm:$0xff] %v8827_v34 }
0x1004   :  { %v7199_v39 = vpop.eup %7198 }
0x1005   :  { %3341 = vrot.lane.b32.xlu1 %v7199_v39, %s9991_s7  ;;  %v8821_v39 = vld [vmem:[%s9706_s16 + $0x78] sm:$0xff] }
0x1006   :  { %v7201_v61 = vpop.eup %7200  ;;  %10072 = vst [vmem:[#allocation10_spill] sm:$0xff] %v8821_v39 }
0x1007   :  { %v3335_v51 = vadd.f32 1.0, %v7201_v61  ;;  %v8835_v61 = vld [vmem:[%s9706_s16 + $0x70] sm:$0xff] }
0x1008   :  { %10074 = vst [vmem:[#allocation12_spill] sm:$0xff] %v8835_v61 }
0x1009   :  { %7202 = vrcp.f32 %v3335_v51 }
0x1016   :  { %v7203_v54 = vpop.eup %7202 }
0x1017   :  { %v3339_v13 = vmul.f32 %v7203_v54, %v8336_v40  ;;  %v8623_v40 = vld [vmem:[%s9909_s30 + $0x8] sm:$0xff] }
0x1018   :  { %7043 = vmatpush3.msra.mxu0 %v8623_v40 }
0x1019   :  { %7044 = vmatprep.subr.mxu0 %v9971_v1 }
0x101a   :  { %7045 = vmatpush3.msra.mxu0 %v8630_v37 }
0x101b   :  { %3655 = vmatprep.subr.mxu0 %v8636_v26 }
0x1077   :  { %v3342_v56 = vpop.permute.xlu1 %3341 }
0x1078   :  { %v3344_v0 = vmul.f32 %v7203_v54, %v3342_v56  ;;  %v8847_v56 = vld [vmem:[%s9706_s16 + $0xe8] sm:$0xff] }
0x1079   :  { %10076 = vst [vmem:[#allocation14_spill] sm:$0xff] %v8847_v56 }
0x107a   :  { %3346 = vrot.lane.b32.xlu0 %v3344_v0, %s9992_s4  ;;  %v8853_v0 = vld [vmem:[%s9706_s16 + $0x68] sm:$0xff] }
0x107b   :  { %10077 = vst [vmem:[#allocation15_spill] sm:$0xff] %v8853_v0 }
0x10ec   :  { %v3347_v49 = vpop.permute.xlu0 %3346 }
0x10ed   :  { %v8605_v11 = vadd.f32 %v3347_v49, %v3339_v13  ;;  %v8859_v13 = vld [vmem:[%s9706_s16 + $0xe0] sm:$0xff] }
0x10ee   :  { %10078 = vst [vmem:[#allocation16_spill] sm:$0xff] %v8859_v13  ;;  %v8867_v49 = vld [vmem:[%s9706_s16 + $0x60] sm:$0xff] }
0x10ef   :  { %7204 = vtanh.f32 %v8605_v11  ;;  %10079 = vst [vmem:[#allocation17_spill] sm:$0xff] %v8867_v49 }
0x10fc   :  { %v7205_v5 = vpop.eup %7204 }
0x10fd   :  { %3352 = vrot.lane.b32.xlu1 %v7205_v5, %s9991_s7 }
0x116f   :  { %v3353_v29 = vpop.permute.xlu1 %3352 }
0x1170   :  { %v3355_v17 = vmul.f32 %v7203_v54, %v3353_v29  ;;  %v8841_v54 = vld [vmem:[%s9915_s29 + $0x8] sm:$0xff]  ;;  %v8873_v29 = vld [vmem:[%s9706_s16 + $0xd8] sm:$0xff] }
0x1171   :  { %10075 = vst [vmem:[#allocation13_spill] sm:$0xff] %v8841_v54  ;;  %10080 = vst [vmem:[#allocation18_spill] sm:$0xff] %v8873_v29 }
0x1172   :  { %3368 = vrot.lane.b32.xlu0 %v3355_v17, %s9992_s4  ;;  %v8879_v17 = vld [vmem:[%s9706_s16 + $0x58] sm:$0xff] }
0x1173   :  { %10081 = vst [vmem:[#allocation19_spill] sm:$0xff] %v8879_v17 }
0x11e4   :  { %v8648_v32 = vpop.permute.xlu0 %3368 }
0x11e5   :  { %7047 = vmatmul.mubr.msk.f32.vlgmr.msra.gmra.mxu0 %vm95_vm3, %v8648_v32 }
0x11e6   :  { %3656 = vmatpush1.msra.mxu0 %v8646_v6  ;;  %3695 = vmatprep.mubr.f32.mxu0 %v9971_v1 }
0x11e7   :  { %3657 = vmatprep.subr.mxu0 %v8653_v33 }
0x11e8   :  { %3658 = vmatpush1.msra.mxu0 %v8660_v19 }
0x11e9   :  { %3659 = vmatprep.subr.mxu0 %v8666_v35 }
0x11ea   :  { %3660 = vmatpush1.msra.mxu0 %v8673_v36 }
0x11eb   :  { %3661 = vmatprep.subr.mxu0 %v8679_v38 }
0x11ec   :  { %3662 = vmatpush1.msra.mxu0 %v8685_v53 }
0x11ed   :  { %6357 = vmatmul.mubr.msk.f32.vlgmr.msra.gmra.mxu0 %vm95_vm3, %v8648_v32 }
0x11ee   :  { %3859 = vmatprep.mubr.f32.mxu0 %v9971_v1 }
0x12a5   :  { %v3438_v10 = vpop.f32.mrf.mxu0 }
0x12a6   :  { %v3439_v48 = vadd.f32 %v8719_v9, %v3438_v10 }
0x12a7   :  { %v7048_v12 = vpop.f32.mrf.mxu0 }
0x12a8   :  { %v8723_v14 = vadd.f32 %v3439_v48, %v8358_v30  ;;  %v8744_v30 = vld [vmem:[%s9703_s13 + $0x70] sm:$0xff]  ;;  %v8901_v48 = vld [vmem:[%s9706_s16 + $0xc8] sm:$0xff]  ;;  %v8906_v12 = vld [vmem:[%s9706_s16 + $0x1f8] sm:$0xff] }
0x12a9   :  { %10084 = vst [vmem:[#allocation22_spill] sm:$0xff] %v8901_v48  ;;  %10085 = vst [vmem:[#allocation23_spill] sm:$0xff] %v8906_v12 }
0x12aa   :  { %6353 = vmatmul.mubr.msk.f32.vlgmr.msra.gmra.mxu1 %vm169_vm1, %v8723_v14  ;;  %6384 = vst.msk [vmem:[%s9716_s26 + $0x8] sm:$0xf] %vm1636_vm5, %v8723_v14 }
0x12ab   :  { %6355 = vmatpush1.msk.msra.mxu1 %vm173_vm0, %v8704_v63  ;;  %3608 = vmatprep.mubr.f32.mxu1 %v9971_v1 }
0x12ac   :  { %3726 = vmatprep.subr.mxu1 %v8728_v22 }
0x12ad   :  { %v3697_v45 = vpop.f32.mrf.mxu0 }
0x12ae   :  { %6356 = vmatmul.mubr.msk.f32.vlgmr.msra.gmra.mxu1 %vm169_vm1, %v8723_v14 }
0x12af   :  { %v3699_v44 = vpop.f32.mrf.mxu0  ;;  %3727 = vmatpush1.msra.mxu1 %v8744_v30  ;;  %3766 = vmatprep.mubr.f32.mxu1 %v9971_v1 }
0x12b0   :  { %3728 = vmatprep.subr.mxu1 %v8749_v57  ;;  %6359 = vmatprep.subr.msk.mxu0 %vm711_vm4, %v3699_v44  ;;  %v8921_v44 = vld [vmem:[%s9706_s16 + $0xc0] sm:$0xff] }
0x12b1   :  { %3729 = vmatpush1.msra.mxu1 %v8756_v21  ;;  %6360 = vmatpush1.msk.msra.mxu0 %vm711_vm4, %v3697_v45  ;;  %v8914_v45 = vld [vmem:[%s9706_s16 + $0x48] sm:$0xff]  ;;  %10087 = vst [vmem:[#allocation25_spill] sm:$0xff] %v8921_v44 }
0x12b2   :  { %3730 = vmatprep.subr.mxu1 %v8762_v52  ;;  %6361 = vmatmul.mubr.msk.f32.vlgmr.msra.gmra.mxu0 %vm704_vm6, %v8794_v28  ;;  %10086 = vst [vmem:[#allocation24_spill] sm:$0xff] %v8914_v45 }
0x12b3   :  { %3731 = vmatpush1.msra.mxu1 %v8770_v43  ;;  %3865 = vmatprep.mubr.f32.mxu0 %v9971_v1 }
0x12b4   :  { %3732 = vmatprep.subr.mxu1 %v8777_v4 }
0x12b5   :  { %3733 = vmatpush1.msra.mxu1 %v8783_v24 }
0x12b6   :  { %6358 = vmatmul.mubr.msk.f32.vlgmr.msra.gmra.mxu1 %vm95_vm3, %v8648_v32  ;;  %6362 = vmatmul.mubr.msk.f32.gmra.mxu0 %vm704_vm6, %v8802_v47 }
0x12b7   :  { %3936 = vmatprep.mubr.f32.mxu1 %v9971_v1  ;;  %4031 = vmatprep.mubr.f32.mxu0 %v9971_v1 }
0x136a   :  { %v3539_v31 = vpop.f32.mrf.mxu1 }
0x136c   :  { %v3541_v46 = vpop.f32.mrf.mxu1 }
0x136d   :  { %6367 = vmatprep.subr.msk.mxu0 %vm711_vm4, %v3541_v46  ;;  %v8934_v46 = vld [vmem:[%s9706_s16 + $0xb8] sm:$0xff] }
0x136e   :  { %6368 = vmatpush1.msk.msra.mxu0 %vm711_vm4, %v3539_v31  ;;  %v3610_v51 = vpop.f32.mrf.mxu1  ;;  %v8928_v31 = vld [vmem:[%s9706_s16 + $0x40] sm:$0xff]  ;;  %10089 = vst [vmem:[#allocation27_spill] sm:$0xff] %v8934_v46 }
0x136f   :  { %6369 = vmatmul.mubr.msk.f32.vlgmr.msra.gmra.mxu0 %vm704_vm6, %v8810_v25  ;;  %6660 = vmatprep.subr.mxu0 %v8815_v58  ;;  %10088 = vst [vmem:[#allocation26_spill] sm:$0xff] %v8928_v31 }
0x1370   :  { %4037 = vmatprep.mubr.f32.mxu0 %v9971_v1  ;;  %6661 = vmatpush3.msra.mxu0 %v8821_v39  ;;  %v3612_v5 = vpop.f32.mrf.mxu1 }
0x1371   :  { %6662 = vmatprep.subr.mxu0 %v8827_v34 }
0x1372   :  { %6663 = vmatpush3.msra.mxu0 %v8835_v61 }
0x1373   :  { %6370 = vmatmul.mubr.msk.f32.gmra.mxu0 %vm704_vm6, %v8841_v54  ;;  %6664 = vmatprep.subr.mxu0 %v8847_v56 }
0x1374   :  { %6665 = vmatpush3.msra.mxu0 %v8853_v0 }
0x1375   :  { %6666 = vmatprep.subr.mxu0 %v8859_v13 }
0x1376   :  { %v3768_v20 = vpop.f32.mrf.mxu1  ;;  %6667 = vmatpush3.msra.mxu0 %v8867_v49 }
0x1377   :  { %6668 = vmatprep.subr.mxu0 %v8873_v29 }
0x1378   :  { %v3770_v10 = vpop.f32.mrf.mxu1  ;;  %6669 = vmatpush3.msra.mxu0 %v8879_v17 }
0x1379   :  { %6363 = vmatprep.subr.msk.mxu1 %vm711_vm4, %v3770_v10  ;;  %6670 = vmatprep.subr.mxu0 %v8885_v55  ;;  %v8960_v10 = vld [vmem:[%s9706_s16 + $0x1f0] sm:$0xff] }
0x137a   :  { %6364 = vmatpush1.msk.msra.mxu1 %vm711_vm4, %v3768_v20  ;;  %6671 = vmatpush3.msra.mxu0 %v8891_v62  ;;  %v8954_v20 = vld [vmem:[%s9706_s16 + $0x178] sm:$0xff]  ;;  %10093 = vst [vmem:[#allocation31_spill] sm:$0xff] %v8960_v10 }
0x137b   :  { %6365 = vmatmul.mubr.msk.f32.vlgmr.msra.gmra.mxu1 %vm704_vm6, %v8794_v28  ;;  %6371 = vmatprep.subr.msk.mxu1 %vm711_vm4, %v3612_v5  ;;  %v8949_v5 = vld [vmem:[%s9706_s16 + $0xb0] sm:$0xff]  ;;  %10092 = vst [vmem:[#allocation30_spill] sm:$0xff] %v8954_v20 }
0x137c   :  { %6372 = vmatpush1.msk.msra.mxu1 %vm711_vm4, %v3610_v51  ;;  %3942 = vmatprep.mubr.f32.mxu1 %v9971_v1  ;;  %v8942_v51 = vld [vmem:[%s9706_s16 + $0x38] sm:$0xff]  ;;  %10091 = vst [vmem:[#allocation29_spill] sm:$0xff] %v8949_v5 }
0x137d   :  { %6672 = vmatprep.subr.mxu0 %v8901_v48  ;;  %6698 = vmatprep.subr.mxu1 %v8906_v12  ;;  %10090 = vst [vmem:[#allocation28_spill] sm:$0xff] %v8942_v51 }
0x137e   :  { %6673 = vmatpush3.msra.mxu0 %v8914_v45  ;;  %v4151_v45 = vld [vmem:[%s9705_s15] sm:$0xf] }
0x137f   :  { %6366 = vmatmul.mubr.msk.f32.gmra.mxu1 %vm704_vm6, %v8802_v47  ;;  %6674 = vmatprep.subr.mxu0 %v8921_v44  ;;  %v8973_v44 = vld [vmem:[%s9706_s16 + $0x170] sm:$0xff]  ;;  %v4160_v49 = vrot.slane %v4151_v45, %v10061_v41 }
0x1380   :  { %4108 = vmatprep.mubr.f32.mxu1 %v9971_v1  ;;  %6675 = vmatpush3.msra.mxu0 %v8928_v31  ;;  %v8966_v31 = vld [vmem:[%s9706_s16 + $0x30] sm:$0xff]  ;;  %10095 = vst [vmem:[#allocation36_spill] sm:$0xff] %v8973_v44 }
0x1381   :  { %6676 = vmatprep.subr.mxu0 %v8934_v46  ;;  %10094 = vst [vmem:[#allocation32_spill] sm:$0xff] %v8966_v31  ;;  %v8987_v46 = vld [vmem:[%s9706_s16 + $0x168] sm:$0xff] }
0x1382   :  { %6677 = vmatpush3.msra.mxu0 %v8942_v51  ;;  %v8981_v51 = vld [vmem:[%s9706_s16 + $0x1e8] sm:$0xff]  ;;  %10097 = vst [vmem:[#allocation34_spill] sm:$0xff] %v8987_v46 }
0x1383   :  { %6373 = vmatmul.mubr.msk.f32.vlgmr.msra.gmra.mxu1 %vm704_vm6, %v8810_v25  ;;  %6678 = vmatprep.subr.mxu0 %v8949_v5  ;;  %10096 = vst [vmem:[#allocation33_spill] sm:$0xff] %v8981_v51  ;;  %v4121_v5 = vld [vmem:[%s9704_s14] sm:$0xf] }
0x1384   :  { %4114 = vmatprep.mubr.f32.mxu1 %v9971_v1  ;;  %6699 = vmatpush3.msra.mxu1 %v8954_v20  ;;  %v8994_v20 = vld [vmem:[%s9706_s16 + $0x1e0] sm:$0xff]  ;;  %v4126_v48 = vrot.slane %v4121_v5, %v10060_v7  ;;  %v4130_v62 = vrot.slane %v4121_v5, %v10061_v41 }
0x1385   :  { %6700 = vmatprep.subr.mxu1 %v8960_v10  ;;  %6679 = vmatpush3.msra.mxu0 %v8966_v31  ;;  %10098 = vst [vmem:[#allocation38_spill] sm:$0xff] %v8994_v20  ;;  %v9004_v31 = vld [vmem:[%s9706_s16 + $0xa8] sm:$0xff]  ;;  %v9043_v10 = vld [vmem:[%s9706_s16 + $0x1d0] sm:$0xff] }
0x1386   :  { %6701 = vmatpush3.msra.mxu1 %v8973_v44  ;;  %10099 = vst [vmem:[#allocation35_spill] sm:$0xff] %v9004_v31  ;;  %v9009_v44 = vld [vmem:[%s9706_s16 + $0x160] sm:$0xff]  ;;  %6680 = vmatprep.subr.mxu0 %v9004_v31  ;;  %10106 = vst [vmem:[#allocation46_spill] sm:$0xff] %v9043_v10 }
0x1387   :  { %6374 = vmatmul.mubr.msk.f32.gmra.mxu1 %vm704_vm6, %v8841_v54  ;;  %6702 = vmatprep.subr.mxu1 %v8981_v51  ;;  %10100 = vst [vmem:[#allocation40_spill] sm:$0xff] %v9009_v44  ;;  %v9026_v51 = vld [vmem:[%s9706_s16 + $0xa0] sm:$0xff] }
0x1388   :  { %6703 = vmatpush3.msra.mxu1 %v8987_v46  ;;  %v9016_v46 = vld [vmem:[%s9706_s16 + $0x28] sm:$0xff]  ;;  %10103 = vst [vmem:[#allocation39_spill] sm:$0xff] %v9026_v51  ;;  %v9038_v31 = vld [vmem:[%s9706_s16 + $0x20] sm:$0xff] }
0x1389   :  { %6704 = vmatprep.subr.mxu1 %v8994_v20  ;;  %10101 = vst [vmem:[#allocation37_spill] sm:$0xff] %v9016_v46  ;;  %v9021_v20 = vld [vmem:[%s9706_s16 + $0x1d8] sm:$0xff]  ;;  %6681 = vmatpush3.msra.mxu0 %v9016_v46  ;;  %10105 = vst [vmem:[#allocation41_spill] sm:$0xff] %v9038_v31  ;;  %v9055_v46 = vld [vmem:[%s9706_s16 + $0x150] sm:$0xff] }
0x138a   :  { %6705 = vmatpush3.msra.mxu1 %v9009_v44  ;;  %10102 = vst [vmem:[#allocation42_spill] sm:$0xff] %v9021_v20  ;;  %v9033_v44 = vld [vmem:[%s9706_s16 + $0x158] sm:$0xff]  ;;  %6682 = vmatprep.subr.mxu0 %v9026_v51  ;;  %10108 = vst [vmem:[#allocation48_spill] sm:$0xff] %v9055_v46  ;;  %v9069_v51 = vld [vmem:[%s9706_s16 + $0x1c8] sm:$0xff] }
0x138b   :  { %6706 = vmatprep.subr.mxu1 %v9021_v20  ;;  %10104 = vst [vmem:[#allocation44_spill] sm:$0xff] %v9033_v44  ;;  %v9050_v20 = vld [vmem:[%s9706_s16 + $0x98] sm:$0xff]  ;;  %6683 = vmatpush3.msra.mxu0 %v9038_v31  ;;  %10110 = vst [vmem:[#allocation50_spill] sm:$0xff] %v9069_v51 }
0x138c   :  { %6707 = vmatpush3.msra.mxu1 %v9033_v44  ;;  %10107 = vst [vmem:[#allocation43_spill] sm:$0xff] %v9050_v20  ;;  %6684 = vmatprep.subr.mxu0 %v9050_v20  ;;  %v9064_v44 = vld [vmem:[%s9706_s16 + $0x18] sm:$0xff] }
0x138d   :  { %6708 = vmatprep.subr.mxu1 %v9043_v10  ;;  %10109 = vst [vmem:[#allocation45_spill] sm:$0xff] %v9064_v44  ;;  %6685 = vmatpush3.msra.mxu0 %v9064_v44  ;;  %v9076_v10 = vld [vmem:[%s9706_s16 + $0x90] sm:$0xff] }
0x138e   :  { %6709 = vmatpush3.msra.mxu1 %v9055_v46  ;;  %10111 = vst [vmem:[#allocation47_spill] sm:$0xff] %v9076_v10  ;;  %v9081_v46 = vld [vmem:[%s9706_s16 + $0x148] sm:$0xff]  ;;  %6686 = vmatprep.subr.mxu0 %v9076_v10  ;;  %v9088_v44 = vld [vmem:[%s9706_s16 + $0x10] sm:$0xff] }
0x138f   :  { %6710 = vmatprep.subr.mxu1 %v9069_v51  ;;  %10112 = vst [vmem:[#allocation52_spill] sm:$0xff] %v9081_v46  ;;  %10113 = vst [vmem:[#allocation49_spill] sm:$0xff] %v9088_v44  ;;  %v9093_v51 = vld [vmem:[%s9706_s16 + $0x1c0] sm:$0xff]  ;;  %6687 = vmatpush3.msra.mxu0 %v9088_v44  ;;  %v9100_v10 = vld [vmem:[%s9706_s16 + $0x88] sm:$0xff] }
0x1390   :  { %6711 = vmatpush3.msra.mxu1 %v9081_v46  ;;  %10114 = vst [vmem:[#allocation54_spill] sm:$0xff] %v9093_v51  ;;  %10115 = vst [vmem:[#allocation51_spill] sm:$0xff] %v9100_v10  ;;  %v9105_v46 = vld [vmem:[%s9706_s16 + $0x140] sm:$0xff]  ;;  %6688 = vmatprep.subr.mxu0 %v9100_v10  ;;  %v9112_v44 = vld [vmem:[%s9706_s16 + $0x8] sm:$0xff] }
0x1391   :  { %6712 = vmatprep.subr.mxu1 %v9093_v51  ;;  %10116 = vst [vmem:[#allocation56_spill] sm:$0xff] %v9105_v46  ;;  %10117 = vst [vmem:[#allocation53_spill] sm:$0xff] %v9112_v44  ;;  %v9117_v51 = vld [vmem:[%s9706_s16 + $0x1b8] sm:$0xff]  ;;  %6689 = vmatpush3.msra.mxu0 %v9112_v44  ;;  %v9124_v10 = vld [vmem:[%s9706_s16 + $0x80] sm:$0xff] }
0x1392   :  { %6713 = vmatpush3.msra.mxu1 %v9105_v46  ;;  %10118 = vst [vmem:[#allocation58_spill] sm:$0xff] %v9117_v51  ;;  %10119 = vst [vmem:[#allocation55_spill] sm:$0xff] %v9124_v10  ;;  %v9129_v46 = vld [vmem:[%s9706_s16 + $0x138] sm:$0xff]  ;;  %6690 = vmatprep.subr.mxu0 %v9124_v10  ;;  %v9136_v44 = vld [vmem:[%s9706_s16] sm:$0xff] }
0x1393   :  { %6714 = vmatprep.subr.mxu1 %v9117_v51  ;;  %10120 = vst [vmem:[#allocation57_spill] sm:$0xff] %v9129_v46  ;;  %10121 = vst [vmem:[#allocation59_spill] sm:$0xff] %v9136_v44  ;;  %v9141_v51 = vld [vmem:[%s9706_s16 + $0x1b0] sm:$0xff]  ;;  %6691 = vmatpush3.msra.mxu0 %v9136_v44  ;;  %v9173_v44 = vld [vmem:[%s9706_s16 + $0x120] sm:$0xff] }
0x1394   :  { %6715 = vmatpush3.msra.mxu1 %v9129_v46  ;;  %10122 = vst [vmem:[#allocation60_spill] sm:$0xff] %v9141_v51  ;;  %v9148_v10 = vld [vmem:[%s9706_s16 + $0x130] sm:$0xff]  ;;  %v9154_v46 = vld [vmem:[%s9706_s16 + $0x1a8] sm:$0xff]  ;;  %7049 = vmatprep.subr.mxu0 %v9971_v1  ;;  %10127 = vst [vmem:[#allocation65_spill] sm:$0xff] %v9173_v44 }
0x1395   :  { %6716 = vmatprep.subr.mxu1 %v9141_v51  ;;  %10123 = vst [vmem:[#allocation61_spill] sm:$0xff] %v9148_v10  ;;  %10124 = vst [vmem:[#allocation62_spill] sm:$0xff] %v9154_v46  ;;  %v9161_v51 = vld [vmem:[%s9706_s16 + $0x128] sm:$0xff] }
0x1396   :  { %6717 = vmatpush3.msra.mxu1 %v9148_v10  ;;  %10125 = vst [vmem:[#allocation63_spill] sm:$0xff] %v9161_v51  ;;  %v9167_v10 = vld [vmem:[%s9706_s16 + $0x1a0] sm:$0xff] }
0x1397   :  { %6718 = vmatprep.subr.mxu1 %v9154_v46  ;;  %10126 = vst [vmem:[#allocation64_spill] sm:$0xff] %v9167_v10  ;;  %v9179_v46 = vld [vmem:[%s9706_s16 + $0x198] sm:$0xff] }
0x1398   :  { %6719 = vmatpush3.msra.mxu1 %v9161_v51  ;;  %10128 = vst [vmem:[#allocation66_spill] sm:$0xff] %v9179_v46  ;;  %v9185_v51 = vld [vmem:[%s9706_s16 + $0x118] sm:$0xff] }
0x1399   :  { %6720 = vmatprep.subr.mxu1 %v9167_v10  ;;  %10129 = vst [vmem:[#allocation67_spill] sm:$0xff] %v9185_v51  ;;  %v9191_v10 = vld [vmem:[%s9706_s16 + $0x190] sm:$0xff] }
0x139a   :  { %6721 = vmatpush3.msra.mxu1 %v9173_v44  ;;  %10130 = vst [vmem:[#allocation68_spill] sm:$0xff] %v9191_v10  ;;  %v9197_v44 = vld [vmem:[%s9706_s16 + $0x110] sm:$0xff] }
0x139b   :  { %6722 = vmatprep.subr.mxu1 %v9179_v46  ;;  %10131 = vst [vmem:[#allocation69_spill] sm:$0xff] %v9197_v44  ;;  %v9203_v46 = vld [vmem:[%s9706_s16 + $0x188] sm:$0xff] }
0x139c   :  { %6723 = vmatpush3.msra.mxu1 %v9185_v51  ;;  %10132 = vst [vmem:[#allocation70_spill] sm:$0xff] %v9203_v46  ;;  %v9209_v51 = vld [vmem:[%s9706_s16 + $0x108] sm:$0xff] }
0x139d   :  { %6724 = vmatprep.subr.mxu1 %v9191_v10  ;;  %10133 = vst [vmem:[#allocation71_spill] sm:$0xff] %v9209_v51  ;;  %v9215_v10 = vld [vmem:[%s9706_s16 + $0x180] sm:$0xff] }
0x139e   :  { %6725 = vmatpush3.msra.mxu1 %v9197_v44  ;;  %10134 = vst [vmem:[#allocation72_spill] sm:$0xff] %v9215_v10  ;;  %v9220_v44 = vld [vmem:[%s9706_s16 + $0x100] sm:$0xff] }
0x139f   :  { %6726 = vmatprep.subr.mxu1 %v9203_v46  ;;  %10135 = vst [vmem:[#allocation75_spill] sm:$0xff] %v9220_v44  ;;  %v3861_v46 = vpop.f32.mrf.mxu0 }
0x13a0   :  { %6727 = vmatpush3.msra.mxu1 %v9209_v51 }
0x13a1   :  { %6728 = vmatprep.subr.mxu1 %v9215_v10  ;;  %v3863_v20 = vpop.f32.mrf.mxu0 }
0x13a2   :  { %6729 = vmatpush3.msra.mxu1 %v9220_v44  ;;  %v4156_v44 = vrot.slane %v4151_v45, %v10060_v7 }
0x13a3   :  { %7068 = vmatprep.subr.mxu1 %v9971_v1  ;;  %v3867_v31 = vpop.f32.mrf.mxu0 }
0x13a5   :  { %v3869_v51 = vpop.f32.mrf.mxu0 }
0x142f   :  { %v4033_v12 = vpop.f32.mrf.mxu0 }
0x1430   :  { %v4034_v10 = vadd.f32 %v4033_v12, %v3861_v46 }
0x1431   :  { %v4035_v55 = vpop.f32.mrf.mxu0 }
0x1432   :  { %v4143_v17 = vmul.f32 %v4126_v48, %v4034_v10  ;;  %v4036_v29 = vadd.f32 %v4035_v55, %v3863_v20 }
0x1433   :  { %v4039_v13 = vpop.f32.mrf.mxu0 }
0x1434   :  { %v4173_v0 = vadd.f32 %v4156_v44, %v4143_v17  ;;  %v4144_v56 = vmul.f32 %v4130_v62, %v4036_v29  ;;  %v4040_v54 = vadd.f32 %v4039_v13, %v3867_v31 }
0x1435   :  { %v4041_v61 = vpop.f32.mrf.mxu0 }
0x1436   :  { %v4147_v34 = vmul.f32 %v4126_v48, %v4040_v54  ;;  %v4042_v39 = vadd.f32 %v4041_v61, %v3869_v51  ;;  %v4174_v58 = vadd.f32 %v4160_v49, %v4144_v56  ;;  %v4181_v25 = vmax.f32 %v4173_v0, 0.0 }
0x1437   :  { %v4134_v61 = vrot.slane %v4121_v5, %v8087_v60 }
0x1438   :  { %v4148_v47 = vmul.f32 %v4130_v62, %v4042_v39  ;;  %v4182_v12 = vmax.f32 %v4174_v58, 0.0  ;;  %v4177_v46 = vadd.f32 %v4156_v44, %v4147_v34  ;;  %v4138_v58 = vrot.slane %v4121_v5, %v8090_v23  ;;  %v9244_v5 = vld [vmem:[%s9709_s19 + $0x18] sm:$0xff] }
0x143a   :  { %4317 = vmatprep.mubr.f32.mxu0 %v4182_v12  ;;  %v4178_v7 = vadd.f32 %v4160_v49, %v4148_v47  ;;  %v4185_v10 = vmax.f32 %v4177_v46, 0.0  ;;  %v4164_v47 = vrot.slane %v4151_v45, %v8087_v60 }
0x143b   :  { %v3938_v24 = vpop.f32.mrf.mxu1  ;;  %4318 = vmatmul.mubr.f32.vlgmr.msra.gmra.mxu0 %v4181_v25 }
0x143c   :  { %v4186_v55 = vmax.f32 %v4178_v7, 0.0  ;;  %v4168_v7 = vrot.slane %v4151_v45, %v8090_v23 }
0x143d   :  { %v3940_v20 = vpop.f32.mrf.mxu1 }
0x143e   :  { %4322 = vmatprep.mubr.f32.mxu0 %v4186_v55 }
0x143f   :  { %v3944_v41 = vpop.f32.mrf.mxu1  ;;  %4323 = vmatmul.mubr.f32.gmra.mxu0 %v4185_v10 }
0x1440   :  { %7065 = vmatprep.mubr.msk.f32.mxu0 %vm7237_vm2, %v9971_v1 }
0x1441   :  { %v3946_v54 = vpop.f32.mrf.mxu1 }
0x1443   :  { %v4110_v56 = vpop.f32.mrf.mxu1 }
0x1444   :  { %v4111_v39 = vadd.f32 %v4110_v56, %v3938_v24  ;;  %v9285_v56 = vld [vmem:[%s9710_s20 + $0x30] sm:$0xff] }
0x1445   :  { %v4112_v34 = vpop.f32.mrf.mxu1 }
0x1446   :  { %v4145_v25 = vmul.f32 %v4134_v61, %v4111_v39  ;;  %v4113_v0 = vadd.f32 %v4112_v34, %v3940_v20  ;;  %v9256_v20 = vld [vmem:[%s9709_s19 + $0x8] sm:$0xff]  ;;  %v9299_v39 = vld [vmem:[%s9710_s20 + $0x20] sm:$0xff] }
0x1447   :  { %v4116_v13 = vpop.f32.mrf.mxu1  ;;  %v9320_v34 = vld [vmem:[%s9710_s20 + $0x8] sm:$0xff] }
0x1448   :  { %v4146_v49 = vmul.f32 %v4138_v58, %v4113_v0  ;;  %v4117_v29 = vadd.f32 %v4116_v13, %v3944_v41  ;;  %v4175_v17 = vadd.f32 %v4164_v47, %v4145_v25  ;;  %v9249_v41 = vld [vmem:[%s9709_s19 + $0x10] sm:$0xff]  ;;  %v9327_v25 = vld [vmem:[%s9710_s20] sm:$0xff]  ;;  %v9333_v0 = vld [vmem:[%s9713_s23 + $0x38] sm:$0xff] }
0x1449   :  { %v4118_v62 = vpop.f32.mrf.mxu1  ;;  %10137 = vst [vmem:[#allocation77_spill] sm:$0xff] %v9333_v0  ;;  %v9346_v13 = vld [vmem:[%s9713_s23 + $0x28] sm:$0xff] }
0x144a   :  { %v4149_v48 = vmul.f32 %v4134_v61, %v4117_v29  ;;  %v4119_v44 = vadd.f32 %v4118_v62, %v3946_v54  ;;  %v4176_v31 = vadd.f32 %v4168_v7, %v4146_v49  ;;  %v4183_v24 = vmax.f32 %v4175_v17, 0.0  ;;  %v9263_v54 = vld [vmem:[%s9709_s19] sm:$0xff]  ;;  %v9278_v61 = vld [vmem:[%s9710_s20 + $0x38] sm:$0xff]  ;;  %10139 = vst [vmem:[#allocation79_spill] sm:$0xff] %v9346_v13 }
0x144b   :  { %10136 = vst [vmem:[#allocation76_spill] sm:$0xff] %v9263_v54  ;;  %7050 = vmatpush3.msra.mxu0 %v9278_v61 }
0x144c   :  { %v4150_v51 = vmul.f32 %v4138_v58, %v4119_v44  ;;  %v4184_v12 = vmax.f32 %v4176_v31, 0.0  ;;  %v4179_v46 = vadd.f32 %v4164_v47, %v4149_v48  ;;  %7051 = vmatprep.subr.mxu0 %v9971_v1  ;;  %v9306_v58 = vld [vmem:[%s9710_s20 + $0x18] sm:$0xff]  ;;  %v9313_v47 = vld [vmem:[%s9710_s20 + $0x10] sm:$0xff] }
0x144d   :  { %7052 = vmatpush3.msra.mxu0 %v9285_v56 }
0x144e   :  { %4392 = vmatprep.mubr.f32.mxu1 %v4184_v12  ;;  %v4180_v10 = vadd.f32 %v4168_v7, %v4150_v51  ;;  %v4187_v55 = vmax.f32 %v4179_v46, 0.0  ;;  %7053 = vmatprep.subr.mxu0 %v9971_v1  ;;  %v9338_v7 = vld [vmem:[%s9713_s23 + $0x30] sm:$0xff]  ;;  %v9355_v12 = vld [vmem:[%s9707_s17] ss:$0 sm:$0xff] }
0x144f   :  { %4393 = vmatmul.mubr.f32.vlgmr.msra.gmra.mxu1 %v4183_v24  ;;  %10138 = vst [vmem:[#allocation78_spill] sm:$0xff] %v9338_v7 }
0x1450   :  { %7069 = vmatpush3.msra.mxu1 %v9244_v5  ;;  %v4188_v45 = vmax.f32 %v4180_v10, 0.0  ;;  %v9360_v10 = vld [vmem:[%s9708_s18] ss:$0 sm:$0xff] }
0x1451   :  { %7070 = vmatprep.subr.mxu1 %v9971_v1 }
0x1452   :  { %4397 = vmatprep.mubr.f32.mxu1 %v4188_v45  ;;  %7071 = vmatpush3.msra.mxu1 %v9249_v41 }
0x1453   :  { %4398 = vmatmul.mubr.f32.gmra.mxu1 %v4187_v55  ;;  %7072 = vmatprep.subr.mxu1 %v9971_v1 }
0x1454   :  { %7073 = vmatpush3.msra.mxu1 %v9256_v20  ;;  %7076 = vmatprep.mubr.msk.f32.mxu1 %vm7237_vm2, %v9971_v1 }
0x1455   :  { %7074 = vmatprep.subr.mxu1 %v9971_v1 }
0x1456   :  { %7075 = vmatpush3.msra.mxu1 %v9263_v54 }
0x1457   :  { %7077 = vmatmul.mubr.msk.f32.vlgmr.msra.gmra.mxu1 %vm95_vm3, %v8648_v32  ;;  %7079 = vmatprep.subr.mxu1 %v9971_v1  ;;  %v9292_v32 = vld [vmem:[%s9710_s20 + $0x28] sm:$0xff] }
0x1458   :  { %7095 = vmatprep.mubr.msk.f32.mxu1 %vm7237_vm2, %v9971_v1  ;;  %7054 = vmatpush3.msra.mxu0 %v9292_v32 }
0x1459   :  { %7055 = vmatprep.subr.mxu0 %v9971_v1  ;;  %7080 = vmatpush3.msra.mxu1 %v9333_v0 }
0x145a   :  { %7056 = vmatpush3.msra.mxu0 %v9299_v39  ;;  %7081 = vmatprep.subr.mxu1 %v9971_v1 }
0x145b   :  { %7057 = vmatprep.subr.mxu0 %v9971_v1  ;;  %7082 = vmatpush3.msra.mxu1 %v9338_v7 }
0x145c   :  { %7058 = vmatpush3.msra.mxu0 %v9306_v58  ;;  %7083 = vmatprep.subr.mxu1 %v9971_v1 }
0x145d   :  { %7059 = vmatprep.subr.mxu0 %v9971_v1  ;;  %7084 = vmatpush3.msra.mxu1 %v9346_v13 }
0x145e   :  { %7060 = vmatpush3.msra.mxu0 %v9313_v47  ;;  %7085 = vmatprep.subr.mxu1 %v9971_v1 }
0x145f   :  { %7061 = vmatprep.subr.mxu0 %v9971_v1 }
0x1460   :  { %7062 = vmatpush3.msra.mxu0 %v9320_v34 }
0x1461   :  { %7063 = vmatprep.subr.mxu0 %v9971_v1 }
0x1462   :  { %7064 = vmatpush3.msra.mxu0 %v9327_v25 }
0x1463   :  { %7098 = vmatprep.subr.mxu0 %v9971_v1 }
0x14fb   :  { %v6692_v49 = vpop.f32.mrf.mxu0 }
0x14fd   :  { %v6693_v29 = vpop.f32.mrf.mxu0 }
0x14fe   :  { %v6694_v44 = vadd.f32 %v6693_v29, %v6692_v49 }
0x14ff   :  { %v6695_v17 = vpop.f32.mrf.mxu0 }
0x1501   :  { %v6696_v51 = vpop.f32.mrf.mxu0 }
0x1502   :  { %v6697_v55 = vadd.f32 %v6696_v51, %v6695_v17  ;;  %v9375_v51 = vld [vmem:[%s9990_s10 + $0x8] sm:$0xff] }
0x150f   :  { %v6730_v62 = vpop.f32.mrf.mxu1 }
0x1511   :  { %v6731_v48 = vpop.f32.mrf.mxu1 }
0x1512   :  { %v6732_v31 = vadd.f32 %v6731_v48, %v6730_v62  ;;  %v9367_v48 = vld [vmem:[%s9990_s10] sm:$0xff] }
0x1513   :  { %v6733_v24 = vpop.f32.mrf.mxu1 }
0x1514   :  { %v4395_v46 = vadd.f32 %v6732_v31, %v6694_v44 }
0x1515   :  { %v6734_v45 = vpop.f32.mrf.mxu1 }
0x1516   :  { %v4410_v13 = vmul.f32 %v9355_v12, %v4395_v46  ;;  %v6735_v7 = vadd.f32 %v6734_v45, %v6733_v24 }
0x1517   :  { %v4587_v49 = vpop.f32.mrf.mxu1 }
0x1518   :  { %v4419_v29 = vadd.f32 %v9360_v10, %v4410_v13  ;;  %v4400_v62 = vadd.f32 %v6735_v7, %v6697_v55 }
0x1519   :  { %v7078_v44 = vpop.f32.mrf.mxu1 }
0x151a   :  { %v4421_v31 = vmax.f32 %v4419_v29, 0.0  ;;  %v4411_v0 = vmul.f32 %v9355_v12, %v4400_v62  ;;  %v9427_v29 = vld [vmem:[%s9711_s21] ss:$0 sm:$0xff] }
0x151c   :  { %v4425_v54 = vadd.f32 %v9367_v48, %v4421_v31  ;;  %v4420_v17 = vadd.f32 %v9360_v10, %v4411_v0  ;;  %v9432_v31 = vld [vmem:[%s9712_s22] ss:$0 sm:$0xff] }
0x151e   :  { %v4422_v13 = vmax.f32 %v4420_v17, 0.0  ;;  %v4428_v7 = vrot.slane %v4425_v54, 4 }
0x1520   :  { %v4426_v24 = vadd.f32 %v9375_v51, %v4422_v13  ;;  %v4430_v45 = vmax.f32 %v4425_v54, %v4428_v7  ;;  %v9420_v54 = vld [vmem:[%s9713_s23] sm:$0xff] }
0x1522   :  { %v4432_v46 = vrot.slane %v4426_v24, 4 }
0x1524   :  { %v4434_v55 = vmax.f32 %v4426_v24, %v4432_v46 }
0x1526   :  { %v4435_v44 = vmax.f32 %v4430_v45, %v4434_v55 }
0x1528   :  { %7066 = vmatmul.mubr.msk.f32.vlgmr.msra.gmra.mxu0 %vm1377_vm7, %v4435_v44 }
0x1529   :  { %7099 = vmatpush3.msra.mxu0 %v8559_v15  ;;  %7106 = vmatprep.mubr.msk.f32.mxu0 %vm7237_vm2, %v9971_v1  ;;  %v9392_v15 = vld [vmem:[%s9713_s23 + $0x20] sm:$0xff] }
0x152a   :  { %7100 = vmatprep.subr.mxu0 %v9971_v1  ;;  %7086 = vmatpush3.msra.mxu1 %v9392_v15 }
0x152b   :  { %7101 = vmatpush3.msra.mxu0 %v8566_v16  ;;  %7087 = vmatprep.subr.mxu1 %v9971_v1  ;;  %v9399_v16 = vld [vmem:[%s9713_s23 + $0x18] sm:$0xff] }
0x152c   :  { %7102 = vmatprep.subr.mxu0 %v9971_v1  ;;  %7088 = vmatpush3.msra.mxu1 %v9399_v16 }
0x152d   :  { %7103 = vmatpush3.msra.mxu0 %v8573_v59  ;;  %7089 = vmatprep.subr.mxu1 %v9971_v1  ;;  %v9406_v59 = vld [vmem:[%s9713_s23 + $0x10] sm:$0xff] }
0x152e   :  { %7104 = vmatprep.subr.mxu0 %v9971_v1  ;;  %7090 = vmatpush3.msra.mxu1 %v9406_v59 }
0x152f   :  { %7105 = vmatpush3.msra.mxu0 %v8580_v3  ;;  %7091 = vmatprep.subr.mxu1 %v9971_v1  ;;  %v9413_v3 = vld [vmem:[%s9713_s23 + $0x8] sm:$0xff] }
0x1530   :  { %7109 = vmatprep.subr.mxu0 %v9971_v1  ;;  %7092 = vmatpush3.msra.mxu1 %v9413_v3 }
0x1531   :  { %7093 = vmatprep.subr.mxu1 %v9971_v1 }
0x1532   :  { %7094 = vmatpush3.msra.mxu1 %v9420_v54 }
0x1533   :  { %7114 = vmatprep.subr.mxu1 %v9971_v1 }
0x15e8   :  { %v4517_v0 = vpop.f32.mrf.mxu0 }
0x15e9   :  { %v4588_v62 = vadd.f32 %v4587_v49, %v4517_v0 }
0x15ea   :  { %v7067_v17 = vpop.f32.mrf.mxu0 }
0x15eb   :  { %v4598_v13 = vmul.f32 %v9427_v29, %v4588_v62 }
0x15ed   :  { %v4606_v7 = vadd.f32 %v9432_v31, %v4598_v13 }
0x15ef   :  { %v4607_v24 = vmax.f32 %v4606_v7, 0.0 }
0x15f1   :  { %7096 = vmatmul.mubr.msk.f32.vlgmr.msra.gmra.mxu1 %vm1377_vm7, %v4607_v24 }
0x15f2   :  { %7115 = vmatpush3.msra.mxu1 %v8611_v2  ;;  %7122 = vmatprep.mubr.msk.f32.mxu1 %vm7237_vm2, %v9971_v1  ;;  %v9450_v2 = vld [vmem:[%s9714_s24] ss:$0 sm:$0xff] }
0x15f3   :  { %7116 = vmatprep.subr.mxu1 %v9971_v1 }
0x15f4   :  { %7117 = vmatpush3.msra.mxu1 %v8616_v27  ;;  %v9455_v27 = vld [vmem:[%s9715_s25] ss:$0 sm:$0xff] }
0x15f5   :  { %7118 = vmatprep.subr.mxu1 %v9971_v1 }
0x15f6   :  { %7119 = vmatpush3.msra.mxu1 %v8623_v40 }
0x15f7   :  { %7120 = vmatprep.subr.mxu1 %v9971_v1 }
0x15f8   :  { %7121 = vmatpush3.msra.mxu1 %v8630_v37  ;;  %v4708_v37 = vld [vmem:[%s9904_s0] sm:$0x3] }
0x15f9   :  { %5190 = vmatprep.subr.mxu1 %v8636_v26 }
0x16b1   :  { %v4685_v49 = vpop.f32.mrf.mxu1 }
0x16b2   :  { %v4696_v46 = vmul.f32 %v9450_v2, %v4685_v49 }
0x16b3   :  { %v7097_v40 = vpop.f32.mrf.mxu1 }
0x16b4   :  { %v4704_v45 = vadd.f32 %v9455_v27, %v4696_v46 }
0x16b6   :  { %v4705_v55 = vmax.f32 %v4704_v45, 0.0 }
0x16b8   :  { %7107 = vmatmul.mubr.msk.f32.vlgmr.msra.gmra.mxu0 %vm95_vm3, %v4705_v55 }
0x16b9   :  { %7110 = vmatpush3.msk.msra.mxu0 %vm173_vm0, %v4708_v37  ;;  %7111 = vmatprep.mubr.msk.f32.mxu0 %vm7237_vm2, %v9971_v1 }
0x16ba   :  { %6392 = vmatprep.subr.msk.mxu0 %vm173_vm0, %v8701_v42 }
0x16bc   :  { %7112 = vmatmul.mubr.msk.f32.vlgmr.msra.gmra.mxu0 %vm169_vm1, %v8723_v14 }
0x16bd   :  { %6393 = vmatpush1.msk.msra.mxu0 %vm173_vm0, %v8697_v18  ;;  %5072 = vmatprep.mubr.f32.mxu0 %v9971_v1 }
0x16be   :  { %6395 = vmatprep.subr.msk.mxu0 %vm173_vm0, %v8712_v8 }
0x1778   :  { %v4782_v26 = vpop.f32.mrf.mxu0 }
0x177a   :  { %v7108_v44 = vpop.f32.mrf.mxu0 }
0x177c   :  { %v4855_v0 = vpop.f32.mrf.mxu0 }
0x177d   :  { %v4856_v62 = vadd.f32 %v4855_v0, %v4782_v26 }
0x177e   :  { %v7113_v17 = vpop.f32.mrf.mxu0 }
0x177f   :  { %v4866_v13 = vadd.f32 %v8599_v50, %v4856_v62  ;;  %v10149_v62 = vld [vmem:[#allocation15_spill] sm:$0xff]  ;;  %v10150_v17 = vld [vmem:[#allocation16_spill] sm:$0xff] }
0x1781   :  { %7206 = vtanh.f32 %v4866_v13  ;;  %v6389_v7 = vmul.f32 -1.442695, %v4866_v13 }
0x1783   :  { %7208 = vpow2.f32 %v6389_v7  ;;  %v10152_v7 = vld [vmem:[#allocation18_spill] sm:$0xff] }
0x178e   :  { %v7207_v42 = vpop.eup %7206 }
0x178f   :  { %4876 = vrot.lane.b32.xlu1 %v7207_v42, %s9991_s7  ;;  %v10151_v42 = vld [vmem:[#allocation17_spill] sm:$0xff] }
0x1790   :  { %v7209_v24 = vpop.eup %7208 }
0x1791   :  { %v4870_v18 = vadd.f32 1.0, %v7209_v24 }
0x1793   :  { %7210 = vrcp.f32 %v4870_v18  ;;  %v10153_v18 = vld [vmem:[#allocation19_spill] sm:$0xff] }
0x17a0   :  { %v7211_v49 = vpop.eup %7210 }
0x17a1   :  { %v4874_v8 = vmul.f32 %v7211_v49, %v8605_v11 }
0x1801   :  { %v4877_v46 = vpop.permute.xlu1 %4876 }
0x1802   :  { %v4879_v40 = vmul.f32 %v7211_v49, %v4877_v46  ;;  %v10155_v46 = vld [vmem:[#allocation21_spill] sm:$0xff] }
0x1804   :  { %4881 = vrot.lane.b32.xlu0 %v4879_v40, %s9992_s4  ;;  %v10156_v40 = vld [vmem:[#allocation23_spill] sm:$0xff] }
0x1876   :  { %v4882_v45 = vpop.permute.xlu0 %4881 }
0x1877   :  { %v4884_v55 = vadd.f32 %v4882_v45, %v4874_v8  ;;  %v10157_v8 = vld [vmem:[#allocation22_spill] sm:$0xff]  ;;  %v10158_v45 = vld [vmem:[#allocation24_spill] sm:$0xff] }
0x1879   :  { %7212 = vtanh.f32 %v4884_v55  ;;  %v10159_v55 = vld [vmem:[#allocation25_spill] sm:$0xff] }
0x1886   :  { %v7213_v50 = vpop.eup %7212 }
0x1887   :  { %4887 = vrot.lane.b32.xlu1 %v7213_v50, %s9991_s7  ;;  %v10161_v50 = vld [vmem:[#allocation27_spill] sm:$0xff] }
0x18f9   :  { %v4888_v37 = vpop.permute.xlu1 %4887 }
0x18fa   :  { %v4890_v26 = vmul.f32 %v7211_v49, %v4888_v37  ;;  %v10154_v49 = vld [vmem:[#allocation20_spill] sm:$0xff] }
0x18fb   :  { %v10162_v37 = vld [vmem:[#allocation28_spill] sm:$0xff] }
0x18fc   :  { %4903 = vrot.lane.b32.xlu0 %v4890_v26, %s9992_s4  ;;  %v10163_v26 = vld [vmem:[#allocation29_spill] sm:$0xff] }
0x196e   :  { %v9481_v44 = vpop.permute.xlu0 %4903 }
0x196f   :  { %7123 = vmatmul.mubr.msk.f32.vlgmr.msra.gmra.mxu1 %vm95_vm3, %v9481_v44 }
0x1970   :  { %5191 = vmatpush1.msra.mxu1 %v8646_v6  ;;  %5230 = vmatprep.mubr.f32.mxu1 %v9971_v1 }
0x1971   :  { %5192 = vmatprep.subr.mxu1 %v8653_v33 }
0x1972   :  { %5193 = vmatpush1.msra.mxu1 %v8660_v19 }
0x1973   :  { %5194 = vmatprep.subr.mxu1 %v8666_v35 }
0x1974   :  { %5195 = vmatpush1.msra.mxu1 %v8673_v36  ;;  %v10140_v36 = vld [vmem:[#allocation6_spill] sm:$0xff] }
0x1975   :  { %5196 = vmatprep.subr.mxu1 %v8679_v38  ;;  %v10141_v38 = vld [vmem:[#allocation7_spill] sm:$0xff] }
0x1976   :  { %5197 = vmatpush1.msra.mxu1 %v8685_v53 }
0x1977   :  { %6398 = vmatmul.mubr.msk.f32.vlgmr.msra.gmra.mxu1 %vm95_vm3, %v9481_v44 }
0x1978   :  { %5394 = vmatprep.mubr.f32.mxu1 %v9971_v1 }
0x1a2f   :  { %v4973_v11 = vpop.f32.mrf.mxu1 }
0x1a30   :  { %v4974_v6 = vadd.f32 %v8719_v9, %v4973_v11  ;;  %v10142_v9 = vld [vmem:[#allocation8_spill] sm:$0xff]  ;;  %v10164_v11 = vld [vmem:[#allocation30_spill] sm:$0xff] }
0x1a31   :  { %v7124_v0 = vpop.f32.mrf.mxu1 }
0x1a32   :  { %v4977_v33 = vadd.f32 %v4974_v6, %v8723_v14  ;;  %v10143_v14 = vld [vmem:[#allocation9_spill] sm:$0xff]  ;;  %v10165_v6 = vld [vmem:[#allocation31_spill] sm:$0xff]  ;;  %v10166_v0 = vld [vmem:[#allocation32_spill] sm:$0xff] }
0x1a34   :  { %6425 = vst.msk [vmem:[%s9716_s26 + $0xc] sm:$0xf] %vm1636_vm5, %v4977_v33  ;;  %6394 = vmatmul.mubr.msk.f32.vlgmr.msra.gmra.mxu0 %vm169_vm1, %v4977_v33 }
0x1a35   :  { %6396 = vmatpush1.msk.msra.mxu0 %vm173_vm0, %v8704_v63  ;;  %5143 = vmatprep.mubr.f32.mxu0 %v9971_v1 }
0x1a36   :  { %5261 = vmatprep.subr.mxu0 %v8728_v22 }
0x1a37   :  { %v5232_v19 = vpop.f32.mrf.mxu1 }
0x1a38   :  { %6397 = vmatmul.mubr.msk.f32.vlgmr.msra.gmra.mxu0 %vm169_vm1, %v4977_v33  ;;  %v10167_v33 = vld [vmem:[#allocation36_spill] sm:$0xff] }
0x1a39   :  { %v5234_v35 = vpop.f32.mrf.mxu1  ;;  %5262 = vmatpush1.msra.mxu0 %v8744_v30  ;;  %5301 = vmatprep.mubr.f32.mxu0 %v9971_v1  ;;  %v10144_v30 = vld [vmem:[#allocation10_spill] sm:$0xff] }
0x1a3a   :  { %5263 = vmatprep.subr.mxu0 %v8749_v57  ;;  %6400 = vmatprep.subr.msk.mxu1 %vm711_vm4, %v5234_v35  ;;  %v10145_v57 = vld [vmem:[#allocation11_spill] sm:$0xff]  ;;  %v10169_v35 = vld [vmem:[#allocation33_spill] sm:$0xff] }
0x1a3b   :  { %5264 = vmatpush1.msra.mxu0 %v8756_v21  ;;  %6401 = vmatpush1.msk.msra.mxu1 %vm711_vm4, %v5232_v19  ;;  %v10146_v21 = vld [vmem:[#allocation12_spill] sm:$0xff]  ;;  %v10168_v19 = vld [vmem:[#allocation35_spill] sm:$0xff] }
0x1a3c   :  { %5265 = vmatprep.subr.mxu0 %v8762_v52  ;;  %6402 = vmatmul.mubr.msk.f32.vlgmr.msra.gmra.mxu1 %vm704_vm6, %v8794_v28  ;;  %v10147_v52 = vld [vmem:[#allocation13_spill] sm:$0xff] }
0x1a3d   :  { %5266 = vmatpush1.msra.mxu0 %v8770_v43  ;;  %5400 = vmatprep.mubr.f32.mxu1 %v9971_v1  ;;  %v10148_v43 = vld [vmem:[#allocation14_spill] sm:$0xff] }
0x1a3e   :  { %5267 = vmatprep.subr.mxu0 %v8777_v4 }
0x1a3f   :  { %5268 = vmatpush1.msra.mxu0 %v10140_v36  ;;  %v10170_v36 = vld [vmem:[#allocation34_spill] sm:$0xff] }
0x1a40   :  { %6399 = vmatmul.mubr.msk.f32.vlgmr.msra.gmra.mxu0 %vm95_vm3, %v9481_v44  ;;  %6403 = vmatmul.mubr.msk.f32.gmra.mxu1 %vm704_vm6, %v10141_v38 }
0x1a41   :  { %5566 = vmatprep.mubr.f32.mxu1 %v9971_v1  ;;  %5471 = vmatprep.mubr.f32.mxu0 %v9971_v1 }
0x1af4   :  { %v5074_v53 = vpop.f32.mrf.mxu0 }
0x1af6   :  { %v5076_v63 = vpop.f32.mrf.mxu0 }
0x1af7   :  { %6408 = vmatprep.subr.msk.mxu1 %vm711_vm4, %v5076_v63  ;;  %v10173_v63 = vld [vmem:[#allocation39_spill] sm:$0xff] }
0x1af8   :  { %6409 = vmatpush1.msk.msra.mxu1 %vm711_vm4, %v5074_v53  ;;  %v5145_v22 = vpop.f32.mrf.mxu0  ;;  %v10172_v53 = vld [vmem:[#allocation38_spill] sm:$0xff] }
0x1af9   :  { %6410 = vmatmul.mubr.msk.f32.vlgmr.msra.gmra.mxu1 %vm704_vm6, %v10142_v9  ;;  %6771 = vmatprep.subr.mxu1 %v10143_v14  ;;  %v10175_v14 = vld [vmem:[#allocation41_spill] sm:$0xff] }
0x1afa   :  { %5572 = vmatprep.mubr.f32.mxu1 %v9971_v1  ;;  %6772 = vmatpush3.msra.mxu1 %v10144_v30  ;;  %v5147_v4 = vpop.f32.mrf.mxu0  ;;  %v10177_v30 = vld [vmem:[#allocation43_spill] sm:$0xff] }
0x1afb   :  { %6773 = vmatprep.subr.mxu1 %v10145_v57  ;;  %v10178_v57 = vld [vmem:[#allocation44_spill] sm:$0xff] }
0x1afc   :  { %6774 = vmatpush3.msra.mxu1 %v10146_v21  ;;  %v10179_v21 = vld [vmem:[#allocation45_spill] sm:$0xff] }
0x1afd   :  { %6411 = vmatmul.mubr.msk.f32.gmra.mxu1 %vm704_vm6, %v10147_v52  ;;  %6775 = vmatprep.subr.mxu1 %v10148_v43  ;;  %v10181_v43 = vld [vmem:[#allocation47_spill] sm:$0xff] }
0x1afe   :  { %6776 = vmatpush3.msra.mxu1 %v10149_v62  ;;  %v10183_v62 = vld [vmem:[#allocation49_spill] sm:$0xff] }
0x1aff   :  { %6777 = vmatprep.subr.mxu1 %v10150_v17  ;;  %v10184_v17 = vld [vmem:[#allocation50_spill] sm:$0xff] }
0x1b00   :  { %v5303_v13 = vpop.f32.mrf.mxu0  ;;  %6778 = vmatpush3.msra.mxu1 %v10151_v42  ;;  %v10186_v42 = vld [vmem:[#allocation52_spill] sm:$0xff] }
0x1b01   :  { %6779 = vmatprep.subr.mxu1 %v10152_v7  ;;  %v10187_v7 = vld [vmem:[#allocation53_spill] sm:$0xff] }
0x1b02   :  { %v5305_v24 = vpop.f32.mrf.mxu0  ;;  %6780 = vmatpush3.msra.mxu1 %v10153_v18  ;;  %v10189_v18 = vld [vmem:[#allocation55_spill] sm:$0xff] }
0x1b03   :  { %6404 = vmatprep.subr.msk.mxu0 %vm711_vm4, %v5305_v24  ;;  %6781 = vmatprep.subr.mxu1 %v10154_v49  ;;  %v10188_v24 = vld [vmem:[#allocation54_spill] sm:$0xff]  ;;  %v10190_v49 = vld [vmem:[#allocation56_spill] sm:$0xff] }
0x1b04   :  { %6405 = vmatpush1.msk.msra.mxu0 %vm711_vm4, %v5303_v13  ;;  %6782 = vmatpush3.msra.mxu1 %v10155_v46  ;;  %v10185_v13 = vld [vmem:[#allocation51_spill] sm:$0xff] }
0x1b05   :  { %6406 = vmatmul.mubr.msk.f32.vlgmr.msra.gmra.mxu0 %vm704_vm6, %v8794_v28  ;;  %6412 = vmatprep.subr.msk.mxu0 %vm711_vm4, %v5147_v4  ;;  %v10160_v28 = vld [vmem:[#allocation26_spill] sm:$0xff]  ;;  %v10182_v4 = vld [vmem:[#allocation48_spill] sm:$0xff]  ;;  %v10191_v46 = vld [vmem:[#allocation59_spill] sm:$0xff] }
0x1b06   :  { %6413 = vmatpush1.msk.msra.mxu0 %vm711_vm4, %v5145_v22  ;;  %5477 = vmatprep.mubr.f32.mxu0 %v9971_v1  ;;  %v10176_v22 = vld [vmem:[#allocation42_spill] sm:$0xff] }
0x1b07   :  { %6809 = vmatprep.subr.mxu0 %v10156_v40  ;;  %6783 = vmatprep.subr.mxu1 %v10157_v8  ;;  %v10192_v40 = vld [vmem:[#allocation58_spill] sm:$0xff]  ;;  %v10193_v8 = vld [vmem:[#allocation57_spill] sm:$0xff] }
0x1b08   :  { %6784 = vmatpush3.msra.mxu1 %v10158_v45  ;;  %v10194_v45 = vld [vmem:[#allocation60_spill] sm:$0xff] }
0x1b09   :  { %6407 = vmatmul.mubr.msk.f32.gmra.mxu0 %vm704_vm6, %v10141_v38  ;;  %6785 = vmatprep.subr.mxu1 %v10159_v55  ;;  %v10171_v38 = vld [vmem:[#allocation37_spill] sm:$0xff] }
0x1b0a   :  { %5643 = vmatprep.mubr.f32.mxu0 %v9971_v1  ;;  %6786 = vmatpush3.msra.mxu1 %v10160_v28  ;;  %v10195_v55 = vld [vmem:[#allocation61_spill] sm:$0xff]  ;;  %v10196_v28 = vld [vmem:[#allocation62_spill] sm:$0xff] }
0x1b0b   :  { %6787 = vmatprep.subr.mxu1 %v10161_v50  ;;  %v10197_v50 = vld [vmem:[#allocation63_spill] sm:$0xff] }
0x1b0c   :  { %6788 = vmatpush3.msra.mxu1 %v10162_v37  ;;  %v10198_v37 = vld [vmem:[#allocation64_spill] sm:$0xff] }
0x1b0d   :  { %6414 = vmatmul.mubr.msk.f32.vlgmr.msra.gmra.mxu0 %vm704_vm6, %v10142_v9  ;;  %6789 = vmatprep.subr.mxu1 %v10163_v26  ;;  %v10174_v9 = vld [vmem:[#allocation40_spill] sm:$0xff]  ;;  %v10199_v26 = vld [vmem:[#allocation65_spill] sm:$0xff] }
0x1b0e   :  { %5649 = vmatprep.mubr.f32.mxu0 %v9971_v1  ;;  %6810 = vmatpush3.msra.mxu0 %v10164_v11  ;;  %v10200_v11 = vld [vmem:[#allocation66_spill] sm:$0xff] }
0x1b0f   :  { %6811 = vmatprep.subr.mxu0 %v10165_v6  ;;  %6790 = vmatpush3.msra.mxu1 %v10166_v0  ;;  %v10201_v6 = vld [vmem:[#allocation67_spill] sm:$0xff]  ;;  %v10202_v0 = vld [vmem:[#allocation68_spill] sm:$0xff] }
0x1b10   :  { %6812 = vmatpush3.msra.mxu0 %v10167_v33  ;;  %6791 = vmatprep.subr.mxu1 %v10168_v19  ;;  %v10203_v33 = vld [vmem:[#allocation69_spill] sm:$0xff]  ;;  %v10204_v19 = vld [vmem:[#allocation70_spill] sm:$0xff] }
0x1b11   :  { %6415 = vmatmul.mubr.msk.f32.gmra.mxu0 %vm704_vm6, %v10147_v52  ;;  %6813 = vmatprep.subr.mxu0 %v10169_v35  ;;  %v10180_v52 = vld [vmem:[#allocation46_spill] sm:$0xff]  ;;  %v10205_v35 = vld [vmem:[#allocation71_spill] sm:$0xff] }
0x1b12   :  { %6814 = vmatpush3.msra.mxu0 %v10170_v36  ;;  %6792 = vmatpush3.msra.mxu1 %v10171_v38  ;;  %v10206_v36 = vld [vmem:[#allocation72_spill] sm:$0xff]  ;;  %v10207_v38 = vld [vmem:[#allocation75_spill] sm:$0xff] }
0x1b13   :  { %6815 = vmatprep.subr.mxu0 %v10172_v53  ;;  %6793 = vmatprep.subr.mxu1 %v10173_v63  ;;  %v5396_v53 = vpop.f32.mrf.mxu1 }
0x1b14   :  { %6816 = vmatpush3.msra.mxu0 %v10174_v9  ;;  %6794 = vmatpush3.msra.mxu1 %v10175_v14 }
0x1b15   :  { %6817 = vmatprep.subr.mxu0 %v10176_v22  ;;  %6795 = vmatprep.subr.mxu1 %v10177_v30  ;;  %v5398_v63 = vpop.f32.mrf.mxu1  ;;  %v5656_v22 = vld [vmem:[%s9704_s14] sm:$0xf]  ;;  %s7241_s14 = smov [#allocation2]  }
0x1b16   :  { %6818 = vmatpush3.msra.mxu0 %v10178_v57  ;;  %6796 = vmatpush3.msra.mxu1 %v10179_v21  ;;  %v5686_v30 = vld [vmem:[%s9705_s15] sm:$0xf]  ;;  %v10208_v57 = vld [vmem:[#allocation73_spill] sm:$0xff]  ;;  %s6253_s15 = sshll.u32 %s7241_s14, 4  ;;  %s6254_s15 = int_to_ptr.vmem [resolvable:$true] %s6253_s15 }
0x1b17   :  { %6819 = vmatprep.subr.mxu0 %v10180_v52  ;;  %6797 = vmatprep.subr.mxu1 %v10181_v43  ;;  %v5402_v9 = vpop.f32.mrf.mxu1  ;;  %v5661_v21 = vrot.slane %v5656_v22, %v10208_v57  ;;  %s7214_s13 = scalar_lea.vmem %s6254_s15, 64  ;;  %p7219_p1 = scmp.lt.s32.totalorder %s6254_s15, %s6254_s15 }
0x1b18   :  { %6820 = vmatpush3.msra.mxu0 %v10182_v4  ;;  %6798 = vmatpush3.msra.mxu1 %v10183_v62  ;;  %v5691_v4 = vrot.slane %v5686_v30, %v10208_v57  ;;  %v10209_v62 = vld [vmem:[#allocation74_spill] sm:$0xff]  ;;  %p7215_p0 = scmp.ne.s32.totalorder %s6254_s15, %s7214_s13  ;;  %p7220_p2 = scmp.lt.s32.totalorder %s7214_s13, %s7214_s13 }
0x1b19   :  { %6821 = vmatprep.subr.mxu0 %v10184_v17  ;;  %6799 = vmatprep.subr.mxu1 %v10185_v13  ;;  %v5404_v14 = vpop.f32.mrf.mxu1  ;;  %v5665_v17 = vrot.slane %v5656_v22, %v10209_v62 }
0x1b1a   :  { %6822 = vmatpush3.msra.mxu0 %v10186_v42  ;;  %6800 = vmatpush3.msra.mxu1 %v10187_v7  ;;  %p7221_p3 = por %p7220_p2, %p7219_p1 }
0x1b1b   :  { %6823 = vmatprep.subr.mxu0 %v10188_v24  ;;  %6801 = vmatprep.subr.mxu1 %v10189_v18  ;;  %v5695_v24 = vrot.slane %v5686_v30, %v10209_v62 }
0x1b1c   :  { %6824 = vmatpush3.msra.mxu0 %v10190_v49  ;;  %6802 = vmatpush3.msra.mxu1 %v10191_v46  ;;  %p7222_p4 = pnand %p7221_p3, %p7215_p0 }
0x1b1d   :  { %6825 = vmatprep.subr.mxu0 %v10192_v40  ;;  %7125 = vmatprep.subr.mxu1 %v9971_v1 }
0x1b1e   :  { %6826 = vmatpush3.msra.mxu0 %v10193_v8 }
0x1b1f   :  { %6827 = vmatprep.subr.mxu0 %v10194_v45 }
0x1b20   :  { %6828 = vmatpush3.msra.mxu0 %v10195_v55 }
0x1b21   :  { %6829 = vmatprep.subr.mxu0 %v10196_v28 }
0x1b22   :  { %6830 = vmatpush3.msra.mxu0 %v10197_v50 }
0x1b23   :  { %6831 = vmatprep.subr.mxu0 %v10198_v37 }
0x1b24   :  { %6832 = vmatpush3.msra.mxu0 %v10199_v26 }
0x1b25   :  { %6833 = vmatprep.subr.mxu0 %v10200_v11 }
0x1b26   :  { %6834 = vmatpush3.msra.mxu0 %v10201_v6 }
0x1b27   :  { %6835 = vmatprep.subr.mxu0 %v10202_v0 }
0x1b28   :  { %6836 = vmatpush3.msra.mxu0 %v10203_v33 }
0x1b29   :  { %6837 = vmatprep.subr.mxu0 %v10204_v19 }
0x1b2a   :  { %6838 = vmatpush3.msra.mxu0 %v10205_v35 }
0x1b2b   :  { %6839 = vmatprep.subr.mxu0 %v10206_v36 }
0x1b2c   :  { %6840 = vmatpush3.msra.mxu0 %v10207_v38 }
0x1b2d   :  { %7144 = vmatprep.subr.mxu0 %v9971_v1 }
0x1bb9   :  { %v5568_v52 = vpop.f32.mrf.mxu1 }
0x1bba   :  { %v5569_v43 = vadd.f32 %v5568_v52, %v5396_v53 }
0x1bbb   :  { %v5570_v13 = vpop.f32.mrf.mxu1 }
0x1bbc   :  { %v5678_v42 = vmul.f32 %v5661_v21, %v5569_v43  ;;  %v5571_v7 = vadd.f32 %v5570_v13, %v5398_v63  ;;  %v5673_v63 = vrot.slane %v5656_v22, %v8090_v23 }
0x1bbd   :  { %v5574_v18 = vpop.f32.mrf.mxu1 }
0x1bbe   :  { %v5708_v49 = vadd.f32 %v5691_v4, %v5678_v42  ;;  %v5679_v46 = vmul.f32 %v5665_v17, %v5571_v7  ;;  %v5575_v40 = vadd.f32 %v5574_v18, %v5402_v9 }
0x1bbf   :  { %v5576_v8 = vpop.f32.mrf.mxu1 }
0x1bc0   :  { %v5682_v45 = vmul.f32 %v5661_v21, %v5575_v40  ;;  %v5577_v55 = vadd.f32 %v5576_v8, %v5404_v14  ;;  %v5709_v28 = vadd.f32 %v5695_v24, %v5679_v46  ;;  %v5716_v50 = vmax.f32 %v5708_v49, 0.0 }
0x1bc1   :  { %v5703_v21 = vrot.slane %v5686_v30, %v8090_v23 }
0x1bc2   :  { %v5683_v37 = vmul.f32 %v5665_v17, %v5577_v55  ;;  %v5717_v26 = vmax.f32 %v5709_v28, 0.0  ;;  %v5712_v11 = vadd.f32 %v5691_v4, %v5682_v45 }
0x1bc4   :  { %5852 = vmatprep.mubr.f32.mxu1 %v5717_v26  ;;  %v5713_v6 = vadd.f32 %v5695_v24, %v5683_v37  ;;  %v5720_v33 = vmax.f32 %v5712_v11, 0.0 }
0x1bc5   :  { %v5473_v0 = vpop.f32.mrf.mxu0  ;;  %5853 = vmatmul.mubr.f32.vlgmr.msra.gmra.mxu1 %v5716_v50 }
0x1bc6   :  { %v5721_v19 = vmax.f32 %v5713_v6, 0.0  ;;  %7126 = vmatpush3.msra.mxu1 %v9278_v61  ;;  %v5669_v61 = vrot.slane %v5656_v22, %v8087_v60 }
0x1bc7   :  { %v5475_v35 = vpop.f32.mrf.mxu0  ;;  %7127 = vmatprep.subr.mxu1 %v9971_v1 }
0x1bc8   :  { %5857 = vmatprep.mubr.f32.mxu1 %v5721_v19  ;;  %7128 = vmatpush3.msra.mxu1 %v9285_v56 }
0x1bc9   :  { %v5479_v36 = vpop.f32.mrf.mxu0  ;;  %5858 = vmatmul.mubr.f32.gmra.mxu1 %v5720_v33  ;;  %7129 = vmatprep.subr.mxu1 %v9971_v1 }
0x1bca   :  { %7130 = vmatpush3.msra.mxu1 %v9292_v32  ;;  %7141 = vmatprep.mubr.msk.f32.mxu1 %vm7237_vm2, %v9971_v1  ;;  %v5699_v32 = vrot.slane %v5686_v30, %v8087_v60 }
0x1bcb   :  { %v5481_v38 = vpop.f32.mrf.mxu0  ;;  %7131 = vmatprep.subr.mxu1 %v9971_v1 }
0x1bcc   :  { %7132 = vmatpush3.msra.mxu1 %v9299_v39 }
0x1bcd   :  { %v5645_v53 = vpop.f32.mrf.mxu0  ;;  %7133 = vmatprep.subr.mxu1 %v9971_v1 }
0x1bce   :  { %v5646_v56 = vadd.f32 %v5645_v53, %v5473_v0  ;;  %7134 = vmatpush3.msra.mxu1 %v9306_v58 }
0x1bcf   :  { %v5647_v9 = vpop.f32.mrf.mxu0  ;;  %7135 = vmatprep.subr.mxu1 %v9971_v1 }
0x1bd0   :  { %v5680_v14 = vmul.f32 %v5669_v61, %v5646_v56  ;;  %v5648_v57 = vadd.f32 %v5647_v9, %v5475_v35  ;;  %7136 = vmatpush3.msra.mxu1 %v9313_v47 }
0x1bd1   :  { %v5651_v39 = vpop.f32.mrf.mxu0  ;;  %7137 = vmatprep.subr.mxu1 %v9971_v1 }
0x1bd2   :  { %v5681_v52 = vmul.f32 %v5673_v63, %v5648_v57  ;;  %v5652_v43 = vadd.f32 %v5651_v39, %v5479_v36  ;;  %7138 = vmatpush3.msra.mxu1 %v9320_v34  ;;  %v5710_v22 = vadd.f32 %v5699_v32, %v5680_v14 }
0x1bd3   :  { %v5653_v58 = vpop.f32.mrf.mxu0  ;;  %7139 = vmatprep.subr.mxu1 %v9971_v1 }
0x1bd4   :  { %v5684_v60 = vmul.f32 %v5669_v61, %v5652_v43  ;;  %v5654_v4 = vadd.f32 %v5653_v58, %v5481_v38  ;;  %v5711_v62 = vadd.f32 %v5703_v21, %v5681_v52  ;;  %7140 = vmatpush3.msra.mxu1 %v9327_v25  ;;  %v5718_v30 = vmax.f32 %v5710_v22, 0.0  ;;  %v10210_v25 = vld [vmem:[#allocation76_spill] sm:$0xff] }
0x1bd6   :  { %v5685_v17 = vmul.f32 %v5673_v63, %v5654_v4  ;;  %v5719_v23 = vmax.f32 %v5711_v62, 0.0  ;;  %v5714_v47 = vadd.f32 %v5699_v32, %v5684_v60 }
0x1bd8   :  { %5927 = vmatprep.mubr.f32.mxu0 %v5719_v23  ;;  %v5715_v13 = vadd.f32 %v5703_v21, %v5685_v17  ;;  %v5722_v34 = vmax.f32 %v5714_v47, 0.0 }
0x1bd9   :  { %5928 = vmatmul.mubr.f32.vlgmr.msra.gmra.mxu0 %v5718_v30 }
0x1bda   :  { %7145 = vmatpush3.msra.mxu0 %v9244_v5  ;;  %v5723_v42 = vmax.f32 %v5715_v13, 0.0  ;;  %v10211_v5 = vld [vmem:[#allocation77_spill] sm:$0xff] }
0x1bdb   :  { %7146 = vmatprep.subr.mxu0 %v9971_v1 }
0x1bdc   :  { %5932 = vmatprep.mubr.f32.mxu0 %v5723_v42  ;;  %7147 = vmatpush3.msra.mxu0 %v9249_v41  ;;  %v10212_v41 = vld [vmem:[#allocation78_spill] sm:$0xff] }
0x1bdd   :  { %5933 = vmatmul.mubr.f32.gmra.mxu0 %v5722_v34  ;;  %7148 = vmatprep.subr.mxu0 %v9971_v1 }
0x1bde   :  { %7149 = vmatpush3.msra.mxu0 %v9256_v20  ;;  %7152 = vmatprep.mubr.msk.f32.mxu0 %vm7237_vm2, %v9971_v1  ;;  %v10213_v20 = vld [vmem:[#allocation79_spill] sm:$0xff] }
0x1bdf   :  { %7150 = vmatprep.subr.mxu0 %v9971_v1 }
0x1be0   :  { %7151 = vmatpush3.msra.mxu0 %v10210_v25 }
0x1be1   :  { %7153 = vmatmul.mubr.msk.f32.vlgmr.msra.gmra.mxu0 %vm95_vm3, %v9481_v44  ;;  %7155 = vmatprep.subr.mxu0 %v9971_v1 }
0x1be2   :  { %7156 = vmatpush3.msra.mxu0 %v10211_v5  ;;  %7171 = vmatprep.mubr.msk.f32.mxu0 %vm7237_vm2, %v9971_v1 }
0x1be3   :  { %7157 = vmatprep.subr.mxu0 %v9971_v1 }
0x1be4   :  { %7158 = vmatpush3.msra.mxu0 %v10212_v41 }
0x1be5   :  { %7159 = vmatprep.subr.mxu0 %v9971_v1 }
0x1be6   :  { %7160 = vmatpush3.msra.mxu0 %v10213_v20 }
0x1be7   :  { %7161 = vmatprep.subr.mxu0 %v9971_v1 }
0x1be8   :  { %7162 = vmatpush3.msra.mxu0 %v9392_v15 }
0x1be9   :  { %7163 = vmatprep.subr.mxu0 %v9971_v1 }
0x1bea   :  { %7164 = vmatpush3.msra.mxu0 %v9399_v16 }
0x1beb   :  { %7165 = vmatprep.subr.mxu0 %v9971_v1 }
0x1bec   :  { %7166 = vmatpush3.msra.mxu0 %v9406_v59 }
0x1bed   :  { %7167 = vmatprep.subr.mxu0 %v9971_v1 }
0x1bee   :  { %7168 = vmatpush3.msra.mxu0 %v9413_v3 }
0x1bef   :  { %7169 = vmatprep.subr.mxu0 %v9971_v1 }
0x1bf0   :  { %7170 = vmatpush3.msra.mxu0 %v9420_v54 }
0x1c85   :  { %v6803_v44 = vpop.f32.mrf.mxu1 }
0x1c87   :  { %v6804_v7 = vpop.f32.mrf.mxu1 }
0x1c88   :  { %v6805_v49 = vadd.f32 %v6804_v7, %v6803_v44 }
0x1c89   :  { %v6806_v24 = vpop.f32.mrf.mxu1 }
0x1c8b   :  { %v6807_v16 = vpop.f32.mrf.mxu1 }
0x1c8c   :  { %v6808_v59 = vadd.f32 %v6807_v16, %v6806_v24 }
0x1c99   :  { %v6841_v15 = vpop.f32.mrf.mxu0 }
0x1c9b   :  { %v6842_v18 = vpop.f32.mrf.mxu0 }
0x1c9c   :  { %v6843_v46 = vadd.f32 %v6842_v18, %v6841_v15 }
0x1c9d   :  { %v6844_v40 = vpop.f32.mrf.mxu0 }
0x1c9e   :  { %v5930_v8 = vadd.f32 %v6843_v46, %v6805_v49 }
0x1c9f   :  { %v6845_v45 = vpop.f32.mrf.mxu0 }
0x1ca0   :  { %v5945_v55 = vmul.f32 %v9355_v12, %v5930_v8  ;;  %v6846_v28 = vadd.f32 %v6845_v45, %v6844_v40 }
0x1ca1   :  { %v6122_v3 = vpop.f32.mrf.mxu0 }
0x1ca2   :  { %v5954_v1 = vadd.f32 %v9360_v10, %v5945_v55  ;;  %v5935_v50 = vadd.f32 %v6846_v28, %v6808_v59 }
0x1ca3   :  { %v7154_v54 = vpop.f32.mrf.mxu0 }
0x1ca4   :  { %v5956_v37 = vmax.f32 %v5954_v1, 0.0  ;;  %v5946_v26 = vmul.f32 %v9355_v12, %v5935_v50 }
0x1ca6   :  { %v5960_v11 = vadd.f32 %v5956_v37, %v9367_v48  ;;  %v5955_v6 = vadd.f32 %v9360_v10, %v5946_v26 }
0x1ca8   :  { %v5957_v0 = vmax.f32 %v5955_v6, 0.0  ;;  %v5963_v33 = vrot.slane %v5960_v11, 4 }
0x1caa   :  { %v5961_v19 = vadd.f32 %v5957_v0, %v9375_v51  ;;  %v5965_v36 = vmax.f32 %v5960_v11, %v5963_v33 }
0x1cac   :  { %v5967_v35 = vrot.slane %v5961_v19, 4 }
0x1cae   :  { %v5969_v38 = vmax.f32 %v5961_v19, %v5967_v35 }
0x1cb0   :  { %v5970_v61 = vmax.f32 %v5965_v36, %v5969_v38 }
0x1cb2   :  { %7142 = vmatmul.mubr.msk.f32.vlgmr.msra.gmra.mxu1 %vm1377_vm7, %v5970_v61 }
0x1d72   :  { %v6052_v53 = vpop.f32.mrf.mxu1 }
0x1d73   :  { %v6123_v56 = vadd.f32 %v6122_v3, %v6052_v53 }
0x1d74   :  { %v7143_v63 = vpop.f32.mrf.mxu1 }
0x1d75   :  { %v6133_v32 = vmul.f32 %v9427_v29, %v6123_v56 }
0x1d77   :  { %v6141_v12 = vadd.f32 %v9432_v31, %v6133_v32 }
0x1d79   :  { %v6142_v48 = vmax.f32 %v6141_v12, 0.0 }
0x1d7b   :  { %7172 = vmatmul.mubr.msk.f32.vlgmr.msra.gmra.mxu0 %vm1377_vm7, %v6142_v48 }
0x1e3b   :  { %v6220_v10 = vpop.f32.mrf.mxu0 }
0x1e3c   :  { %v6231_v9 = vmul.f32 %v9450_v2, %v6220_v10 }
0x1e3d   :  { %v7173_v51 = vpop.f32.mrf.mxu0 }
0x1e3e   :  { %v6239_v14 = vadd.f32 %v9455_v27, %v6231_v9 }
0x1e40   :  { %v6240_v57 = vmax.f32 %v6239_v14, 0.0 }
0x1e42   :  { %6244 = vst.msk [vmem:[#allocation2] sm:$0xf] %vm6243_vm8, %v6240_v57 }
0x1e43   :  { %7225 = shalt.err (!%p7222_p4)
}
0x1e44   :  { %s10214_s10 = sld [smem:[#allocation92_spill]] }
0x1e4a   :  { %6256 = dma.vmem_to_hbm [thread:$0]  %s6254_s15, 64, %s10214_s10, [#allocation3]  }
0x1e4b   :  { %7234 = dma.done.wait [#allocation3], 64  }
0x1e4c   :  { %7235 = vsyncadd [#allocation3], 4294967232 }
0x1e4d   :  { %6262 = vsyncpa [#allocation3], 1 }

</bundles_post_ra>
